<compile_context>
chip_gen: v5e
topology: v5e:2x2
jax: 0.10.0
libtpu: 0.0.40
codegen_flags: <defaults>
</compile_context>

<pallas_src>
import jax
import jax.numpy as jnp
from jax.experimental import pallas as pl
from jax.experimental.pallas import tpu as pltpu


def _pointnet_feat_kernel(x_ref,
                          w1, b1, w2, b2, w3, b3, w4, b4, w5, b5,
                          local_ref, global_ref):
    bb, tn, _ = x_ref.shape
    m = bb * tn
    ep = b1.dtype                               # epilogue dtype: bf16 (v6e/v7x) or f32 (<=v5)
    # Leading-dim merge only (tn % 128 == 0), no lane relayout.
    x = x_ref[...].reshape(m, 3)                # f32 (M, 3)

    # --- mlp1 layer 1: Conv1d(3,64,1)+BN+ReLU ---
    # K=3 would waste >95% of an MXU pass; compute it on the VPU instead.
    w1v = w1[...]                               # (3, 64) f32
    acc = (x[:, 0:1] * w1v[0:1, :]
           + x[:, 1:2] * w1v[1:2, :]
           + x[:, 2:3] * w1v[2:3, :])           # (M, 64) f32
    h = jnp.maximum(acc.astype(ep) + b1[...], 0)                       # (M, 64) ep

    # --- mlp1 layer 2: Conv1d(64,64,1)+BN+ReLU (bf16 MXU operands, f32 accumulation,
    #     epilogue in `ep`) ---
    h = jnp.dot(h.astype(w2.dtype), w2[...],
                preferred_element_type=jnp.float32).astype(ep)
    h = jnp.maximum(h + b2[...], 0)                                    # (M, 64) ep

    # local_feature: lane-dense PyTorch [B, 64, N] layout, stored bf16.
    local_ref[...] = jnp.transpose(
        h.astype(local_ref.dtype).reshape(bb, tn, 64), (0, 2, 1))      # (bb, 64, tn)

    # --- mlp2: Conv1d(64,64,1)+BN+ReLU, Conv1d(64,128,1)+BN+ReLU,
    #           Conv1d(128,1024,1)+BN+ReLU ---
    g = jnp.dot(h.astype(w3.dtype), w3[...],
                preferred_element_type=jnp.float32).astype(ep)
    g = jnp.maximum(g + b3[...], 0)                                    # (M, 64)
    g = jnp.dot(g.astype(w4.dtype), w4[...],
                preferred_element_type=jnp.float32).astype(ep)
    g = jnp.maximum(g + b4[...], 0)                                    # (M, 128)
    g = jnp.dot(g.astype(w5.dtype), w5[...],
                preferred_element_type=jnp.float32).astype(ep)
    g = jnp.maximum(g + b5[...], 0)                                    # (M, 1024)

    # Per-tile max over the point rows (exact in bf16), accumulated in f32.
    tile_max = jnp.max(g.reshape(bb, tn, 1024), axis=1).astype(jnp.float32)   # (bb, 1024)

    # Global max-pool accumulated across the points grid axis (torch.max(x, 2)[0]).
    @pl.when(pl.program_id(1) == 0)
    def _():
        global_ref[...] = jnp.full(global_ref.shape, -jnp.inf, dtype=global_ref.dtype)

    global_ref[...] = jnp.maximum(global_ref[...], tile_max[:, None, :])


def _epilogue_dtype():
    """bf16 bias-add/ReLU epilogues on chips with a bf16 VPU (v6e/v7x); f32 on <=v5."""
    try:
        kind = jax.devices()[0].device_kind.lower()
    except Exception:
        kind = ""
    if any(v in kind for v in ("v2", "v3", "v4", "v5")):
        return jnp.float32
    return jnp.bfloat16


def _choose_tiles(B, N):
    """Pick (batch fold bb, points tile, padded N).

    Targets: M = bb*tile_n in ~[512, 1024] (amortize ~0.35us/grid-step, feed the 2x256
    MXUs), tile_n bounded (never N) so the activation chain is a few MiB regardless of N
    (v7x 64 MiB VMEM), and >= 2 steps on the parallel batch axis (v7x megacore).
    """
    n128 = max(128, -(-N // 128) * 128)
    tile_n = n128 if n128 <= 1024 else 512
    n_pad = -(-N // tile_n) * tile_n
    bb = 1
    max_bb = B // 2 if B >= 2 else 1          # keep >= 2 parallel grid steps when B >= 2
    while bb * 2 <= max_bb and B % (bb * 2) == 0 and bb * tile_n < 512:
        bb *= 2
    return bb, tile_n, n_pad


def _vmem_limit_bytes(bb, tile_n, params):
    """Rough VMEM footprint of the chosen tiles, doubled for headroom, <= 32 MiB."""
    m = bb * tile_n
    ep_bytes = params[0][1].dtype.itemsize
    inp = 2 * bb * tile_n * 128 * 4                            # 3-wide lane dim pads to 128
    wb = 2 * sum(int(w.size) * w.dtype.itemsize + 8 * int(w.shape[-1]) * b.dtype.itemsize
                 for w, b in params)                           # resident, double-buffered
    outs = 2 * (bb * 64 * tile_n * 2 + bb * 8 * 1024 * 4)      # local (bf16) + global blocks
    acts = (m * 1024 * 4                                       # layer-5 f32 dot result
            + m * (1024 + 128 + 64 + 64 + 64) * ep_bytes       # ep activation chain
            + m * 64 * 4)                                      # layer-1 f32 accumulator
    est = inp + wb + outs + acts
    return max(24 * 1024 * 1024, min(32 * 1024 * 1024, 2 * est))


def pointnet_feat(pointcloud, params):
    """pointcloud: [B, N, 3] float32.
    Returns (global_feature[B,1024] f32, local_feature[B,64,N] bf16, None, None)."""
    B, N, _ = pointcloud.shape
    (w1, b1), (w2, b2), (w3, b3), (w4, b4), (w5, b5) = params
    bb, tile_n, n_pad = _choose_tiles(B, N)

    if n_pad != N:
        # Pad the points axis with copies of the last point: duplicate points leave the
        # global max-pool unchanged; padded local-feature columns are sliced off below.
        pointcloud = jnp.pad(pointcloud, ((0, 0), (0, n_pad - N), (0, 0)), mode="edge")

    def full_spec(arr):
        nd = arr.ndim
        return pl.BlockSpec(arr.shape, lambda b, n, _nd=nd: (0,) * _nd)

    in_specs = [pl.BlockSpec((bb, tile_n, 3), lambda b, n: (b, n, 0))]
    for w, bias in params:
        in_specs.append(full_spec(w))
        in_specs.append(full_spec(bias))

    flops = 2 * B * n_pad * (3 * 64 + 64 * 64 + 64 * 64 + 64 * 128 + 128 * 1024)
    weight_bytes = sum(int(w.size) * w.dtype.itemsize + int(bi.size) * bi.dtype.itemsize
                       for w, bi in params)
    bytes_accessed = (B * n_pad * 3 * 4          # input
                      + B * 64 * n_pad * 2       # local_feature out (bf16)
                      + B * 1024 * 4             # global_feature out
                      + weight_bytes)
    cost = pl.CostEstimate(flops=flops, transcendentals=0, bytes_accessed=bytes_accessed)

    local, glob = pl.pallas_call(
        _pointnet_feat_kernel,
        out_shape=(jax.ShapeDtypeStruct((B, 64, n_pad), jnp.bfloat16),
                   jax.ShapeDtypeStruct((B, 1, 1024), jnp.float32)),
        grid=(B // bb, n_pad // tile_n),
        in_specs=in_specs,
        out_specs=(pl.BlockSpec((bb, 64, tile_n), lambda b, n: (b, 0, n)),
                   pl.BlockSpec((bb, 1, 1024), lambda b, n: (b, 0, 0))),
        compiler_params=pltpu.CompilerParams(
            dimension_semantics=("parallel", "arbitrary"),
            vmem_limit_bytes=_vmem_limit_bytes(bb, tile_n, params)),
        cost_estimate=cost,
    )(pointcloud, w1, b1, w2, b2, w3, b3, w4, b4, w5, b5)

    global_feature = glob[:, 0, :]          # [B, 1024] f32
    local_feature = local[:, :, :N]         # [B, 64, N] bf16, PyTorch layout
    return global_feature, local_feature, None, None


def make_params(key, *, epilogue_dtype=jnp.bfloat16):
    """Deterministically init Conv1d + BatchNorm1d params and fold BN (eval mode).

    Layer-1 weight stays f32 (VPU path); layers 2-5 weights are bf16 MXU operands;
    biases are stored in the epilogue dtype."""
    eps = 1e-5
    layer_dims = [(3, 64), (64, 64), (64, 64), (64, 128), (128, 1024)]
    params = []
    for idx, (cin, cout) in enumerate(layer_dims):
        key, kw, kb, kg, kbt, km, kv = jax.random.split(key, 7)
        # Conv1d(cin, cout, 1): weight [cout, cin, 1] -> use [cout, cin]
        w = jax.random.normal(kw, (cout, cin), jnp.float32) * 0.1
        b = jax.random.normal(kb, (cout,), jnp.float32) * 0.1
        # BatchNorm1d(cout) params / running stats
        gamma = 1.0 + 0.1 * jax.random.normal(kg, (cout,), jnp.float32)
        beta = 0.1 * jax.random.normal(kbt, (cout,), jnp.float32)
        run_mean = 0.1 * jax.random.normal(km, (cout,), jnp.float32)
        run_var = 0.5 + jnp.abs(jax.random.normal(kv, (cout,), jnp.float32))
        # Fold BN: y = scale*(x@W^T + b - mean) + beta
        scale = gamma / jnp.sqrt(run_var + eps)
        w_eff = (w * scale[:, None]).T                   # [cin, cout] for x @ W
        b_eff = (scale * (b - run_mean) + beta)[None]    # [1, cout]
        if idx > 0:
            w_eff = w_eff.astype(jnp.bfloat16)           # bf16 MXU operand
        params.append((w_eff, b_eff.astype(epilogue_dtype)))
    return params


def pointnet_feat_ref(pointcloud, params):
    """Pure-JAX reference of the same folded-BN forward pass, matching the kernel's
    operand/epilogue dtypes."""
    ep = params[0][1].dtype
    h = pointcloud
    local = None
    for i, (w, b) in enumerate(params):
        acc = jnp.einsum('bnc,co->bno', h.astype(w.dtype), w,
                         preferred_element_type=jnp.float32)
        h = jnp.maximum(acc.astype(ep) + b, 0)
        if i == 1:
            local = h
    global_feature = jnp.max(h, axis=1).astype(jnp.float32)
    local = jnp.transpose(local, (0, 2, 1)).astype(jnp.bfloat16)
    return global_feature, local


if __name__ == "__main__":
    key = jax.random.PRNGKey(0)
    key, kx = jax.random.split(key)
    B, N = 2, 128
    pointcloud = jax.random.normal(kx, (B, N, 3), jnp.float32)

    params = make_params(key, epilogue_dtype=_epilogue_dtype())

    global_feat, local_feat, t_in, t_feat = pointnet_feat(pointcloud, params)
    jax.block_until_ready((global_feat, local_feat))

    # sanity check against pure-JAX reference (bf16 operands/epilogues -> loose tol)
    g_ref, l_ref = pointnet_feat_ref(pointcloud, params)
    assert global_feat.shape == (B, 1024)
    assert local_feat.shape == (B, 64, N)
    assert t_in is None and t_feat is None
    assert jnp.allclose(global_feat, g_ref, atol=3e-2, rtol=3e-2)
    assert jnp.allclose(local_feat.astype(jnp.float32), l_ref.astype(jnp.float32),
                        atol=3e-2, rtol=3e-2)

    print("KERNEL_OK")
</pallas_src>

<mosaic_0001>
module attributes {stable_mosaic.version = 11 : i64} {
  func.func @_pointnet_feat_kernel(%arg0: i32, %arg1: i32, %arg2: memref<1x128x3xf32, #tpu.memory_space<vmem>>, %arg3: memref<3x64xf32, #tpu.memory_space<vmem>>, %arg4: memref<1x64xbf16, #tpu.memory_space<vmem>>, %arg5: memref<64x64xbf16, #tpu.memory_space<vmem>>, %arg6: memref<1x64xbf16, #tpu.memory_space<vmem>>, %arg7: memref<64x64xbf16, #tpu.memory_space<vmem>>, %arg8: memref<1x64xbf16, #tpu.memory_space<vmem>>, %arg9: memref<64x128xbf16, #tpu.memory_space<vmem>>, %arg10: memref<1x128xbf16, #tpu.memory_space<vmem>>, %arg11: memref<128x1024xbf16, #tpu.memory_space<vmem>>, %arg12: memref<1x1024xbf16, #tpu.memory_space<vmem>>, %arg13: memref<1x64x128xbf16, #tpu.memory_space<vmem>>, %arg14: memref<1x1x1024xf32, #tpu.memory_space<vmem>>) attributes {dimension_semantics = [#tpu.dimension_semantics<parallel>, #tpu.dimension_semantics<arbitrary>], iteration_bounds = array<i64: 2, 1>, scalar_prefetch = 0 : i64, scratch_operands = 0 : i64, tpu.core_type = #tpu.core_type<tc>, window_params = [{transform_indices = @transform_0, window_bounds = array<i64: 1, 128, 3>}, {pipeline_mode = #tpu.pipeline_mode<synchronous>, transform_indices = @transform_1, window_bounds = array<i64: 3, 64>}, {pipeline_mode = #tpu.pipeline_mode<synchronous>, transform_indices = @transform_2, window_bounds = array<i64: 1, 64>}, {pipeline_mode = #tpu.pipeline_mode<synchronous>, transform_indices = @transform_3, window_bounds = array<i64: 64, 64>}, {pipeline_mode = #tpu.pipeline_mode<synchronous>, transform_indices = @transform_4, window_bounds = array<i64: 1, 64>}, {pipeline_mode = #tpu.pipeline_mode<synchronous>, transform_indices = @transform_5, window_bounds = array<i64: 64, 64>}, {pipeline_mode = #tpu.pipeline_mode<synchronous>, transform_indices = @transform_6, window_bounds = array<i64: 1, 64>}, {pipeline_mode = #tpu.pipeline_mode<synchronous>, transform_indices = @transform_7, window_bounds = array<i64: 64, 128>}, {pipeline_mode = #tpu.pipeline_mode<synchronous>, transform_indices = @transform_8, window_bounds = array<i64: 1, 128>}, {pipeline_mode = #tpu.pipeline_mode<synchronous>, transform_indices = @transform_9, window_bounds = array<i64: 128, 1024>}, {pipeline_mode = #tpu.pipeline_mode<synchronous>, transform_indices = @transform_10, window_bounds = array<i64: 1, 1024>}, {transform_indices = @transform_11, window_bounds = array<i64: 1, 64, 128>}, {transform_indices = @transform_12, window_bounds = array<i64: 1, 1, 1024>}]} {
    %c0 = arith.constant 0 : index
    %c0_0 = arith.constant 0 : index
    %c0_1 = arith.constant 0 : index
    %0 = vector.load %arg2[%c0, %c0_0, %c0_1] : memref<1x128x3xf32, #tpu.memory_space<vmem>>, vector<1x128x3xf32>
    %1 = vector.shape_cast %0 : vector<1x128x3xf32> to vector<128x3xf32>
    %c0_2 = arith.constant 0 : index
    %c0_3 = arith.constant 0 : index
    %2 = vector.load %arg3[%c0_2, %c0_3] : memref<3x64xf32, #tpu.memory_space<vmem>>, vector<3x64xf32>
    %3 = vector.extract_strided_slice %1 {offsets = [0, 0], sizes = [128, 1], strides = [1, 1]} : vector<128x3xf32> to vector<128x1xf32>
    %4 = vector.extract_strided_slice %2 {offsets = [0, 0], sizes = [1, 64], strides = [1, 1]} : vector<3x64xf32> to vector<1x64xf32>
    %5 = vector.broadcast %3 : vector<128x1xf32> to vector<128x64xf32>
    %6 = vector.broadcast %4 : vector<1x64xf32> to vector<128x64xf32>
    %7 = arith.mulf %5, %6 : vector<128x64xf32>
    %8 = vector.extract_strided_slice %1 {offsets = [0, 1], sizes = [128, 1], strides = [1, 1]} : vector<128x3xf32> to vector<128x1xf32>
    %9 = vector.extract_strided_slice %2 {offsets = [1, 0], sizes = [1, 64], strides = [1, 1]} : vector<3x64xf32> to vector<1x64xf32>
    %10 = vector.broadcast %8 : vector<128x1xf32> to vector<128x64xf32>
    %11 = vector.broadcast %9 : vector<1x64xf32> to vector<128x64xf32>
    %12 = arith.mulf %10, %11 : vector<128x64xf32>
    %13 = arith.addf %7, %12 : vector<128x64xf32>
    %14 = vector.extract_strided_slice %1 {offsets = [0, 2], sizes = [128, 1], strides = [1, 1]} : vector<128x3xf32> to vector<128x1xf32>
    %15 = vector.extract_strided_slice %2 {offsets = [2, 0], sizes = [1, 64], strides = [1, 1]} : vector<3x64xf32> to vector<1x64xf32>
    %16 = vector.broadcast %14 : vector<128x1xf32> to vector<128x64xf32>
    %17 = vector.broadcast %15 : vector<1x64xf32> to vector<128x64xf32>
    %18 = arith.mulf %16, %17 : vector<128x64xf32>
    %19 = arith.addf %13, %18 : vector<128x64xf32>
    %20 = arith.truncf %19 : vector<128x64xf32> to vector<128x64xbf16>
    %c0_4 = arith.constant 0 : index
    %c0_5 = arith.constant 0 : index
    %21 = vector.load %arg4[%c0_4, %c0_5] : memref<1x64xbf16, #tpu.memory_space<vmem>>, vector<1x64xbf16>
    %22 = vector.broadcast %21 : vector<1x64xbf16> to vector<128x64xbf16>
    %23 = arith.addf %20, %22 : vector<128x64xbf16>
    %cst = arith.constant 0.000000e+00 : bf16
    %24 = vector.broadcast %cst : bf16 to vector<128x64xbf16>
    %25 = arith.maximumf %23, %24 : vector<128x64xbf16>
    %c0_6 = arith.constant 0 : index
    %c0_7 = arith.constant 0 : index
    %26 = vector.load %arg5[%c0_6, %c0_7] : memref<64x64xbf16, #tpu.memory_space<vmem>>, vector<64x64xbf16>
    %cst_8 = arith.constant dense<0.000000e+00> : vector<128x64xf32>
    %27 = tpu.matmul %25, %26, %cst_8 {dimension_numbers = #tpu.dot_dimension_numbers<[1], [0], [0], [1], [0, 0, 1, 1], [], []>} : vector<128x64xbf16>, vector<64x64xbf16>, vector<128x64xf32> -> vector<128x64xf32>
    %28 = arith.truncf %27 : vector<128x64xf32> to vector<128x64xbf16>
    %c0_9 = arith.constant 0 : index
    %c0_10 = arith.constant 0 : index
    %29 = vector.load %arg6[%c0_9, %c0_10] : memref<1x64xbf16, #tpu.memory_space<vmem>>, vector<1x64xbf16>
    %30 = vector.broadcast %29 : vector<1x64xbf16> to vector<128x64xbf16>
    %31 = arith.addf %28, %30 : vector<128x64xbf16>
    %cst_11 = arith.constant 0.000000e+00 : bf16
    %32 = vector.broadcast %cst_11 : bf16 to vector<128x64xbf16>
    %33 = arith.maximumf %31, %32 : vector<128x64xbf16>
    %34 = vector.shape_cast %33 : vector<128x64xbf16> to vector<1x128x64xbf16>
    %35 = tpu.transpose %34, [0, 2, 1] : vector<1x128x64xbf16> -> vector<1x64x128xbf16>
    %c0_12 = arith.constant 0 : index
    %c0_13 = arith.constant 0 : index
    %c0_14 = arith.constant 0 : index
    %36 = vector.load %arg13[%c0_12, %c0_13, %c0_14] : memref<1x64x128xbf16, #tpu.memory_space<vmem>>, vector<1x64x128xbf16>
    tpu.vector_store %arg13[%c0_12, %c0_13, %c0_14], %35 {strides = array<i32>} : memref<1x64x128xbf16, #tpu.memory_space<vmem>>, vector<1x64x128xbf16>,
    %c0_15 = arith.constant 0 : index
    %c0_16 = arith.constant 0 : index
    %37 = vector.load %arg7[%c0_15, %c0_16] : memref<64x64xbf16, #tpu.memory_space<vmem>>, vector<64x64xbf16>
    %cst_17 = arith.constant dense<0.000000e+00> : vector<128x64xf32>
    %38 = tpu.matmul %33, %37, %cst_17 {dimension_numbers = #tpu.dot_dimension_numbers<[1], [0], [0], [1], [0, 0, 1, 1], [], []>} : vector<128x64xbf16>, vector<64x64xbf16>, vector<128x64xf32> -> vector<128x64xf32>
    %39 = arith.truncf %38 : vector<128x64xf32> to vector<128x64xbf16>
    %c0_18 = arith.constant 0 : index
    %c0_19 = arith.constant 0 : index
    %40 = vector.load %arg8[%c0_18, %c0_19] : memref<1x64xbf16, #tpu.memory_space<vmem>>, vector<1x64xbf16>
    %41 = vector.broadcast %40 : vector<1x64xbf16> to vector<128x64xbf16>
    %42 = arith.addf %39, %41 : vector<128x64xbf16>
    %cst_20 = arith.constant 0.000000e+00 : bf16
    %43 = vector.broadcast %cst_20 : bf16 to vector<128x64xbf16>
    %44 = arith.maximumf %42, %43 : vector<128x64xbf16>
    %c0_21 = arith.constant 0 : index
    %c0_22 = arith.constant 0 : index
    %45 = vector.load %arg9[%c0_21, %c0_22] : memref<64x128xbf16, #tpu.memory_space<vmem>>, vector<64x128xbf16>
    %cst_23 = arith.constant dense<0.000000e+00> : vector<128x128xf32>
    %46 = tpu.matmul %44, %45, %cst_23 {dimension_numbers = #tpu.dot_dimension_numbers<[1], [0], [0], [1], [0, 0, 1, 1], [], []>} : vector<128x64xbf16>, vector<64x128xbf16>, vector<128x128xf32> -> vector<128x128xf32>
    %47 = arith.truncf %46 : vector<128x128xf32> to vector<128x128xbf16>
    %c0_24 = arith.constant 0 : index
    %c0_25 = arith.constant 0 : index
    %48 = vector.load %arg10[%c0_24, %c0_25] : memref<1x128xbf16, #tpu.memory_space<vmem>>, vector<1x128xbf16>
    %49 = vector.broadcast %48 : vector<1x128xbf16> to vector<128x128xbf16>
    %50 = arith.addf %47, %49 : vector<128x128xbf16>
    %cst_26 = arith.constant 0.000000e+00 : bf16
    %51 = vector.broadcast %cst_26 : bf16 to vector<128x128xbf16>
    %52 = arith.maximumf %50, %51 : vector<128x128xbf16>
    %c0_27 = arith.constant 0 : index
    %c0_28 = arith.constant 0 : index
    %53 = vector.load %arg11[%c0_27, %c0_28] : memref<128x1024xbf16, #tpu.memory_space<vmem>>, vector<128x1024xbf16>
    %cst_29 = arith.constant dense<0.000000e+00> : vector<128x1024xf32>
    %54 = tpu.matmul %52, %53, %cst_29 {dimension_numbers = #tpu.dot_dimension_numbers<[1], [0], [0], [1], [0, 0, 1, 1], [], []>} : vector<128x128xbf16>, vector<128x1024xbf16>, vector<128x1024xf32> -> vector<128x1024xf32>
    %55 = arith.truncf %54 : vector<128x1024xf32> to vector<128x1024xbf16>
    %c0_30 = arith.constant 0 : index
    %c0_31 = arith.constant 0 : index
    %56 = vector.load %arg12[%c0_30, %c0_31] : memref<1x1024xbf16, #tpu.memory_space<vmem>>, vector<1x1024xbf16>
    %57 = vector.broadcast %56 : vector<1x1024xbf16> to vector<128x1024xbf16>
    %58 = arith.addf %55, %57 : vector<128x1024xbf16>
    %cst_32 = arith.constant 0.000000e+00 : bf16
    %59 = vector.broadcast %cst_32 : bf16 to vector<128x1024xbf16>
    %60 = arith.maximumf %58, %59 : vector<128x1024xbf16>
    %61 = vector.shape_cast %60 : vector<128x1024xbf16> to vector<1x128x1024xbf16>
    %cst_33 = arith.constant dense<0xFF80> : vector<1x1024xbf16>
    %62 = vector.multi_reduction <maximumf>, %61, %cst_33 [1] : vector<1x128x1024xbf16> to vector<1x1024xbf16>
    %63 = arith.extf %62 : vector<1x1024xbf16> to vector<1x1024xf32>
    %c0_i32 = arith.constant 0 : i32
    %64 = arith.cmpi eq, %arg1, %c0_i32 : i32
    %65 = arith.extui %64 : i1 to i32
    %c0_i32_34 = arith.constant 0 : i32
    %66 = arith.cmpi ne, %65, %c0_i32_34 : i32
    scf.if %66 {
      %cst_41 = arith.constant 0xFF800000 : f32
      %71 = vector.broadcast %cst_41 : f32 to vector<1x1x1024xf32>
      %c0_42 = arith.constant 0 : index
      %c0_43 = arith.constant 0 : index
      %c0_44 = arith.constant 0 : index
      %72 = vector.load %arg14[%c0_42, %c0_43, %c0_44] : memref<1x1x1024xf32, #tpu.memory_space<vmem>>, vector<1x1x1024xf32>
      tpu.vector_store %arg14[%c0_42, %c0_43, %c0_44], %71 {strides = array<i32>} : memref<1x1x1024xf32, #tpu.memory_space<vmem>>, vector<1x1x1024xf32>,
    } else {
    }
    %c0_35 = arith.constant 0 : index
    %c0_36 = arith.constant 0 : index
    %c0_37 = arith.constant 0 : index
    %67 = vector.load %arg14[%c0_35, %c0_36, %c0_37] : memref<1x1x1024xf32, #tpu.memory_space<vmem>>, vector<1x1x1024xf32>
    %68 = vector.shape_cast %63 : vector<1x1024xf32> to vector<1x1x1024xf32>
    %69 = arith.maximumf %67, %68 : vector<1x1x1024xf32>
    %c0_38 = arith.constant 0 : index
    %c0_39 = arith.constant 0 : index
    %c0_40 = arith.constant 0 : index
    %70 = vector.load %arg14[%c0_38, %c0_39, %c0_40] : memref<1x1x1024xf32, #tpu.memory_space<vmem>>, vector<1x1x1024xf32>
    tpu.vector_store %arg14[%c0_38, %c0_39, %c0_40], %69 {strides = array<i32>} : memref<1x1x1024xf32, #tpu.memory_space<vmem>>, vector<1x1x1024xf32>,
    return
  }
  func.func @transform_0(%arg0: i32, %arg1: i32) -> (i32, i32, i32) {
    %c0_i32 = arith.constant 0 : i32
    %c0_i32_0 = arith.constant 0 : i32
    return %arg0, %arg1, %c0_i32 : i32, i32, i32
  }
  func.func @transform_1(%arg0: i32, %arg1: i32) -> (i32, i32) {
    %c0_i32 = arith.constant 0 : i32
    %c0_i32_0 = arith.constant 0 : i32
    %c0_i32_1 = arith.constant 0 : i32
    return %c0_i32, %c0_i32_0 : i32, i32
  }
  func.func @transform_2(%arg0: i32, %arg1: i32) -> (i32, i32) {
    %c0_i32 = arith.constant 0 : i32
    %c0_i32_0 = arith.constant 0 : i32
    %c0_i32_1 = arith.constant 0 : i32
    return %c0_i32, %c0_i32_0 : i32, i32
  }
  func.func @transform_3(%arg0: i32, %arg1: i32) -> (i32, i32) {
    %c0_i32 = arith.constant 0 : i32
    %c0_i32_0 = arith.constant 0 : i32
    %c0_i32_1 = arith.constant 0 : i32
    return %c0_i32, %c0_i32_0 : i32, i32
  }
  func.func @transform_4(%arg0: i32, %arg1: i32) -> (i32, i32) {
    %c0_i32 = arith.constant 0 : i32
    %c0_i32_0 = arith.constant 0 : i32
    %c0_i32_1 = arith.constant 0 : i32
    return %c0_i32, %c0_i32_0 : i32, i32
  }
  func.func @transform_5(%arg0: i32, %arg1: i32) -> (i32, i32) {
    %c0_i32 = arith.constant 0 : i32
    %c0_i32_0 = arith.constant 0 : i32
    %c0_i32_1 = arith.constant 0 : i32
    return %c0_i32, %c0_i32_0 : i32, i32
  }
  func.func @transform_6(%arg0: i32, %arg1: i32) -> (i32, i32) {
    %c0_i32 = arith.constant 0 : i32
    %c0_i32_0 = arith.constant 0 : i32
    %c0_i32_1 = arith.constant 0 : i32
    return %c0_i32, %c0_i32_0 : i32, i32
  }
  func.func @transform_7(%arg0: i32, %arg1: i32) -> (i32, i32) {
    %c0_i32 = arith.constant 0 : i32
    %c0_i32_0 = arith.constant 0 : i32
    %c0_i32_1 = arith.constant 0 : i32
    return %c0_i32, %c0_i32_0 : i32, i32
  }
  func.func @transform_8(%arg0: i32, %arg1: i32) -> (i32, i32) {
    %c0_i32 = arith.constant 0 : i32
    %c0_i32_0 = arith.constant 0 : i32
    %c0_i32_1 = arith.constant 0 : i32
    return %c0_i32, %c0_i32_0 : i32, i32
  }
  func.func @transform_9(%arg0: i32, %arg1: i32) -> (i32, i32) {
    %c0_i32 = arith.constant 0 : i32
    %c0_i32_0 = arith.constant 0 : i32
    %c0_i32_1 = arith.constant 0 : i32
    return %c0_i32, %c0_i32_0 : i32, i32
  }
  func.func @transform_10(%arg0: i32, %arg1: i32) -> (i32, i32) {
    %c0_i32 = arith.constant 0 : i32
    %c0_i32_0 = arith.constant 0 : i32
    %c0_i32_1 = arith.constant 0 : i32
    return %c0_i32, %c0_i32_0 : i32, i32
  }
  func.func @transform_11(%arg0: i32, %arg1: i32) -> (i32, i32, i32) {
    %c0_i32 = arith.constant 0 : i32
    %c0_i32_0 = arith.constant 0 : i32
    return %arg0, %c0_i32, %arg1 : i32, i32, i32
  }
  func.func @transform_12(%arg0: i32, %arg1: i32) -> (i32, i32, i32) {
    %c0_i32 = arith.constant 0 : i32
    %c0_i32_0 = arith.constant 0 : i32
    %c0_i32_1 = arith.constant 0 : i32
    return %arg0, %c0_i32, %c0_i32_0 : i32, i32, i32
  }
}

</mosaic_0001>

<bundles_post_ra>
// kernel: tpu_custom_call.1
= control target key start
LH: loop header
LB: loop body
LE: loop exit
PB: predicated region body
PF: predicated region fallthrough
CT: control target
= control target key end

     0   :  { %s5103_s0 = inlined_call_operand.vmem [shape: f32[2,128,3], index: 0, kind: input, shape index: {}]   ;;  %s5104_s1 = inlined_call_operand.vmem [shape: f32[3,64], index: 1, kind: input, shape index: {}]   ;;  %s5105_s2 = inlined_call_operand.vmem [shape: bf16[1,64], index: 2, kind: input, shape index: {}]   ;;  %s5106_s3 = inlined_call_operand.vmem [shape: bf16[64,64], index: 3, kind: input, shape index: {}]   ;;  %s5107_s4 = inlined_call_operand.vmem [shape: bf16[1,64], index: 4, kind: input, shape index: {}]   ;;  %s5108_s5 = inlined_call_operand.vmem [shape: bf16[64,64], index: 5, kind: input, shape index: {}]   ;;  %s5109_s6 = inlined_call_operand.vmem [shape: bf16[1,64], index: 6, kind: input, shape index: {}]   ;;  %s5110_s7 = inlined_call_operand.vmem [shape: bf16[64,128], index: 7, kind: input, shape index: {}]   ;;  %s5111_s8 = inlined_call_operand.vmem [shape: bf16[1,128], index: 8, kind: input, shape index: {}]   ;;  %s5112_s9 = inlined_call_operand.hbm [shape: bf16[128,1024], index: 9, kind: input, shape index: {}]   ;;  %s5113_s10 = inlined_call_operand.vmem [shape: bf16[1,1024], index: 10, kind: input, shape index: {}]   ;;  %s5114_s11 = inlined_call_operand.hbm [shape: bf16[2,64,128], index: 11, kind: output, shape index: {0}]   ;;  %s5115_s12 = inlined_call_operand.hbm [shape: f32[2,1,1024], index: 12, kind: output, shape index: {1}]  }
   0x1   :  { %5117 = sst [smem:[#allocation12_spill]] %s5103_s0 }
   0x2   :  { %5118 = sst [smem:[#allocation13_spill]] %s5104_s1 }
   0x3   :  { %5119 = sst [smem:[#allocation14_spill]] %s5105_s2 }
   0x4   :  { %5120 = sst [smem:[#allocation15_spill]] %s5106_s3 }
   0x5   :  { %18 = vsyncpa [#allocation3], 0 }
   0x6   :  { %19 = vsyncpa [#allocation4], 0 }
   0x7   :  { %21 = vsyncpa [#allocation4 + $0x1], 0 }
   0x8   :  { %22 = vsyncpa [#allocation7], 0 }
   0x9   :  { %24 = vsyncpa [#allocation7 + $0x1], 0  ;;  %s4444_s21 = smov 0   ;;  %s4446_s22 = smov 0  }
   0xa   :  { %s4448_s23 = smov 0   ;;  %s4450_s24 = smov 0  }
   0xb   :  { %s4452_s25 = smov 0   ;;  %s4454_s26 = smov 0  }
   0xc LB: > { %s3671_s27 = sadd.s32 4294967295, %s4369_s26   ;;  %s3672_s28 = sadd.s32 4294967294, %s4369_s26   ;;  %s4369_s26 = sphi %s4454_s26, %s30_s26   ;;  %s4365_s25 = sphi %s4452_s25, %s5133_s25   ;;  %s4361_s24 = sphi %s4450_s24, %s5132_s24   ;;  %s4357_s23 = sphi %s4448_s23, %s5131_s23   ;;  %s4353_s22 = sphi %s4446_s22, %s5130_s22   ;;  %s4349_s21 = sphi %s4444_s21, %s5129_s21  }
   0xd   : > { %s42_s29 = sadd.s32 1, %s4365_s25  ;;  %s289_s30 = sadd.s32 1, %s4357_s23 }
   0xe   : > { %p44_p0 = scmp.ge.s32.totalorder %s42_s29, 2  ;;  %p299_p1 = scmp.ne.s32.totalorder %s4357_s23, %s4353_s22 }
   0xf   : > { %p300_p2 = scmp.eq.s32.totalorder %s3671_s27, 1  ;;  %p305_p3 = scmp.ne.s32.totalorder %s4353_s22, %s4349_s21 }
  0x10   : > { %s5135_s29 = smov (%p44_p0, %s42_s29), 0  ;;  %p306_p5 = scmp.eq.s32.totalorder %s3672_s28, 1 }
  0x11   : > { %5121 = sst [smem:[#allocation11_spill]] %s5135_s29  ;;  %p4484_p4 = por %p300_p2, %p299_p1 }
  0x12   : > { %s284_s14 = ssub.s32 %s4365_s25, %s5135_s29  ;;  %p3673_p6 = scmp.ge.s32.totalorder %s4369_s26, 1 }
  0x13   : > { %p287_p7 = scmp.eq.s32.totalorder %s284_s14, 0  ;;  %p4491_p8 = por %p306_p5, %p305_p3 }
  0x14   : > { %p339_p9 = scmp.lt.s32.totalorder %s4369_s26, 3  ;;  %p4126_p11 = scmp.eq.s32.totalorder %s3671_s27, 0 }
  0x15   : > { %s4497_s16 = scalar_select %p287_p7, %s4357_s23, %s289_s30  }
  0x16   : > { %p340_p10 = pnand %p3673_p6, %p339_p9  ;;  %s374_s19 = sshll.u32 %s5112_s9, 4  ;;  %s375_s19 = int_to_ptr.hbm [resolvable:$true] %s374_s19 }
  0x17   : > { %s4371_s20 = smov [#allocation2]   ;;  %s4372_s14 = smov 512  }
  0x18   : > { %p4115_p12 = pneg %p340_p10  ;;  %s376_s28 = sshll.u32 %s4371_s20, 4  ;;  %s377_s28 = int_to_ptr.vmem [resolvable:$true] %s376_s28 }
  0x19   : > { %s4373_s29 = smov 32   ;;  %408 = sbr.rel (%p340_p10) target bundleno = 1078 (0x436), region = 64 }
  0x1a   : > { %p4116_p13 = pnand %p4126_p11, %p4115_p12 }
  0x1c   : > { %4118 = dma.hbm_to_vmem [thread:$0]  (!%p4116_p13), %s375_s19, 8192, %s377_s28, [#allocation3], %s4372_s14, %s4372_s14, %s4373_s29  }
  0x1e   : > { %4336 = dma.done.wait (%p4126_p11), [#allocation3], 8192  }
  0x1f   : > { %4338 = vsyncadd (%p4126_p11), [#allocation3], 4294959104  ;;  %p461_p0 = scmp.lt.s32.totalorder %s4361_s24, 1  ;;  %v4374_v0 = vmov 1   ;;  %v4375_v1 = vmov 0   ;;  %v4376_v2 = vmov 2  }
  0x20   : > { %4187 = vset.pattern.permute.xlu1 %v4374_v0  ;;  %4186 = vset.pattern.permute.xlu0 %v4375_v1  ;;  %s5124_s0 = sld [smem:[#allocation12_spill]]  ;;  %vm921_vm0 = vcmask 523264   ;;  %vm3495_vm1 = vcmask 1040384   ;;  %vm3497_vm2 = vcmask 1042434   ;;  %vm3499_vm3 = vcmask 1041408   ;;  %s5010_s20 = sand.u32 1, %s4353_s22  }
  0x21   : > { %s462_s27 = scalar_select %p461_p0, %s4361_s24, 1  ;;  %4188 = vset.pattern.permute.xlu2 %v4376_v2 }
  0x22   : > { %s5125_s3 = sld [smem:[#allocation15_spill]]  ;;  %s3678_s28 = sshll.u32 %s5010_s20, 5 }
  0x23   : > { %s4017_s30 = sshll.u32 %s462_s27, 7  ;;  %s5126_s1 = sld [smem:[#allocation13_spill]] }
  0x24   : > { %s5127_s2 = sld [smem:[#allocation14_spill]]  ;;  %s5020_s14 = scalar_lea.vmem [#allocation5], %s3678_s28 }
  0x25   : > { %s3531_s18 = sshll.u32 %s5020_s14, 4  ;;  %s3513_s28 = scalar_lea.sflag [#allocation4], %s5010_s20  ;;  %s5048_s18 = int_to_ptr.vmem [resolvable:$true] %s3531_s18 }
  0x26   : > { %s4510_s29 = scalar_lea.vmem %s5124_s0, %s4017_s30  ;;  %s4275_s0 = scalar_lea.hbm %s5114_s11, 64 }
  0x27   : > { %v471_v3 = vld [vmem:[%s4510_s29] sm:$0xff]  ;;  %v472_v4 = vld [vmem:[%s4510_s29 + $0x8] sm:$0xff]  ;;  %v473_v5 = vld [vmem:[%s4510_s29 + $0x10] sm:$0xff] }
  0x28   : > { %586 = vperm.xlu1 %4187, %v471_v3   ;;  %490 = vperm.xlu0 %4186, %v471_v3   ;;  %v474_v6 = vld [vmem:[%s4510_s29 + $0x18] sm:$0xff]  ;;  %v475_v7 = vld [vmem:[%s4510_s29 + $0x20] sm:$0xff]  ;;  %v476_v8 = vld [vmem:[%s4510_s29 + $0x28] sm:$0xff] }
  0x29   : > { %683 = vperm.xlu2 %4188, %v471_v3   ;;  %v477_v9 = vld [vmem:[%s4510_s29 + $0x30] sm:$0xff]  ;;  %v478_v10 = vld [vmem:[%s4510_s29 + $0x38] sm:$0xff]  ;;  %v480_v11 = vld [vmem:[%s4510_s29 + $0x48] sm:$0xff] }
  0x2a   : > { %v481_v12 = vld [vmem:[%s4510_s29 + $0x50] sm:$0xff]  ;;  %v479_v13 = vld [vmem:[%s4510_s29 + $0x40] sm:$0xff]  ;;  %v482_v14 = vld [vmem:[%s4510_s29 + $0x58] sm:$0xff] }
  0x2b   : > { %v483_v15 = vld [vmem:[%s4510_s29 + $0x60] sm:$0xff]  ;;  %v4021_v16 = vld [vmem:[%s5125_s3 + $0x18] sm:$0xff]  ;;  %v484_v18 = vld [vmem:[%s4510_s29 + $0x68] sm:$0xff] }
  0x2c   : > { %950 = vmatpush.bf16.msra.mxu0 %v4021_v16  ;;  %4095 = vmatpush.bf16.msra.mxu3 %v4021_v16  ;;  %v4020_v19 = vld [vmem:[%s5125_s3 + $0x10] sm:$0xff]  ;;  %v4019_v20 = vld [vmem:[%s5125_s3 + $0x8] sm:$0xff]  ;;  %v4018_v23 = vld [vmem:[%s5125_s3] sm:$0xff] }
  0x2d   : > { %v4561_v22 = vld [vmem:[%s4510_s29 + $0x70] sm:$0xff]  ;;  %v487_v24 = vld [vmem:[%s5126_s1] sm:$0x7]  ;;  %v486_v57 = vld [vmem:[%s4510_s29 + $0x78] sm:$0xff]  ;;  %s4094_s29 = sshll.u32 %s4361_s24, 5 }
  0x2e   : > { %v4572_v25 = vperm.slane %v487_v24, 2  ;;  %v4574_v26 = vperm.slane %v487_v24, 1  ;;  %v4576_v27 = vperm.slane %v487_v24, 0  ;;  %v795_v34 = vld [vmem:[%s5127_s2] sm:$0x1]  ;;  %s5042_s17 = scalar_lea.hbm %s5114_s11, %s4094_s29 }
  0x2f   : > { %v797_v37 = vpack.i.b16 %v795_v34, %v795_v34  ;;  %s3533_s19 = sshll.u32 %s5042_s17, 4  ;;  %s3534_s19 = int_to_ptr.hbm [resolvable:$true] %s3533_s19 }
  0x30   : > { %590 = vperm.xlu1 %4187, %v472_v4   ;;  %495 = vperm.xlu0 %4186, %v472_v4   ;;  %s4269_s29 = sshra.s32 %s3534_s19, 4  ;;  %s4270_s29 = int_to_ptr.hbm [resolvable:$true] %s4269_s29 }
  0x31   : > { %687 = vperm.xlu2 %4188, %v472_v4   ;;  %951 = vmatpush.bf16.msra.mxu0 %v4020_v19  ;;  %v799_v44 = vperm.slane %v797_v37, 0  ;;  %s4271_s27 = scalar_lea.hbm %s4270_s29, 32  ;;  %p4276_p5 = scmp.lt.s32.totalorder %s4270_s29, %s5114_s11 }
  0x32   : > { %4096 = vmatpush.bf16.msra.mxu3 %v4020_v19  ;;  %p4272_p1 = scmp.ne.s32.totalorder %s4270_s29, %s4271_s27  ;;  %p4277_p6 = scmp.lt.s32.totalorder %s4275_s0, %s4271_s27 }
  0x33   : > { %v4591_v49 = vunpack.c.l.bf16 %v799_v44 }
  0x34   : > { %p4273_p2 = pnand %p4272_p1, %p4484_p4  ;;  %p4278_p7 = por %p4277_p6, %p4276_p5 }
  0x35   : > { %952 = vmatpush.bf16.msra.mxu0 %v4019_v20 }
  0x36   : > { %4097 = vmatpush.bf16.msra.mxu3 %v4019_v20  ;;  %p4274_p3 = pneg %p4273_p2 }
  0x38   : > { %4189 = vset.pattern.permute.xlu1 %v4375_v1  ;;  %500 = vperm.xlu0 %4186, %v473_v5   ;;  %p4279_p9 = pnand %p4278_p7, %p4274_p3 }
  0x39   : > { %505 = vperm.xlu1 %4189, %v474_v6   ;;  %4190 = vset.pattern.permute.xlu2 %v4374_v0 }
  0x3a   : > { %594 = vperm.xlu2 %4190, %v473_v5   ;;  %953 = vmatpush.bf16.msra.mxu0 %v4018_v23 }
  0x3b   : > { %4098 = vmatpush.bf16.msra.mxu3 %v4018_v23 }
  0x40   : > { %4191 = vset.pattern.permute.xlu0 %v4374_v0 }
  0x41   : > { %4192 = vset.pattern.permute.xlu1 %v4376_v2  ;;  %598 = vperm.xlu0 %4191, %v474_v6  }
  0x42   : > { %691 = vperm.xlu1 %4192, %v473_v5   ;;  %4193 = vset.pattern.permute.xlu2 %v4376_v2 }
  0x43   : > { %695 = vperm.xlu2 %4193, %v474_v6  }
  0x49   : > { %602 = vperm.xlu0 %4191, %v475_v7  }
  0x4a   : > { %4194 = vset.pattern.permute.xlu1 %v4375_v1 }
  0x4b   : > { %510 = vperm.xlu1 %4194, %v475_v7   ;;  %4195 = vset.pattern.permute.xlu2 %v4375_v1 }
  0x4c   : > { %515 = vperm.xlu2 %4195, %v476_v8  }
  0x51   : > { %4198 = vset.pattern.permute.xlu0 %v4376_v2 }
  0x52   : > { %703 = vperm.xlu0 %4198, %v476_v8  }
  0x53   : > { %4196 = vset.pattern.permute.xlu1 %v4374_v0 }
  0x54   : > { %606 = vperm.xlu1 %4196, %v476_v8   ;;  %4197 = vset.pattern.permute.xlu2 %v4376_v2 }
  0x55   : > { %699 = vperm.xlu2 %4197, %v475_v7  }
  0x5a   : > { %707 = vperm.xlu0 %4198, %v477_v9  }
  0x5c   : > { %4199 = vset.pattern.permute.xlu1 %v4375_v1 }
  0x5d   : > { %520 = vperm.xlu1 %4199, %v477_v9   ;;  %4200 = vset.pattern.permute.xlu2 %v4375_v1 }
  0x5e   : > { %525 = vperm.xlu2 %4200, %v478_v10  }
  0x62   : > { %4205 = vset.pattern.permute.xlu0 %v4375_v1 }
  0x63   : > { %535 = vperm.xlu0 %4205, %v480_v11  }
  0x65   : > { %4201 = vset.pattern.permute.xlu1 %v4374_v0 }
  0x66   : > { %610 = vperm.xlu1 %4201, %v477_v9   ;;  %4202 = vset.pattern.permute.xlu2 %v4374_v0 }
  0x67   : > { %614 = vperm.xlu2 %4202, %v478_v10  }
  0x6b   : > { %540 = vperm.xlu0 %4205, %v481_v12  }
  0x6e   : > { %4203 = vset.pattern.permute.xlu1 %v4376_v2 }
  0x6f   : > { %711 = vperm.xlu1 %4203, %v478_v10   ;;  %4204 = vset.pattern.permute.xlu2 %v4375_v1 }
  0x70   : > { %530 = vperm.xlu2 %4204, %v479_v13  }
  0x73   : > { %4212 = vset.pattern.permute.xlu0 %v4374_v0 }
  0x74   : > { %630 = vperm.xlu0 %4212, %v482_v14  }
  0x77   : > { %4206 = vset.pattern.permute.xlu1 %v4374_v0 }
  0x78   : > { %618 = vperm.xlu1 %4206, %v479_v13   ;;  %4207 = vset.pattern.permute.xlu2 %v4374_v0 }
  0x79   : > { %622 = vperm.xlu2 %4207, %v480_v11  }
  0x7c   : > { %634 = vperm.xlu0 %4212, %v483_v15  }
  0x80   : > { %4208 = vset.pattern.permute.xlu1 %v4376_v2 }
  0x81   : > { %715 = vperm.xlu1 %4208, %v479_v13   ;;  %4209 = vset.pattern.permute.xlu2 %v4376_v2 }
  0x82   : > { %719 = vperm.xlu2 %4209, %v480_v11  }
  0x83   : > { %v684_v17 = vpop.permute.xlu2 %683 }
  0x84   : > { %4219 = vset.pattern.permute.xlu0 %v4376_v2  ;;  %v747_v31 = vmul.f32 %v4572_v25, %v684_v17 }
  0x85   : > { %735 = vperm.xlu0 %4219, %v484_v18  }
  0x89   : > { %4210 = vset.pattern.permute.xlu1 %v4375_v1 }
  0x8a   : > { %545 = vperm.xlu1 %4210, %v482_v14   ;;  %4211 = vset.pattern.permute.xlu2 %v4374_v0 }
  0x8b   : > { %626 = vperm.xlu2 %4211, %v481_v12   ;;  %v688_v21 = vpop.permute.xlu2 %687 }
  0x8c   : > { %v748_v45 = vmul.f32 %v4572_v25, %v688_v21 }
  0x8d   : > { %739 = vperm.xlu0 %4219, %v4561_v22  }
  0x92   : > { %4213 = vset.pattern.permute.xlu1 %v4376_v2 }
  0x93   : > { %723 = vperm.xlu1 %4213, %v481_v12   ;;  %4214 = vset.pattern.permute.xlu2 %v4376_v2 }
  0x94   : > { %727 = vperm.xlu2 %4214, %v482_v14   ;;  %v595_v28 = vpop.permute.xlu2 %594 }
  0x95   : > { %v652_v58 = vmul.f32 %v4574_v26, %v595_v28 }
  0x9a   : > { %v587_v29 = vpop.permute.xlu1 %586  ;;  %v491_v30 = vpop.permute.xlu0 %490 }
  0x9b   : > { %v650_v32 = vmul.f32 %v4574_v26, %v587_v29  ;;  %v569_v33 = vmul.f32 %v4576_v27, %v491_v30  ;;  %4215 = vset.pattern.permute.xlu1 %v4375_v1 }
  0x9c   : > { %550 = vperm.xlu1 %4215, %v483_v15   ;;  %4216 = vset.pattern.permute.xlu2 %v4375_v1 }
  0x9d   : > { %v666_v35 = vadd.f32 %v650_v32, %v569_v33  ;;  %555 = vperm.xlu2 %4216, %v484_v18   ;;  %v696_v38 = vpop.permute.xlu2 %695 }
  0x9e   : > { %v750_v5 = vmul.f32 %v4572_v25, %v696_v38 }
  0x9f   : > { %v763_v36 = vadd.f32 %v747_v31, %v666_v35 }
  0xa1   : > { %v779_v41 = vpack.c.bf16 %v763_v36, %v763_v36 }
  0xa2   : > { %v591_v39 = vpop.permute.xlu1 %590  ;;  %v496_v40 = vpop.permute.xlu0 %495 }
  0xa3   : > { %v651_v42 = vmul.f32 %v4574_v26, %v591_v39  ;;  %v570_v43 = vmul.f32 %v4576_v27, %v496_v40  ;;  %v800_v47 = vunpack.c.l.bf16 %v779_v41 }
  0xa4   : > { %4217 = vset.pattern.permute.xlu1 %v4374_v0 }
  0xa5   : > { %v667_v46 = vadd.f32 %v651_v42, %v570_v43  ;;  %638 = vperm.xlu1 %4217, %v484_v18   ;;  %4218 = vset.pattern.permute.xlu2 %v4376_v2  ;;  %v817_v54 = vadd.f32 %v4591_v49, %v800_v47 }
  0xa6   : > { %731 = vperm.xlu2 %4218, %v483_v15   ;;  %v516_v55 = vpop.permute.xlu2 %515 }
  0xa7   : > { %v764_v48 = vadd.f32 %v748_v45, %v667_v46  ;;  %v865_v60 = vmax.f32 %v817_v54, 0.0  ;;  %v574_v33 = vmul.f32 %v4576_v27, %v516_v55 }
  0xa9   : > { %v780_v50 = vpack.c.bf16 %v764_v48, %v764_v48 }
  0xaa   : > { %v501_v51 = vpop.permute.xlu0 %500 }
  0xab   : > { %v801_v52 = vunpack.c.l.bf16 %v780_v50  ;;  %v506_v53 = vpop.permute.xlu1 %505  ;;  %v571_v59 = vmul.f32 %v4576_v27, %v501_v51 }
  0xac   : > { %v572_v4 = vmul.f32 %v4576_v27, %v506_v53 }
  0xad   : > { %4220 = vset.pattern.permute.xlu1 %v4375_v1  ;;  %v818_v56 = vadd.f32 %v4591_v49, %v801_v52  ;;  %v668_v63 = vadd.f32 %v652_v58, %v571_v59 }
  0xae   : > { %560 = vperm.xlu1 %4220, %v4561_v22   ;;  %4221 = vset.pattern.permute.xlu2 %v4375_v1 }
  0xaf   : > { %v866_v61 = vmax.f32 %v818_v56, 0.0  ;;  %565 = vperm.xlu2 %4221, %v486_v57   ;;  %v700_v9 = vpop.permute.xlu2 %699 }
  0xb1   : > { %v881_v62 = vpack.c.bf16 %v866_v61, %v865_v60 }
  0xb3   : > { %3698 = vmatmul.msk.bf16.vlgmr.msra.gmra.mxu0 %vm921_vm0, %v881_v62  ;;  %v599_v3 = vpop.permute.xlu0 %598 }
  0xb4   : > { %v653_v6 = vmul.f32 %v4574_v26, %v599_v3  ;;  %v692_v1 = vpop.permute.xlu1 %691 }
  0xb5   : > { %v749_v7 = vmul.f32 %v4572_v25, %v692_v1 }
  0xb6   : > { %v669_v8 = vadd.f32 %v653_v6, %v572_v4  ;;  %4222 = vset.pattern.permute.xlu1 %v4374_v0 }
  0xb7   : > { %v765_v10 = vadd.f32 %v749_v7, %v668_v63  ;;  %642 = vperm.xlu1 %4222, %v4561_v22   ;;  %4223 = vset.pattern.permute.xlu2 %v4374_v0  ;;  %v751_v22 = vmul.f32 %v4572_v25, %v700_v9 }
  0xb8   : > { %v766_v11 = vadd.f32 %v750_v5, %v669_v8  ;;  %646 = vperm.xlu2 %4223, %v486_v57   ;;  %v526_v23 = vpop.permute.xlu2 %525 }
  0xb9   : > { %v781_v12 = vpack.c.bf16 %v765_v10, %v765_v10  ;;  %v576_v58 = vmul.f32 %v4576_v27, %v526_v23 }
  0xba   : > { %v782_v13 = vpack.c.bf16 %v766_v11, %v766_v11 }
  0xbb   : > { %v802_v14 = vunpack.c.l.bf16 %v781_v12  ;;  %v603_v15 = vpop.permute.xlu0 %602 }
  0xbc   : > { %v803_v16 = vunpack.c.l.bf16 %v782_v13  ;;  %v654_v17 = vmul.f32 %v4574_v26, %v603_v15 }
  0xbd   : > { %v819_v18 = vadd.f32 %v4591_v49, %v802_v14  ;;  %v511_v19 = vpop.permute.xlu1 %510 }
  0xbe   : > { %v573_v20 = vmul.f32 %v4576_v27, %v511_v19  ;;  %v820_v21 = vadd.f32 %v4591_v49, %v803_v16 }
  0xbf   : > { %4224 = vset.pattern.permute.xlu1 %v4376_v2  ;;  %v867_v0 = vmax.f32 %v819_v18, 0.0 }
  0xc0   : > { %v670_v24 = vadd.f32 %v654_v17, %v573_v20  ;;  %743 = vperm.xlu1 %4224, %v486_v57   ;;  %v868_v28 = vmax.f32 %v820_v21, 0.0 }
  0xc1   : > { %v615_v37 = vpop.permute.xlu2 %614 }
  0xc2   : > { %v882_v29 = vpack.c.bf16 %v868_v28, %v867_v0  ;;  %v767_v30 = vadd.f32 %v751_v22, %v670_v24  ;;  %v657_v59 = vmul.f32 %v4574_v26, %v615_v37 }
  0xc4   : > { %3699 = vmatmul.msk.bf16.gmra.mxu0 %vm921_vm0, %v882_v29  ;;  %v704_v31 = vpop.permute.xlu0 %703  ;;  %v783_v34 = vpack.c.bf16 %v767_v30, %v767_v30  ;;  %v673_v62 = vadd.f32 %v657_v59, %v576_v58 }
  0xc5   : > { %v752_v36 = vmul.f32 %v4572_v25, %v704_v31 }
  0xc6   : > { %v607_v32 = vpop.permute.xlu1 %606  ;;  %v804_v2 = vunpack.c.l.bf16 %v783_v34 }
  0xc7   : > { %v655_v35 = vmul.f32 %v4574_v26, %v607_v32 }
  0xc8   : > { %v821_v41 = vadd.f32 %v4591_v49, %v804_v2 }
  0xc9   : > { %v671_v38 = vadd.f32 %v655_v35, %v574_v33 }
  0xca   : > { %v531_v45 = vpop.permute.xlu2 %530  ;;  %v869_v46 = vmax.f32 %v821_v41, 0.0 }
  0xcb   : > { %v768_v39 = vadd.f32 %v752_v36, %v671_v38  ;;  %v577_v22 = vmul.f32 %v4576_v27, %v531_v45 }
  0xcc   : > { %v708_v50 = vpop.permute.xlu0 %707 }
  0xcd   : > { %v784_v40 = vpack.c.bf16 %v768_v39, %v768_v39  ;;  %v753_v54 = vmul.f32 %v4572_v25, %v708_v50 }
  0xcf   : > { %v805_v42 = vunpack.c.l.bf16 %v784_v40  ;;  %v521_v43 = vpop.permute.xlu1 %520 }
  0xd0   : > { %v575_v52 = vmul.f32 %v4576_v27, %v521_v43 }
  0xd1   : > { %v822_v44 = vadd.f32 %v4591_v49, %v805_v42 }
  0xd3   : > { %v870_v47 = vmax.f32 %v822_v44, 0.0  ;;  %v623_v56 = vpop.permute.xlu2 %622 }
  0xd4   : > { %v659_v6 = vmul.f32 %v4574_v26, %v623_v56 }
  0xd5   : > { %v883_v48 = vpack.c.bf16 %v870_v47, %v869_v46  ;;  %v536_v3 = vpop.permute.xlu0 %535 }
  0xd6   : > { %v578_v1 = vmul.f32 %v4576_v27, %v536_v3 }
  0xd7   : > { %3700 = vmatmul.msk.bf16.vlgmr.msra.gmra.mxu3 %vm921_vm0, %v883_v48 }
  0xd8   : > { %v611_v51 = vpop.permute.xlu1 %610  ;;  %v675_v11 = vadd.f32 %v659_v6, %v578_v1 }
  0xd9   : > { %v656_v53 = vmul.f32 %v4574_v26, %v611_v51 }
  0xdb   : > { %v672_v55 = vadd.f32 %v656_v53, %v575_v52 }
  0xdc   : > { %v720_v8 = vpop.permute.xlu2 %719 }
  0xdd   : > { %v769_v57 = vadd.f32 %v753_v54, %v672_v55  ;;  %v756_v12 = vmul.f32 %v4572_v25, %v720_v8  ;;  %v541_v19 = vpop.permute.xlu0 %540 }
  0xde   : > { %v579_v45 = vmul.f32 %v4576_v27, %v541_v19 }
  0xdf   : > { %v785_v60 = vpack.c.bf16 %v769_v57, %v769_v57  ;;  %v772_v15 = vadd.f32 %v756_v12, %v675_v11 }
  0xe1   : > { %v712_v61 = vpop.permute.xlu1 %711  ;;  %v806_v4 = vunpack.c.l.bf16 %v785_v60  ;;  %v788_v21 = vpack.c.bf16 %v772_v15, %v772_v15 }
  0xe2   : > { %v754_v63 = vmul.f32 %v4572_v25, %v712_v61 }
  0xe3   : > { %v823_v9 = vadd.f32 %v4591_v49, %v806_v4  ;;  %v809_v28 = vunpack.c.l.bf16 %v788_v21 }
  0xe4   : > { %v770_v5 = vadd.f32 %v754_v63, %v673_v62 }
  0xe5   : > { %v871_v16 = vmax.f32 %v823_v9, 0.0  ;;  %v627_v23 = vpop.permute.xlu2 %626  ;;  %v826_v31 = vadd.f32 %v4591_v49, %v809_v28  ;;  %v4025_v9 = vld [vmem:[%s5108_s5 + $0x18] sm:$0xff]  ;;  %v4022_v28 = vld [vmem:[%s5108_s5] sm:$0xff] }
  0xe6   : > { %v786_v7 = vpack.c.bf16 %v770_v5, %v770_v5  ;;  %v631_v33 = vpop.permute.xlu0 %630  ;;  %v660_v46 = vmul.f32 %v4574_v26, %v627_v23  ;;  %1273 = vmatpush.bf16.msrb.mxu0 %v4025_v9  ;;  %4099 = vmatpush.bf16.msra.mxu1 %v4025_v9 }
  0xe7   : > { %v661_v36 = vmul.f32 %v4574_v26, %v631_v33  ;;  %v874_v2 = vmax.f32 %v826_v31, 0.0 }
  0xe8   : > { %v807_v10 = vunpack.c.l.bf16 %v786_v7  ;;  %v676_v51 = vadd.f32 %v660_v46, %v579_v45 }
  0xea   : > { %v824_v13 = vadd.f32 %v4591_v49, %v807_v10  ;;  %v619_v14 = vpop.permute.xlu1 %618 }
  0xeb   : > { %v658_v20 = vmul.f32 %v4574_v26, %v619_v14 }
  0xec   : > { %v872_v17 = vmax.f32 %v824_v13, 0.0 }
  0xed   : > { %v674_v24 = vadd.f32 %v658_v20, %v577_v22  ;;  %v4023_v20 = vld [vmem:[%s5108_s5 + $0x8] sm:$0xff] }
  0xee   : > { %v884_v18 = vpack.c.bf16 %v872_v17, %v871_v16  ;;  %v728_v35 = vpop.permute.xlu2 %727  ;;  %v635_v56 = vpop.permute.xlu0 %634  ;;  %v4024_v16 = vld [vmem:[%s5108_s5 + $0x10] sm:$0xff] }
  0xef   : > { %v758_v40 = vmul.f32 %v4572_v25, %v728_v35  ;;  %v662_v59 = vmul.f32 %v4574_v26, %v635_v56  ;;  %1274 = vmatpush.bf16.msrb.mxu0 %v4024_v16  ;;  %4100 = vmatpush.bf16.msra.mxu1 %v4024_v16 }
  0xf0   : > { %3701 = vmatmul.msk.bf16.gmra.mxu3 %vm921_vm0, %v884_v18 }
  0xf3   : > { %v716_v0 = vpop.permute.xlu1 %715  ;;  %1275 = vmatpush.bf16.msrb.mxu0 %v4023_v20  ;;  %4101 = vmatpush.bf16.msra.mxu1 %v4023_v20 }
  0xf4   : > { %v755_v29 = vmul.f32 %v4572_v25, %v716_v0 }
  0xf6   : > { %v771_v30 = vadd.f32 %v755_v29, %v674_v24 }
  0xf7   : > { %v556_v47 = vpop.permute.xlu2 %555  ;;  %v736_v8 = vpop.permute.xlu0 %735  ;;  %1276 = vmatpush.bf16.msrb.mxu0 %v4022_v28  ;;  %4102 = vmatpush.bf16.msra.mxu1 %v4022_v28 }
  0xf8   : > { %v787_v32 = vpack.c.bf16 %v771_v30, %v771_v30  ;;  %v582_v10 = vmul.f32 %v4576_v27, %v556_v47  ;;  %v760_v14 = vmul.f32 %v4572_v25, %v736_v8 }
  0xfa   : > { %v808_v34 = vunpack.c.l.bf16 %v787_v32  ;;  %v1011_v32 = vld [vmem:[%s5107_s4] sm:$0x1] }
  0xfc   : > { %v825_v37 = vadd.f32 %v4591_v49, %v808_v34  ;;  %v546_v38 = vpop.permute.xlu1 %545 }
  0xfd   : > { %v580_v39 = vmul.f32 %v4576_v27, %v546_v38 }
  0xfe   : > { %v873_v41 = vmax.f32 %v825_v37, 0.0  ;;  %v1013_v37 = vpack.i.b16 %v1011_v32, %v1011_v32 }
  0xff   : > { %v677_v42 = vadd.f32 %v661_v36, %v580_v39  ;;  %v740_v33 = vpop.permute.xlu0 %739 }
 0x100   : > { %v885_v43 = vpack.c.bf16 %v874_v2, %v873_v41  ;;  %v732_v60 = vpop.permute.xlu2 %731  ;;  %v761_v38 = vmul.f32 %v4572_v25, %v740_v33 }
 0x101   : > { %v774_v44 = vadd.f32 %v758_v40, %v677_v42  ;;  %v759_v3 = vmul.f32 %v4572_v25, %v732_v60 }
 0x102   : > { %3702 = vmatmul.msk.bf16.gmra.mxu3 %vm921_vm0, %v885_v43  ;;  %v1015_v43 = vperm.slane %v1013_v37, 0 }
 0x103   : > { %v790_v48 = vpack.c.bf16 %v774_v44, %v774_v44 }
 0x105   : > { %v724_v50 = vpop.permute.xlu1 %723  ;;  %v811_v53 = vunpack.c.l.bf16 %v790_v48 }
 0x106   : > { %v757_v52 = vmul.f32 %v4572_v25, %v724_v50 }
 0x107   : > { %v828_v57 = vadd.f32 %v4591_v49, %v811_v53 }
 0x108   : > { %v773_v54 = vadd.f32 %v757_v52, %v676_v51  ;;  %v4678_v51 = vunpack.c.l.bf16 %v1015_v43 }
 0x109   : > { %v876_v5 = vmax.f32 %v828_v57, 0.0  ;;  %v566_v24 = vpop.permute.xlu2 %565 }
 0x10a   : > { %v789_v55 = vpack.c.bf16 %v773_v54, %v773_v54  ;;  %v584_v41 = vmul.f32 %v4576_v27, %v566_v24 }
 0x10c   : > { %v810_v58 = vunpack.c.l.bf16 %v789_v55 }
 0x10e   : > { %v827_v61 = vadd.f32 %v4591_v49, %v810_v58  ;;  %v551_v62 = vpop.permute.xlu1 %550 }
 0x10f   : > { %v581_v63 = vmul.f32 %v4576_v27, %v551_v62 }
 0x110   : > { %v875_v4 = vmax.f32 %v827_v61, 0.0 }
 0x111   : > { %v678_v6 = vadd.f32 %v662_v59, %v581_v63 }
 0x112   : > { %v886_v1 = vpack.c.bf16 %v876_v5, %v875_v4  ;;  %v647_v2 = vpop.permute.xlu2 %646 }
 0x113   : > { %v775_v7 = vadd.f32 %v759_v3, %v678_v6  ;;  %v665_v42 = vmul.f32 %v4574_v26, %v647_v2 }
 0x114   : > { %3703 = vmatmul.msk.bf16.gmra.mxu3 %vm921_vm0, %v886_v1 }
 0x115   : > { %v791_v12 = vpack.c.bf16 %v775_v7, %v775_v7  ;;  %v681_v48 = vadd.f32 %v665_v42, %v584_v41 }
 0x117   : > { %v639_v11 = vpop.permute.xlu1 %638  ;;  %v812_v17 = vunpack.c.l.bf16 %v791_v12 }
 0x118   : > { %v663_v13 = vmul.f32 %v4574_v26, %v639_v11 }
 0x119   : > { %v829_v21 = vadd.f32 %v4591_v49, %v812_v17 }
 0x11a   : > { %v679_v15 = vadd.f32 %v663_v13, %v582_v10 }
 0x11b   : > { %v877_v29 = vmax.f32 %v829_v21, 0.0 }
 0x11c   : > { %v776_v18 = vadd.f32 %v760_v14, %v679_v15 }
 0x11e   : > { %v792_v19 = vpack.c.bf16 %v776_v18, %v776_v18 }
 0x120   : > { %v813_v23 = vunpack.c.l.bf16 %v792_v19  ;;  %v561_v22 = vpop.permute.xlu1 %560 }
 0x121   : > { %v583_v35 = vmul.f32 %v4576_v27, %v561_v22 }
 0x122   : > { %v830_v0 = vadd.f32 %v4591_v49, %v813_v23 }
 0x124   : > { %v878_v30 = vmax.f32 %v830_v0, 0.0 }
 0x126   : > { %v887_v31 = vpack.c.bf16 %v878_v30, %v877_v29 }
 0x128   : > { %3704 = vmatmul.msk.bf16.gmra.mxu3 %vm921_vm0, %v887_v31 }
 0x129   : > { %v643_v34 = vpop.permute.xlu1 %642 }
 0x12a   : > { %v664_v36 = vmul.f32 %v4574_v26, %v643_v34 }
 0x12c   : > { %v680_v39 = vadd.f32 %v664_v36, %v583_v35 }
 0x12e   : > { %v777_v40 = vadd.f32 %v761_v38, %v680_v39 }
 0x130   : > { %v955_v44 = vpop.f32.mrf.mxu0  ;;  %v793_v45 = vpack.c.bf16 %v777_v40, %v777_v40 }
 0x131   : > { %v995_v46 = vpack.c.bf16 %v955_v44, %v955_v44 }
 0x132   : > { %v744_v47 = vpop.permute.xlu1 %743  ;;  %v814_v53 = vunpack.c.l.bf16 %v793_v45 }
 0x133   : > { %v1016_v50 = vunpack.c.l.bf16 %v995_v46  ;;  %v762_v52 = vmul.f32 %v4572_v25, %v744_v47 }
 0x134   : > { %v831_v26 = vadd.f32 %v4591_v49, %v814_v53 }
 0x135   : > { %v778_v54 = vadd.f32 %v762_v52, %v681_v48  ;;  %v1033_v55 = vadd.f32 %v4678_v51, %v1016_v50 }
 0x136   : > { %v879_v63 = vmax.f32 %v831_v26, 0.0 }
 0x137   : > { %v794_v56 = vpack.c.bf16 %v778_v54, %v778_v54  ;;  %v1081_v59 = vmax.f32 %v1033_v55, 0.0 }
 0x138   : > { %v957_v57 = vpop.f32.mrf.mxu0 }
 0x139   : > { %v815_v27 = vunpack.c.l.bf16 %v794_v56  ;;  %v996_v58 = vpack.c.bf16 %v957_v57, %v957_v57  ;;  %v1097_v4 = vpack.c.bf16 %v1081_v59, %v1081_v59 }
 0x13b   : > { %v832_v60 = vadd.f32 %v4591_v49, %v815_v27  ;;  %v1017_v61 = vunpack.c.l.bf16 %v996_v58  ;;  %v1129_v8 = vunpack.c.l.b16 %v1097_v4 }
 0x13d   : > { %v1034_v62 = vadd.f32 %v4678_v51, %v1017_v61  ;;  %v880_v3 = vmax.f32 %v832_v60, 0.0 }
 0x13f   : > { %v1082_v25 = vmax.f32 %v1034_v62, 0.0  ;;  %v888_v5 = vpack.c.bf16 %v880_v3, %v879_v63 }
 0x141   : > { %v1098_v6 = vpack.c.bf16 %v1082_v25, %v1082_v25  ;;  %v960_v1 = vpop.f32.mrf.mxu0  ;;  %3705 = vmatmul.msk.bf16.gmra.mxu3 %vm921_vm0, %v888_v5 }
 0x142   : > { %v997_v7 = vpack.c.bf16 %v960_v1, %v960_v1 }
 0x143   : > { %v1130_v9 = vunpack.c.l.b16 %v1098_v6 }
 0x144   : > { %v1018_v10 = vunpack.c.l.bf16 %v997_v7 }
 0x145   : > { %v1145_v11 = vpack.c.b16 %v1130_v9, %v1129_v8 }
 0x146   : > { %v1035_v49 = vadd.f32 %v4678_v51, %v1018_v10 }
 0x147   : > { %1161 = vxpose.xlu2.c.b16.start [1/8] (narrow) %v1145_v11, 64  ;;  %3722 = vmatmul.msk.bf16.vlgmr.msrb.gmra.mxu0 %vm921_vm0, %v1145_v11 }
 0x148   : > { %v1083_v14 = vmax.f32 %v1035_v49, 0.0 }
 0x149   : > { %v962_v12 = vpop.f32.mrf.mxu0 }
 0x14a   : > { %v998_v13 = vpack.c.bf16 %v962_v12, %v962_v12  ;;  %v1099_v17 = vpack.c.bf16 %v1083_v14, %v1083_v14 }
 0x14c   : > { %v1019_v15 = vunpack.c.l.bf16 %v998_v13  ;;  %v1131_v20 = vunpack.c.l.b16 %v1099_v17 }
 0x14e   : > { %v1036_v16 = vadd.f32 %v4678_v51, %v1019_v15 }
 0x150   : > { %v1084_v18 = vmax.f32 %v1036_v16, 0.0  ;;  %v4029_v16 = vld [vmem:[%s5110_s7 + $0x18] sm:$0xff] }
 0x151   : > { %1488 = vmatpush.bf16.msra.mxu0 %v4029_v16  ;;  %4103 = vmatpush.bf16.msra.mxu2 %v4029_v16 }
 0x152   : > { %v1100_v19 = vpack.c.bf16 %v1084_v18, %v1084_v18 }
 0x154   : > { %v1132_v21 = vunpack.c.l.b16 %v1100_v19 }
 0x156   : > { %v1146_v23 = vpack.c.b16 %v1132_v21, %v1131_v20  ;;  %v4028_v20 = vld [vmem:[%s5110_s7 + $0x10] sm:$0xff] }
 0x157   : > { %1489 = vmatpush.bf16.msra.mxu0 %v4028_v20  ;;  %4104 = vmatpush.bf16.msra.mxu2 %v4028_v20 }
 0x158   : > { %1162 = vxpose.xlu2.c.b16.cont [2/8] (narrow) %v1146_v23, 64  ;;  %3723 = vmatmul.msk.bf16.gmra.mxu0 %vm921_vm0, %v1146_v23 }
 0x15a   : > { %v965_v22 = vpop.f32.mrf.mxu3 }
 0x15b   : > { %v999_v0 = vpack.c.bf16 %v965_v22, %v965_v22 }
 0x15d   : > { %v1020_v24 = vunpack.c.l.bf16 %v999_v0 }
 0x15f   : > { %v1037_v28 = vadd.f32 %v4678_v51, %v1020_v24  ;;  %v4027_v24 = vld [vmem:[%s5110_s7 + $0x8] sm:$0xff] }
 0x160   : > { %1490 = vmatpush.bf16.msra.mxu0 %v4027_v24  ;;  %4105 = vmatpush.bf16.msra.mxu2 %v4027_v24 }
 0x161   : > { %v1085_v31 = vmax.f32 %v1037_v28, 0.0 }
 0x162   : > { %v967_v29 = vpop.f32.mrf.mxu3 }
 0x163   : > { %v1000_v30 = vpack.c.bf16 %v967_v29, %v967_v29  ;;  %v1101_v34 = vpack.c.bf16 %v1085_v31, %v1085_v31  ;;  %v4026_v29 = vld [vmem:[%s5110_s7] sm:$0xff] }
 0x164   : > { %1491 = vmatpush.bf16.msra.mxu0 %v4026_v29  ;;  %4106 = vmatpush.bf16.msra.mxu2 %v4026_v29 }
 0x165   : > { %v1021_v32 = vunpack.c.l.bf16 %v1000_v30  ;;  %v1133_v37 = vunpack.c.l.b16 %v1101_v34 }
 0x167   : > { %v1038_v33 = vadd.f32 %v4678_v51, %v1021_v32 }
 0x169   : > { %v1086_v35 = vmax.f32 %v1038_v33, 0.0 }
 0x16b   : > { %v1102_v36 = vpack.c.bf16 %v1086_v35, %v1086_v35 }
 0x16d   : > { %v1134_v38 = vunpack.c.l.b16 %v1102_v36 }
 0x16f   : > { %v1147_v2 = vpack.c.b16 %v1134_v38, %v1133_v37 }
 0x171   : > { %1163 = vxpose.xlu2.c.b16.cont [3/8] (narrow) %v1147_v2, 64  ;;  %3724 = vmatmul.msk.bf16.vlgmr.msra.gmra.mxu1 %vm921_vm0, %v1147_v2 }
 0x173   : > { %v970_v39 = vpop.f32.mrf.mxu3 }
 0x174   : > { %v1001_v40 = vpack.c.bf16 %v970_v39, %v970_v39 }
 0x176   : > { %v1022_v41 = vunpack.c.l.bf16 %v1001_v40  ;;  %v1334_v40 = vld [vmem:[%s5109_s6] sm:$0x1] }
 0x178   : > { %v1039_v42 = vadd.f32 %v4678_v51, %v1022_v41  ;;  %v1336_v41 = vpack.i.b16 %v1334_v40, %v1334_v40 }
 0x17a   : > { %v1087_v45 = vmax.f32 %v1039_v42, 0.0 }
 0x17b   : > { %v972_v43 = vpop.f32.mrf.mxu3 }
 0x17c   : > { %v1002_v44 = vpack.c.bf16 %v972_v43, %v972_v43  ;;  %v1103_v48 = vpack.c.bf16 %v1087_v45, %v1087_v45 }
 0x17e   : > { %v1023_v46 = vunpack.c.l.bf16 %v1002_v44  ;;  %v1135_v54 = vunpack.c.l.b16 %v1103_v48 }
 0x180   : > { %v1040_v47 = vadd.f32 %v4678_v51, %v1023_v46 }
 0x182   : > { %v1088_v50 = vmax.f32 %v1040_v47, 0.0  ;;  %v1338_v47 = vperm.slane %v1336_v41, 0 }
 0x184   : > { %v1104_v52 = vpack.c.bf16 %v1088_v50, %v1088_v50 }
 0x185   : > { %v975_v53 = vpop.f32.mrf.mxu3 }
 0x186   : > { %v1136_v55 = vunpack.c.l.b16 %v1104_v52  ;;  %v1003_v56 = vpack.c.bf16 %v975_v53, %v975_v53  ;;  %v4721_v52 = vunpack.c.l.bf16 %v1338_v47  ;;  %v4091_v47 = vld [vmem:[#allocation2 + $0x1e4] sm:$0xf0] }
 0x188   : > { %v1024_v57 = vunpack.c.l.bf16 %v1003_v56  ;;  %v1148_v27 = vpack.c.b16 %v1136_v55, %v1135_v54 }
 0x18a   : > { %1164 = vxpose.xlu2.c.b16.cont [4/8] (narrow) %v1148_v27, 64  ;;  %3725 = vmatmul.msk.bf16.gmra.mxu1 %vm921_vm0, %v1148_v27  ;;  %v1041_v58 = vadd.f32 %v4678_v51, %v1024_v57 }
 0x18c   : > { %v1089_v60 = vmax.f32 %v1041_v58, 0.0 }
 0x18d   : > { %v977_v26 = vpop.f32.mrf.mxu3 }
 0x18e   : > { %v1004_v59 = vpack.c.bf16 %v977_v26, %v977_v26  ;;  %v1105_v63 = vpack.c.bf16 %v1089_v60, %v1089_v60 }
 0x190   : > { %v1025_v61 = vunpack.c.l.bf16 %v1004_v59  ;;  %v1137_v5 = vunpack.c.l.b16 %v1105_v63 }
 0x192   : > { %v1042_v62 = vadd.f32 %v4678_v51, %v1025_v61 }
 0x194   : > { %v1090_v3 = vmax.f32 %v1042_v62, 0.0 }
 0x196   : > { %v1106_v4 = vpack.c.bf16 %v1090_v3, %v1090_v3 }
 0x197   : > { %v980_v25 = vpop.f32.mrf.mxu3 }
 0x198   : > { %v1138_v6 = vunpack.c.l.b16 %v1106_v4  ;;  %v1005_v1 = vpack.c.bf16 %v980_v25, %v980_v25 }
 0x19a   : > { %v1026_v7 = vunpack.c.l.bf16 %v1005_v1  ;;  %v1149_v8 = vpack.c.b16 %v1138_v6, %v1137_v5 }
 0x19c   : > { %1165 = vxpose.xlu2.c.b16.cont [5/8] (narrow) %v1149_v8, 64  ;;  %3726 = vmatmul.msk.bf16.gmra.mxu1 %vm921_vm0, %v1149_v8  ;;  %v1043_v9 = vadd.f32 %v4678_v51, %v1026_v7 }
 0x19e   : > { %v1091_v49 = vmax.f32 %v1043_v9, 0.0 }
 0x19f   : > { %v982_v10 = vpop.f32.mrf.mxu3 }
 0x1a0   : > { %v1006_v11 = vpack.c.bf16 %v982_v10, %v982_v10  ;;  %v1107_v14 = vpack.c.bf16 %v1091_v49, %v1091_v49 }
 0x1a2   : > { %v1027_v12 = vunpack.c.l.bf16 %v1006_v11  ;;  %v1139_v18 = vunpack.c.l.b16 %v1107_v14 }
 0x1a4   : > { %v1044_v13 = vadd.f32 %v4678_v51, %v1027_v12 }
 0x1a6   : > { %v1092_v15 = vmax.f32 %v1044_v13, 0.0 }
 0x1a8   : > { %v1108_v17 = vpack.c.bf16 %v1092_v15, %v1092_v15 }
 0x1aa   : > { %v1140_v19 = vunpack.c.l.b16 %v1108_v17 }
 0x1ab   : > { %v985_v21 = vpop.f32.mrf.mxu3 }
 0x1ac   : > { %v1007_v23 = vpack.c.bf16 %v985_v21, %v985_v21  ;;  %v1150_v22 = vpack.c.b16 %v1140_v19, %v1139_v18 }
 0x1ae   : > { %v1028_v0 = vunpack.c.l.bf16 %v1007_v23  ;;  %1166 = vxpose.xlu2.c.b16.cont [6/8] (narrow) %v1150_v22, 64  ;;  %3727 = vmatmul.msk.bf16.gmra.mxu1 %vm921_vm0, %v1150_v22 }
 0x1b0   : > { %v1045_v28 = vadd.f32 %v4678_v51, %v1028_v0 }
 0x1b2   : > { %v1093_v32 = vmax.f32 %v1045_v28, 0.0 }
 0x1b3   : > { %v987_v30 = vpop.f32.mrf.mxu3 }
 0x1b4   : > { %v1008_v31 = vpack.c.bf16 %v987_v30, %v987_v30  ;;  %v1109_v35 = vpack.c.bf16 %v1093_v32, %v1093_v32 }
 0x1b6   : > { %v1029_v33 = vunpack.c.l.bf16 %v1008_v31  ;;  %v1141_v38 = vunpack.c.l.b16 %v1109_v35 }
 0x1b8   : > { %v1046_v34 = vadd.f32 %v4678_v51, %v1029_v33 }
 0x1ba   : > { %v1094_v36 = vmax.f32 %v1046_v34, 0.0 }
 0x1bc   : > { %v1110_v37 = vpack.c.bf16 %v1094_v36, %v1094_v36  ;;  %v3980_v36 = vld [vmem:[#allocation2 + $0x1c0] sm:$0xf] }
 0x1be   : > { %v1142_v2 = vunpack.c.l.b16 %v1110_v37  ;;  %v4090_v37 = vld [vmem:[#allocation2 + $0x1dc] sm:$0xf0] }
 0x1c0   : > { %v1151_v39 = vpack.c.b16 %v1142_v2, %v1141_v38  ;;  %v4087_v38 = vld [vmem:[#allocation2 + $0x1cc] sm:$0xf]  ;;  %v3981_v2 = vor.u32 %v4090_v37, %v3980_v36 }
 0x1c2   : > { %1167 = vxpose.xlu2.c.b16.cont [7/8] (narrow) %v1151_v39, 64  ;;  %3728 = vmatmul.msk.bf16.gmra.mxu1 %vm921_vm0, %v1151_v39  ;;  %v3990_v39 = vld [vmem:[#allocation2 + $0x1e8] sm:$0xf0] }
 0x1c3   : > { %v3993_v41 = vor.u32 %v4087_v38, %v3990_v39  ;;  %2027 = vmatpush.bf16.msrb.mxu3 %v3981_v2  ;;  %v3852_v38 = vld [vmem:[#allocation2 + $0xc0] sm:$0xf] }
 0x1c4   : > { %v990_v42 = vpop.f32.mrf.mxu3  ;;  %v1278_v43 = vpop.f32.mrf.mxu0  ;;  %v4058_v2 = vld [vmem:[#allocation2 + $0xdc] sm:$0xf0] }
 0x1c5   : > { %v1009_v44 = vpack.c.bf16 %v990_v42, %v990_v42  ;;  %v1318_v46 = vpack.c.bf16 %v1278_v43, %v1278_v43  ;;  %2174 = vmatpush.bf16.msrb.mxu2 %v3993_v41  ;;  %v3853_v41 = vor.u32 %v4058_v2, %v3852_v38  ;;  %v4039_v38 = vld [vmem:[#allocation2 + $0x4c] sm:$0xf] }
 0x1c6   : > { %v3798_v2 = vld [vmem:[#allocation2 + $0x68] sm:$0xf0] }
 0x1c7   : > { %v1030_v45 = vunpack.c.l.bf16 %v1009_v44  ;;  %v1339_v50 = vunpack.c.l.bf16 %v1318_v46  ;;  %v3988_v46 = vld [vmem:[#allocation2 + $0x1c8] sm:$0xf] }
 0x1c9   : > { %v1047_v48 = vadd.f32 %v4678_v51, %v1030_v45  ;;  %v1356_v27 = vadd.f32 %v4721_v52, %v1339_v50  ;;  %v3989_v50 = vor.u32 %v4091_v47, %v3988_v46  ;;  %v4059_v46 = vld [vmem:[#allocation2 + $0xe4] sm:$0xf0] }
 0x1cb   : > { %v1095_v57 = vmax.f32 %v1047_v48, 0.0  ;;  %v1404_v62 = vmax.f32 %v1356_v27, 0.0  ;;  %v3948_v48 = vld [vmem:[#allocation2 + $0x180] sm:$0xf]  ;;  %2125 = vmatpush.bf16.msrb.mxu1 %v3989_v50 }
 0x1cc   : > { %v992_v53 = vpop.f32.mrf.mxu3  ;;  %v1280_v54 = vpop.f32.mrf.mxu0  ;;  %v3820_v50 = vld [vmem:[#allocation2 + $0x80] sm:$0xf] }
 0x1cd   : > { %v1010_v55 = vpack.c.bf16 %v992_v53, %v992_v53  ;;  %v1319_v56 = vpack.c.bf16 %v1280_v54, %v1280_v54  ;;  %v1111_v61 = vpack.c.bf16 %v1095_v57, %v1095_v57  ;;  %v4082_v53 = vld [vmem:[#allocation2 + $0x19c] sm:$0xf0]  ;;  %v4079_v54 = vld [vmem:[#allocation2 + $0x18c] sm:$0xf] }
 0x1ce   : > { %v3949_v57 = vor.u32 %v4082_v53, %v3948_v48  ;;  %v4050_v53 = vld [vmem:[#allocation2 + $0x9c] sm:$0xf0] }
 0x1cf   : > { %v1031_v58 = vunpack.c.l.bf16 %v1010_v55  ;;  %v1340_v26 = vunpack.c.l.bf16 %v1319_v56  ;;  %v1143_v6 = vunpack.c.l.b16 %v1111_v61  ;;  %v3958_v55 = vld [vmem:[#allocation2 + $0x1a8] sm:$0xf0] }
 0x1d0   : > { %v3961_v27 = vor.u32 %v4079_v54, %v3958_v55  ;;  %2028 = vmatpush.bf16.msrb.mxu3 %v3949_v57  ;;  %v4046_v54 = vld [vmem:[#allocation2 + $0x84] sm:$0xf]  ;;  %v3821_v57 = vor.u32 %v4050_v53, %v3820_v50 }
 0x1d1   : > { %v1048_v59 = vadd.f32 %v4678_v51, %v1031_v58  ;;  %v1357_v60 = vadd.f32 %v4721_v52, %v1340_v26 }
 0x1d2   : > { %2175 = vmatpush.bf16.msrb.mxu2 %v3961_v27  ;;  %v3822_v27 = vld [vmem:[#allocation2 + $0xa0] sm:$0xf0] }
 0x1d3   : > { %v1096_v63 = vmax.f32 %v1048_v59, 0.0  ;;  %v1405_v3 = vmax.f32 %v1357_v60, 0.0 }
 0x1d5   : > { %v1112_v4 = vpack.c.bf16 %v1096_v63, %v1096_v63  ;;  %v1420_v25 = vpack.c.bf16 %v1405_v3, %v1404_v62  ;;  %v1283_v5 = vpop.f32.mrf.mxu0  ;;  %v4086_v62 = vld [vmem:[#allocation2 + $0x1c4] sm:$0xf] }
 0x1d6   : > { %v1320_v7 = vpack.c.bf16 %v1283_v5, %v1283_v5  ;;  %v3982_v63 = vld [vmem:[#allocation2 + $0x1e0] sm:$0xf0] }
 0x1d7   : > { %v1144_v1 = vunpack.c.l.b16 %v1112_v4  ;;  %3746 = vmatmul.msk.bf16.vlgmr.msra.gmra.mxu0 %vm921_vm0, %v1420_v25  ;;  %v3956_v4 = vld [vmem:[#allocation2 + $0x188] sm:$0xf]  ;;  %v3985_v5 = vor.u32 %v4086_v62, %v3982_v63 }
 0x1d8   : > { %v1341_v9 = vunpack.c.l.bf16 %v1320_v7  ;;  %v4083_v25 = vld [vmem:[#allocation2 + $0x1a4] sm:$0xf0] }
 0x1d9   : > { %v1152_v8 = vpack.c.b16 %v1144_v1, %v1143_v6  ;;  %v3957_v6 = vor.u32 %v4083_v25, %v3956_v4  ;;  %2076 = vmatpush.bf16.msrb.mxu0 %v3985_v5  ;;  %v3788_v4 = vld [vmem:[#allocation2 + $0x40] sm:$0xf]  ;;  %v4038_v5 = vld [vmem:[#allocation2 + $0x44] sm:$0xf] }
 0x1da   : > { %v1358_v11 = vadd.f32 %v4721_v52, %v1341_v9  ;;  %v3950_v9 = vld [vmem:[#allocation2 + $0x1a0] sm:$0xf0]  ;;  %v4042_v25 = vld [vmem:[#allocation2 + $0x5c] sm:$0xf0] }
 0x1db   : > { %1168 = vxpose.xlu2.c.b16.end [8/8] (narrow) %v1152_v8, 64  ;;  %3729 = vmatmul.msk.bf16.gmra.mxu1 %vm921_vm0, %v1152_v8  ;;  %v4078_v8 = vld [vmem:[#allocation2 + $0x184] sm:$0xf] }
 0x1dc   : > { %v1406_v13 = vmax.f32 %v1358_v11, 0.0  ;;  %2126 = vmatpush.bf16.msrb.mxu1 %v3957_v6  ;;  %v3789_v6 = vor.u32 %v4042_v25, %v3788_v4 }
 0x1dd   : > { %v1285_v51 = vpop.f32.mrf.mxu0 }
 0x1de   : > { %v1321_v10 = vpack.c.bf16 %v1285_v51, %v1285_v51 }
 0x1e0   : > { %v1342_v49 = vunpack.c.l.bf16 %v1321_v10  ;;  %v3953_v10 = vor.u32 %v4078_v8, %v3950_v9  ;;  %v4043_v8 = vld [vmem:[#allocation2 + $0x64] sm:$0xf0] }
 0x1e2   : > { %v1359_v12 = vadd.f32 %v4721_v52, %v1342_v49  ;;  %2077 = vmatpush.bf16.msrb.mxu0 %v3953_v10  ;;  %v3916_v49 = vld [vmem:[#allocation2 + $0x140] sm:$0xf] }
 0x1e4   : > { %v1407_v14 = vmax.f32 %v1359_v12, 0.0  ;;  %v4074_v12 = vld [vmem:[#allocation2 + $0x15c] sm:$0xf0] }
 0x1e6   : > { %v1421_v15 = vpack.c.bf16 %v1407_v14, %v1406_v13  ;;  %v3924_v13 = vld [vmem:[#allocation2 + $0x148] sm:$0xf] }
 0x1e8   : > { %3747 = vmatmul.msk.bf16.gmra.mxu0 %vm921_vm0, %v1421_v15  ;;  %v3917_v15 = vor.u32 %v4074_v12, %v3916_v49  ;;  %v4034_v49 = vld [vmem:[#allocation2 + $0x1c] sm:$0xf0]  ;;  %v4030_v12 = vld [vmem:[#allocation2 + $0x4] sm:$0xf] }
 0x1ea   : > { %2029 = vmatpush.bf16.msrb.mxu3 %v3917_v15  ;;  %v3758_v15 = vld [vmem:[#allocation2 + $0x20] sm:$0xf0] }
 0x1ee   : > { %v1288_v16 = vpop.f32.mrf.mxu1 }
 0x1ef   : > { %v1322_v17 = vpack.c.bf16 %v1288_v16, %v1288_v16  ;;  %v4071_v16 = vld [vmem:[#allocation2 + $0x14c] sm:$0xf] }
 0x1f1   : > { %v1343_v18 = vunpack.c.l.bf16 %v1322_v17  ;;  %v3926_v17 = vld [vmem:[#allocation2 + $0x168] sm:$0xf0] }
 0x1f3   : > { %v1360_v21 = vadd.f32 %v4721_v52, %v1343_v18  ;;  %v4075_v18 = vld [vmem:[#allocation2 + $0x164] sm:$0xf0] }
 0x1f5   : > { %v1408_v0 = vmax.f32 %v1360_v21, 0.0  ;;  %v4070_v21 = vld [vmem:[#allocation2 + $0x144] sm:$0xf] }
 0x1f6   : > { %v1290_v19 = vpop.f32.mrf.mxu1 }
 0x1f7   : > { %v1323_v20 = vpack.c.bf16 %v1290_v19, %v1290_v19  ;;  %v3929_v19 = vor.u32 %v4071_v16, %v3926_v17  ;;  %v3764_v16 = vld [vmem:[#allocation2 + $0x8] sm:$0xf] }
 0x1f8   : > { %v4035_v17 = vld [vmem:[#allocation2 + $0x24] sm:$0xf0] }
 0x1f9   : > { %v1344_v23 = vunpack.c.l.bf16 %v1323_v20  ;;  %v3925_v20 = vor.u32 %v4075_v18, %v3924_v13  ;;  %2176 = vmatpush.bf16.msrb.mxu2 %v3929_v19  ;;  %v3761_v18 = vor.u32 %v4030_v12, %v3758_v15  ;;  %v3765_v19 = vor.u32 %v4035_v17, %v3764_v16  ;;  %v4089_v15 = vld [vmem:[#allocation2 + $0x1dc] sm:$0xf] }
 0x1fb   : > { %v1361_v22 = vadd.f32 %v4721_v52, %v1344_v23  ;;  %v3918_v23 = vld [vmem:[#allocation2 + $0x160] sm:$0xf0]  ;;  %2127 = vmatpush.bf16.msrb.mxu1 %v3925_v20 }
 0x1fd   : > { %v1409_v24 = vmax.f32 %v1361_v22, 0.0  ;;  %v3921_v22 = vor.u32 %v4070_v21, %v3918_v23  ;;  %v4055_v23 = vld [vmem:[#allocation2 + $0xcc] sm:$0xf] }
 0x1ff   : > { %v1422_v28 = vpack.c.bf16 %v1409_v24, %v1408_v0  ;;  %v3884_v0 = vld [vmem:[#allocation2 + $0x100] sm:$0xf]  ;;  %2078 = vmatpush.bf16.msrb.mxu0 %v3921_v22  ;;  %v3862_v22 = vld [vmem:[#allocation2 + $0xe8] sm:$0xf0] }
 0x200   : > { %v4066_v24 = vld [vmem:[#allocation2 + $0x11c] sm:$0xf0] }
 0x201   : > { %3748 = vmatmul.msk.bf16.vlgmr.msra.gmra.mxu2 %vm921_vm0, %v1422_v28  ;;  %v4062_v28 = vld [vmem:[#allocation2 + $0x104] sm:$0xf] }
 0x207   : > { %v1293_v29 = vpop.f32.mrf.mxu1 }
 0x208   : > { %v1324_v30 = vpack.c.bf16 %v1293_v29, %v1293_v29 }
 0x20a   : > { %v1345_v31 = vunpack.c.l.bf16 %v1324_v30  ;;  %v3885_v30 = vor.u32 %v4066_v24, %v3884_v0  ;;  %v3865_v24 = vor.u32 %v4055_v23, %v3862_v22  ;;  %v4004_v23 = vld [vmem:[#allocation2 + $0x1d8] sm:$0xf] }
 0x20c   : > { %v1362_v34 = vadd.f32 %v4721_v52, %v1345_v31  ;;  %v3886_v31 = vld [vmem:[#allocation2 + $0x120] sm:$0xf0]  ;;  %2030 = vmatpush.bf16.msrb.mxu3 %v3885_v30 }
 0x20e   : > { %v1410_v42 = vmax.f32 %v1362_v34, 0.0  ;;  %v3892_v34 = vld [vmem:[#allocation2 + $0x108] sm:$0xf] }
 0x20f   : > { %v1295_v32 = vpop.f32.mrf.mxu1 }
 0x210   : > { %v1325_v33 = vpack.c.bf16 %v1295_v32, %v1295_v32  ;;  %2031 = vmatpush.bf16.msrb.mxu3 %v3853_v41 }
 0x212   : > { %v1346_v35 = vunpack.c.l.bf16 %v1325_v33  ;;  %v3889_v33 = vor.u32 %v4062_v28, %v3886_v31 }
 0x214   : > { %v1363_v40 = vadd.f32 %v4721_v52, %v1346_v35  ;;  %v4067_v35 = vld [vmem:[#allocation2 + $0x124] sm:$0xf0]  ;;  %2079 = vmatpush.bf16.msrb.mxu0 %v3889_v33  ;;  %2032 = vmatpush.bf16.msrb.mxu3 %v3821_v57  ;;  %v4047_v33 = vld [vmem:[#allocation2 + $0x8c] sm:$0xf] }
 0x215   : > { %v3893_v37 = vor.u32 %v4067_v35, %v3892_v34  ;;  %v3830_v34 = vld [vmem:[#allocation2 + $0xa8] sm:$0xf0] }
 0x216   : > { %v1411_v43 = vmax.f32 %v1363_v40, 0.0  ;;  %v3833_v35 = vor.u32 %v4047_v33, %v3830_v34  ;;  %v3974_v33 = vld [vmem:[#allocation2 + $0x1b8] sm:$0xf0] }
 0x217   : > { %2128 = vmatpush.bf16.msrb.mxu1 %v3893_v37  ;;  %v1549_v37 = vld [vmem:[%s5111_s8] sm:$0x1] }
 0x218   : > { %v1423_v44 = vpack.c.bf16 %v1411_v43, %v1410_v42  ;;  %v4054_v42 = vld [vmem:[#allocation2 + $0xc4] sm:$0xf]  ;;  %2033 = vmatpush.bf16.msrb.mxu3 %v3789_v6 }
 0x219   : > { %v1298_v45 = vpop.f32.mrf.mxu1  ;;  %v3854_v43 = vld [vmem:[#allocation2 + $0xe0] sm:$0xf0] }
 0x21a   : > { %3749 = vmatmul.msk.bf16.gmra.mxu2 %vm921_vm0, %v1423_v44  ;;  %v1326_v56 = vpack.c.bf16 %v1298_v45, %v1298_v45  ;;  %v3860_v44 = vld [vmem:[#allocation2 + $0xc8] sm:$0xf]  ;;  %v3857_v45 = vor.u32 %v4054_v42, %v3854_v43  ;;  %v4031_v42 = vld [vmem:[#allocation2 + $0xc] sm:$0xf] }
 0x21b   : > { %v3861_v48 = vor.u32 %v4059_v46, %v3860_v44  ;;  %v3766_v43 = vld [vmem:[#allocation2 + $0x28] sm:$0xf0] }
 0x21c   : > { %v1347_v58 = vunpack.c.l.bf16 %v1326_v56  ;;  %2080 = vmatpush.bf16.msrb.mxu0 %v3857_v45  ;;  %v3769_v46 = vor.u32 %v4031_v42, %v3766_v43 }
 0x21d   : > { %2129 = vmatpush.bf16.msrb.mxu1 %v3861_v48 }
 0x21e   : > { %v1364_v60 = vadd.f32 %v4721_v52, %v1347_v58  ;;  %v3828_v58 = vld [vmem:[#allocation2 + $0x88] sm:$0xf] }
 0x220   : > { %v1412_v1 = vmax.f32 %v1364_v60, 0.0  ;;  %v3825_v60 = vor.u32 %v4046_v54, %v3822_v27 }
 0x221   : > { %v1300_v26 = vpop.f32.mrf.mxu1 }
 0x222   : > { %v1327_v59 = vpack.c.bf16 %v1300_v26, %v1300_v26  ;;  %v4063_v26 = vld [vmem:[#allocation2 + $0x10c] sm:$0xf]  ;;  %2081 = vmatpush.bf16.msrb.mxu0 %v3825_v60 }
 0x224   : > { %v1348_v61 = vunpack.c.l.bf16 %v1327_v59  ;;  %v3894_v59 = vld [vmem:[#allocation2 + $0x128] sm:$0xf0] }
 0x225   : > { %v3897_v63 = vor.u32 %v4063_v26, %v3894_v59 }
 0x226   : > { %v1365_v3 = vadd.f32 %v4721_v52, %v1348_v61  ;;  %v4051_v61 = vld [vmem:[#allocation2 + $0xa4] sm:$0xf0] }
 0x227   : > { %2177 = vmatpush.bf16.msrb.mxu2 %v3897_v63 }
 0x228   : > { %v1413_v7 = vmax.f32 %v1365_v3, 0.0  ;;  %v3829_v3 = vor.u32 %v4051_v61, %v3828_v58 }
 0x22a   : > { %v1424_v51 = vpack.c.bf16 %v1413_v7, %v1412_v1  ;;  %v3790_v1 = vld [vmem:[#allocation2 + $0x60] sm:$0xf0]  ;;  %v3796_v7 = vld [vmem:[#allocation2 + $0x48] sm:$0xf]  ;;  %2130 = vmatpush.bf16.msrb.mxu1 %v3829_v3 }
 0x22b   : > { %v1303_v11 = vpop.f32.mrf.mxu1  ;;  %v3797_v10 = vor.u32 %v4043_v8, %v3796_v7  ;;  %2178 = vmatpush.bf16.msrb.mxu2 %v3865_v24 }
 0x22c   : > { %3750 = vmatmul.msk.bf16.gmra.mxu2 %vm921_vm0, %v1424_v51  ;;  %v1328_v14 = vpack.c.bf16 %v1303_v11, %v1303_v11  ;;  %v3793_v51 = vor.u32 %v4038_v5, %v3790_v1  ;;  %v3756_v11 = vld [vmem:[#allocation2] sm:$0xf] }
 0x22e   : > { %v1349_v29 = vunpack.c.l.bf16 %v1328_v14  ;;  %2082 = vmatpush.bf16.msrb.mxu0 %v3793_v51  ;;  %v3757_v14 = vor.u32 %v4034_v49, %v3756_v11  ;;  %2131 = vmatpush.bf16.msrb.mxu1 %v3797_v10 }
 0x22f   : > { %2179 = vmatpush.bf16.msrb.mxu2 %v3833_v35 }
 0x230   : > { %v1366_v39 = vadd.f32 %v4721_v52, %v1349_v29  ;;  %2034 = vmatpush.bf16.msrb.mxu3 %v3757_v14  ;;  %v4092_v14 = vld [vmem:[#allocation2 + $0x1ec] sm:$0xf0] }
 0x232   : > { %v1414_v55 = vmax.f32 %v1366_v39, 0.0  ;;  %2083 = vmatpush.bf16.msrb.mxu0 %v3761_v18  ;;  %2132 = vmatpush.bf16.msrb.mxu1 %v3765_v19  ;;  %v1551_v39 = vpack.i.b16 %v1549_v37, %v1549_v37  ;;  %v4006_v18 = vld [vmem:[#allocation2 + $0x1f8] sm:$0xf0] }
 0x233   : > { %v1305_v32 = vpop.f32.mrf.mxu1  ;;  %v4009_v19 = vor.u32 %v4089_v15, %v4006_v18  ;;  %v4069_v18 = vld [vmem:[#allocation2 + $0x134] sm:$0xf0] }
 0x234   : > { %v1329_v36 = vpack.c.bf16 %v1305_v32, %v1305_v32  ;;  %v1553_v45 = vperm.slane %v1551_v39, 0  ;;  %v3966_v39 = vld [vmem:[#allocation2 + $0x1b0] sm:$0xf0] }
 0x236   : > { %v1350_v40 = vunpack.c.l.bf16 %v1329_v36  ;;  %v4749_v50 = vunpack.c.l.bf16 %v1553_v45 }
 0x238   : > { %v1367_v47 = vadd.f32 %v4721_v52, %v1350_v40  ;;  %v3801_v40 = vor.u32 %v4039_v38, %v3798_v2  ;;  %v4080_v2 = vld [vmem:[#allocation2 + $0x194] sm:$0xf] }
 0x239   : > { %v3969_v43 = vor.u32 %v4080_v2, %v3966_v39  ;;  %v4056_v2 = vld [vmem:[#allocation2 + $0xd4] sm:$0xf] }
 0x23a   : > { %v1415_v56 = vmax.f32 %v1367_v47, 0.0  ;;  %2180 = vmatpush.bf16.msrb.mxu2 %v3801_v40  ;;  %v3972_v40 = vld [vmem:[#allocation2 + $0x198] sm:$0xf]  ;;  %v3870_v39 = vld [vmem:[#allocation2 + $0xf0] sm:$0xf0] }
 0x23c   : > { %v1425_v62 = vpack.c.bf16 %v1415_v56, %v1414_v55 }
 0x23e   : > { %3751 = vmatmul.msk.bf16.gmra.mxu2 %vm921_vm0, %v1425_v62 }
 0x23f   : > { %v1308_v9 = vpop.f32.mrf.mxu1  ;;  %2181 = vmatpush.bf16.msrb.mxu2 %v3769_v46 }
 0x240   : > { %v1330_v13 = vpack.c.bf16 %v1308_v9, %v1308_v9 }
 0x242   : > { %v1351_v20 = vunpack.c.l.bf16 %v1330_v13  ;;  %v3996_v13 = vld [vmem:[#allocation2 + $0x1d0] sm:$0xf] }
 0x243   : > { %v3997_v17 = vor.u32 %v4092_v14, %v3996_v13  ;;  %2370 = vmatpush.bf16.msra.mxu2 %v4009_v19 }
 0x244   : > { %v1368_v28 = vadd.f32 %v4721_v52, %v1351_v20  ;;  %v4088_v20 = vld [vmem:[#allocation2 + $0x1d4] sm:$0xf] }
 0x245   : > { %2223 = vmatpush.bf16.msra.mxu3 %v3997_v17  ;;  %v3908_v17 = vld [vmem:[#allocation2 + $0x118] sm:$0xf] }
 0x246   : > { %v1416_v31 = vmax.f32 %v1368_v28, 0.0  ;;  %v3909_v19 = vor.u32 %v4069_v18, %v3908_v17 }
 0x247   : > { %v1310_v21 = vpop.f32.mrf.mxu1 }
 0x248   : > { %v1331_v0 = vpack.c.bf16 %v1310_v21, %v1310_v21  ;;  %v3998_v21 = vld [vmem:[#allocation2 + $0x1f0] sm:$0xf0] }
 0x249   : > { %v4001_v22 = vor.u32 %v4088_v20, %v3998_v21 }
 0x24a   : > { %v1352_v29 = vunpack.c.l.bf16 %v1331_v0  ;;  %v4093_v0 = vld [vmem:[#allocation2 + $0x1f4] sm:$0xf0] }
 0x24b   : > { %v4005_v24 = vor.u32 %v4093_v0, %v4004_v23  ;;  %2272 = vmatpush.bf16.msra.mxu0 %v4001_v22 }
 0x24c   : > { %v1369_v30 = vadd.f32 %v4721_v52, %v1352_v29  ;;  %v3964_v29 = vld [vmem:[#allocation2 + $0x190] sm:$0xf] }
 0x24d   : > { %2321 = vmatpush.bf16.msra.mxu1 %v4005_v24  ;;  %v3868_v24 = vld [vmem:[#allocation2 + $0xd0] sm:$0xf] }
 0x24e   : > { %v1417_v32 = vmax.f32 %v1369_v30, 0.0  ;;  %v4084_v30 = vld [vmem:[#allocation2 + $0x1ac] sm:$0xf0] }
 0x24f   : > { %2273 = vmatpush.bf16.msra.mxu0 %v3969_v43 }
 0x250   : > { %v1426_v36 = vpack.c.bf16 %v1417_v32, %v1416_v31  ;;  %v4081_v31 = vld [vmem:[#allocation2 + $0x19c] sm:$0xf]  ;;  %v3965_v32 = vor.u32 %v4084_v30, %v3964_v29 }
 0x251   : > { %v3977_v34 = vor.u32 %v4081_v31, %v3974_v33  ;;  %v4057_v29 = vld [vmem:[#allocation2 + $0xdc] sm:$0xf] }
 0x252   : > { %3752 = vmatmul.msk.bf16.gmra.mxu2 %vm921_vm0, %v1426_v36  ;;  %2224 = vmatpush.bf16.msra.mxu3 %v3965_v32  ;;  %v3878_v31 = vld [vmem:[#allocation2 + $0xf8] sm:$0xf0] }
 0x253   : > { %2371 = vmatpush.bf16.msra.mxu2 %v3977_v34  ;;  %v3881_v32 = vor.u32 %v4057_v29, %v3878_v31 }
 0x254   : > { %v1493_v41 = vpop.f32.mrf.mxu0 }
 0x255   : > { %v1533_v44 = vpack.c.bf16 %v1493_v41, %v1493_v41 }
 0x257   : > { %v1554_v48 = vunpack.c.l.bf16 %v1533_v44  ;;  %v4085_v44 = vld [vmem:[#allocation2 + $0x1b4] sm:$0xf0] }
 0x258   : > { %v1313_v47 = vpop.f32.mrf.mxu1  ;;  %v3973_v45 = vor.u32 %v4085_v44, %v3972_v40  ;;  %v3876_v40 = vld [vmem:[#allocation2 + $0xd8] sm:$0xf] }
 0x259   : > { %v1332_v53 = vpack.c.bf16 %v1313_v47, %v1313_v47  ;;  %v1571_v56 = vadd.f32 %v4749_v50, %v1554_v48 }
 0x25a   : > { %2322 = vmatpush.bf16.msra.mxu1 %v3973_v45 }
 0x25b   : > { %v1353_v57 = vunpack.c.l.bf16 %v1332_v53  ;;  %v1619_v60 = vmax.f32 %v1571_v56, 0.0  ;;  %v4073_v56 = vld [vmem:[#allocation2 + $0x15c] sm:$0xf] }
 0x25c   : > { %v1495_v54 = vpop.f32.mrf.mxu0 }
 0x25d   : > { %v1534_v55 = vpack.c.bf16 %v1495_v54, %v1495_v54  ;;  %v1370_v61 = vadd.f32 %v4721_v52, %v1353_v57  ;;  %v3932_v54 = vld [vmem:[#allocation2 + $0x150] sm:$0xf] }
 0x25f   : > { %v1555_v27 = vunpack.c.l.bf16 %v1534_v55  ;;  %v1418_v5 = vmax.f32 %v1370_v61, 0.0  ;;  %v4076_v55 = vld [vmem:[#allocation2 + $0x16c] sm:$0xf0]  ;;  %v3934_v61 = vld [vmem:[#allocation2 + $0x170] sm:$0xf0] }
 0x260   : > { %v1315_v58 = vpop.f32.mrf.mxu1  ;;  %v3933_v57 = vor.u32 %v4076_v55, %v3932_v54  ;;  %v3836_v55 = vld [vmem:[#allocation2 + $0x90] sm:$0xf] }
 0x261   : > { %v1572_v26 = vadd.f32 %v4749_v50, %v1555_v27  ;;  %v1333_v59 = vpack.c.bf16 %v1315_v58, %v1315_v58  ;;  %v3942_v27 = vld [vmem:[#allocation2 + $0x178] sm:$0xf0] }
 0x262   : > { %v3945_v58 = vor.u32 %v4073_v56, %v3942_v27  ;;  %2225 = vmatpush.bf16.msra.mxu3 %v3933_v57  ;;  %v4052_v56 = vld [vmem:[#allocation2 + $0xac] sm:$0xf0]  ;;  %v4049_v57 = vld [vmem:[#allocation2 + $0x9c] sm:$0xf] }
 0x263   : > { %v1620_v62 = vmax.f32 %v1572_v26, 0.0  ;;  %v1354_v63 = vunpack.c.l.bf16 %v1333_v59  ;;  %v3837_v27 = vor.u32 %v4052_v56, %v3836_v55  ;;  %v3774_v55 = vld [vmem:[#allocation2 + $0x30] sm:$0xf0]  ;;  %v3780_v56 = vld [vmem:[#allocation2 + $0x18] sm:$0xf] }
 0x264   : > { %2372 = vmatpush.bf16.msra.mxu2 %v3945_v58  ;;  %v3846_v58 = vld [vmem:[#allocation2 + $0xb8] sm:$0xf0] }
 0x265   : > { %v4754_v3 = vpack.c.bf16 %v1620_v62, %v1619_v60  ;;  %v1371_v4 = vadd.f32 %v4721_v52, %v1354_v63  ;;  %v1498_v25 = vpop.f32.mrf.mxu0  ;;  %v4072_v60 = vld [vmem:[#allocation2 + $0x154] sm:$0xf]  ;;  %v3940_v62 = vld [vmem:[#allocation2 + $0x158] sm:$0xf] }
 0x266   : > { %v1535_v1 = vpack.c.bf16 %v1498_v25, %v1498_v25  ;;  %v3937_v63 = vor.u32 %v4072_v60, %v3934_v61  ;;  %v3849_v61 = vor.u32 %v4049_v57, %v3846_v58 }
 0x267   : > { %v1419_v6 = vmax.f32 %v1371_v4, 0.0  ;;  %2035 = vmatmul.bf16.vlgmr.msrb.gmra.mxu3 %v4754_v3  ;;  %2084 = vmatmul.bf16.vlgmr.msrb.gmra.mxu0 %v4754_v3  ;;  %v4077_v4 = vld [vmem:[#allocation2 + $0x174] sm:$0xf0] }
 0x268   : > { %2133 = vmatmul.bf16.vlgmr.msrb.gmra.mxu1 %v4754_v3  ;;  %v1556_v8 = vunpack.c.l.bf16 %v1535_v1  ;;  %v3941_v25 = vor.u32 %v4077_v4, %v3940_v62  ;;  %2274 = vmatpush.bf16.msra.mxu0 %v3937_v63  ;;  %v3844_v63 = vld [vmem:[#allocation2 + $0x98] sm:$0xf] }
 0x269   : > { %v1427_v7 = vpack.c.bf16 %v1419_v6, %v1418_v5  ;;  %v4053_v4 = vld [vmem:[#allocation2 + $0xb4] sm:$0xf0] }
 0x26a   : > { %v1573_v10 = vadd.f32 %v4749_v50, %v1556_v8  ;;  %2323 = vmatpush.bf16.msra.mxu1 %v3941_v25 }
 0x26b   : > { %3753 = vmatmul.msk.bf16.gmra.mxu2 %vm921_vm0, %v1427_v7 }
 0x26c   : > { %v1621_v49 = vmax.f32 %v1573_v10, 0.0  ;;  %v4065_v10 = vld [vmem:[#allocation2 + $0x11c] sm:$0xf] }
 0x26d   : > { %v1500_v9 = vpop.f32.mrf.mxu0 }
 0x26e   : > { %v1536_v51 = vpack.c.bf16 %v1500_v9, %v1500_v9  ;;  %v3900_v9 = vld [vmem:[#allocation2 + $0x110] sm:$0xf]  ;;  %2324 = vmatpush.bf16.msra.mxu1 %v3909_v19 }
 0x270   : > { %v1557_v11 = vunpack.c.l.bf16 %v1536_v51  ;;  %v4068_v51 = vld [vmem:[#allocation2 + $0x12c] sm:$0xf0] }
 0x272   : > { %v1574_v52 = vadd.f32 %v4749_v50, %v1557_v11  ;;  %v3901_v11 = vor.u32 %v4068_v51, %v3900_v9 }
 0x274   : > { %v1622_v12 = vmax.f32 %v1574_v52, 0.0  ;;  %v3910_v52 = vld [vmem:[#allocation2 + $0x138] sm:$0xf0]  ;;  %2226 = vmatpush.bf16.msra.mxu3 %v3901_v11 }
 0x275   : > { %v3913_v14 = vor.u32 %v4065_v10, %v3910_v52  ;;  %v3804_v52 = vld [vmem:[#allocation2 + $0x50] sm:$0xf] }
 0x276   : > { %v4763_v16 = vpack.c.bf16 %v1622_v12, %v1621_v49  ;;  %v4064_v49 = vld [vmem:[#allocation2 + $0x114] sm:$0xf] }
 0x277   : > { %v3902_v12 = vld [vmem:[#allocation2 + $0x130] sm:$0xf0]  ;;  %2373 = vmatpush.bf16.msra.mxu2 %v3913_v14  ;;  %v3814_v14 = vld [vmem:[#allocation2 + $0x78] sm:$0xf0] }
 0x278   : > { %2040 = vmatmul.bf16.gmra.mxu3 %v4763_v16  ;;  %2089 = vmatmul.bf16.gmra.mxu0 %v4763_v16  ;;  %v3905_v15 = vor.u32 %v4064_v49, %v3902_v12  ;;  %v4044_v49 = vld [vmem:[#allocation2 + $0x6c] sm:$0xf0]  ;;  %v4041_v12 = vld [vmem:[#allocation2 + $0x5c] sm:$0xf] }
 0x279   : > { %2138 = vmatmul.bf16.gmra.mxu1 %v4763_v16 }
 0x27a   : > { %2275 = vmatpush.bf16.msra.mxu0 %v3905_v15  ;;  %v3817_v15 = vor.u32 %v4041_v12, %v3814_v14 }
 0x27b   : > { %2182 = vmatmul.bf16.vlgmr.msrb.gmra.mxu2 %v4754_v3 }
 0x27c   : > { %2374 = vmatpush.bf16.msra.mxu2 %v3881_v32 }
 0x280   : > { %2375 = vmatpush.bf16.msra.mxu2 %v3849_v61 }
 0x284   : > { %v1503_v28 = vpop.f32.mrf.mxu2  ;;  %2376 = vmatpush.bf16.msra.mxu2 %v3817_v15 }
 0x285   : > { %v1537_v35 = vpack.c.bf16 %v1503_v28, %v1503_v28  ;;  %v4060_v28 = vld [vmem:[#allocation2 + $0xec] sm:$0xf0] }
 0x286   : > { %v3869_v30 = vor.u32 %v4060_v28, %v3868_v24  ;;  %v3806_v24 = vld [vmem:[#allocation2 + $0x70] sm:$0xf0]  ;;  %v3812_v28 = vld [vmem:[#allocation2 + $0x58] sm:$0xf] }
 0x287   : > { %v1558_v36 = vunpack.c.l.bf16 %v1537_v35 }
 0x288   : > { %2227 = vmatpush.bf16.msra.mxu3 %v3869_v30  ;;  %v4045_v30 = vld [vmem:[#allocation2 + $0x74] sm:$0xf0] }
 0x289   : > { %v1575_v41 = vadd.f32 %v4749_v50, %v1558_v36  ;;  %v3813_v32 = vor.u32 %v4045_v30, %v3812_v28 }
 0x28b   : > { %2187 = vmatmul.bf16.gmra.mxu2 %v4763_v16  ;;  %v1623_v47 = vmax.f32 %v1575_v41, 0.0  ;;  %v3873_v41 = vor.u32 %v4056_v2, %v3870_v39  ;;  %v3772_v2 = vld [vmem:[#allocation2 + $0x10] sm:$0xf] }
 0x28c   : > { %v1505_v37 = vpop.f32.mrf.mxu2  ;;  %2228 = vmatpush.bf16.msra.mxu3 %v3837_v27  ;;  %v4036_v39 = vld [vmem:[#allocation2 + $0x2c] sm:$0xf0]  ;;  %v4037_v27 = vld [vmem:[#allocation2 + $0x34] sm:$0xf0] }
 0x28d   : > { %v1538_v38 = vpack.c.bf16 %v1505_v37, %v1505_v37  ;;  %2276 = vmatpush.bf16.msra.mxu0 %v3873_v41 }
 0x28f   : > { %v1559_v42 = vunpack.c.l.bf16 %v1538_v38 }
 0x291   : > { %v1576_v46 = vadd.f32 %v4749_v50, %v1559_v42  ;;  %v4061_v42 = vld [vmem:[#allocation2 + $0xf4] sm:$0xf0] }
 0x292   : > { %v3877_v45 = vor.u32 %v4061_v42, %v3876_v40  ;;  %v4033_v40 = vld [vmem:[#allocation2 + $0x1c] sm:$0xf] }
 0x293   : > { %v1624_v48 = vmax.f32 %v1576_v46, 0.0 }
 0x294   : > { %2325 = vmatpush.bf16.msra.mxu1 %v3877_v45 }
 0x295   : > { %v4772_v53 = vpack.c.bf16 %v1624_v48, %v1623_v47  ;;  %v2483_v48 = vld [vmem:[%s5113_s10] sm:$0xff] }
 0x296   : > { %2485 = vst [vmem:[#allocation1] ss:$9 sm:$0xff] %v2483_v48 }
 0x297   : > { %2045 = vmatmul.bf16.gmra.mxu3 %v4772_v53  ;;  %2094 = vmatmul.bf16.gmra.mxu0 %v4772_v53 }
 0x298   : > { %2143 = vmatmul.bf16.gmra.mxu1 %v4772_v53 }
 0x29b   : > { %2192 = vmatmul.bf16.gmra.mxu2 %v4772_v53 }
 0x29d   : > { %v1508_v26 = vpop.f32.mrf.mxu2 }
 0x29e   : > { %v1539_v59 = vpack.c.bf16 %v1508_v26, %v1508_v26  ;;  %v4048_v26 = vld [vmem:[#allocation2 + $0x94] sm:$0xf] }
 0x2a0   : > { %v1560_v5 = vunpack.c.l.bf16 %v1539_v59  ;;  %v3838_v59 = vld [vmem:[#allocation2 + $0xb0] sm:$0xf0] }
 0x2a1   : > { %v3841_v62 = vor.u32 %v4048_v26, %v3838_v59  ;;  %v3781_v59 = vor.u32 %v4037_v27, %v3780_v56 }
 0x2a2   : > { %v1577_v7 = vadd.f32 %v4749_v50, %v1560_v5  ;;  %v3845_v5 = vor.u32 %v4053_v4, %v3844_v63 }
 0x2a3   : > { %2277 = vmatpush.bf16.msra.mxu0 %v3841_v62 }
 0x2a4   : > { %v1625_v20 = vmax.f32 %v1577_v7, 0.0  ;;  %2326 = vmatpush.bf16.msra.mxu1 %v3845_v5 }
 0x2a5   : > { %v1510_v6 = vpop.f32.mrf.mxu2 }
 0x2a6   : > { %v1540_v1 = vpack.c.bf16 %v1510_v6, %v1510_v6 }
 0x2a8   : > { %v1561_v8 = vunpack.c.l.bf16 %v1540_v1  ;;  %2327 = vmatpush.bf16.msra.mxu1 %v3813_v32 }
 0x2aa   : > { %v1578_v13 = vadd.f32 %v4749_v50, %v1561_v8 }
 0x2ac   : > { %v1626_v21 = vmax.f32 %v1578_v13, 0.0  ;;  %v3805_v13 = vor.u32 %v4044_v49, %v3804_v52  ;;  %2328 = vmatpush.bf16.msra.mxu1 %v3781_v59 }
 0x2ae   : > { %v4780_v23 = vpack.c.bf16 %v1626_v21, %v1625_v20  ;;  %2229 = vmatpush.bf16.msra.mxu3 %v3805_v13 }
 0x2af   : > { %v1513_v22 = vpop.f32.mrf.mxu2 }
 0x2b0   : > { %2050 = vmatmul.bf16.gmra.mxu3 %v4780_v23  ;;  %2099 = vmatmul.bf16.gmra.mxu0 %v4780_v23  ;;  %v1541_v0 = vpack.c.bf16 %v1513_v22, %v1513_v22 }
 0x2b1   : > { %2148 = vmatmul.bf16.gmra.mxu1 %v4780_v23  ;;  %2197 = vmatmul.bf16.gmra.mxu2 %v4780_v23 }
 0x2b2   : > { %v1562_v33 = vunpack.c.l.bf16 %v1541_v0  ;;  %v4040_v0 = vld [vmem:[#allocation2 + $0x54] sm:$0xf] }
 0x2b3   : > { %v3809_v29 = vor.u32 %v4040_v0, %v3806_v24 }
 0x2b4   : > { %v1579_v36 = vadd.f32 %v4749_v50, %v1562_v33 }
 0x2b5   : > { %2278 = vmatpush.bf16.msra.mxu0 %v3809_v29 }
 0x2b6   : > { %v1627_v43 = vmax.f32 %v1579_v36, 0.0 }
 0x2b7   : > { %v1515_v34 = vpop.f32.mrf.mxu2 }
 0x2b8   : > { %v1542_v35 = vpack.c.bf16 %v1515_v34, %v1515_v34 }
 0x2ba   : > { %v1563_v37 = vunpack.c.l.bf16 %v1542_v35 }
 0x2bc   : > { %v1580_v38 = vadd.f32 %v4749_v50, %v1563_v37  ;;  %v2486_v37 = vld [vmem:[#allocation1] sm:$0xff] }
 0x2bd   : > { %v2494_v42 = vpack.i.b16 %v2486_v37, %v2486_v37 }
 0x2be   : > { %v1628_v44 = vmax.f32 %v1580_v38, 0.0  ;;  %v2487_v38 = vld [vmem:[#allocation1 + $0x9] sm:$0xff] }
 0x2bf   : > { %v2496_v58 = vperm.slane %v2494_v42, 0 }
 0x2c0   : > { %v4788_v46 = vpack.c.bf16 %v1628_v44, %v1627_v43  ;;  %v3773_v43 = vor.u32 %v4036_v39, %v3772_v2  ;;  %v3782_v44 = vld [vmem:[#allocation2 + $0x38] sm:$0xf0] }
 0x2c1   : > { %v1518_v47 = vpop.f32.mrf.mxu2  ;;  %v3785_v48 = vor.u32 %v4033_v40, %v3782_v44  ;;  %v4813_v63 = vunpack.c.l.bf16 %v2496_v58 }
 0x2c2   : > { %2055 = vmatmul.bf16.gmra.mxu3 %v4788_v46  ;;  %2104 = vmatmul.bf16.gmra.mxu0 %v4788_v46  ;;  %v1543_v54 = vpack.c.bf16 %v1518_v47, %v1518_v47  ;;  %v2497_v47 = vpack.i.b16 %v2487_v38, %v2487_v38 }
 0x2c3   : > { %2153 = vmatmul.bf16.gmra.mxu1 %v4788_v46  ;;  %2202 = vmatmul.bf16.gmra.mxu2 %v4788_v46 }
 0x2c4   : > { %v1564_v60 = vunpack.c.l.bf16 %v1543_v54  ;;  %2230 = vmatpush.bf16.msra.mxu3 %v3773_v43  ;;  %v4032_v54 = vld [vmem:[#allocation2 + $0x14] sm:$0xf]  ;;  %2377 = vmatpush.bf16.msra.mxu2 %v3785_v48 }
 0x2c5   : > { %v3777_v57 = vor.u32 %v4032_v54, %v3774_v55 }
 0x2c6   : > { %v1581_v1 = vadd.f32 %v4749_v50, %v1564_v60  ;;  %v2499_v60 = vperm.slane %v2497_v47, 0 }
 0x2c7   : > { %2279 = vmatpush.bf16.msra.mxu0 %v3777_v57 }
 0x2c8   : > { %v1629_v9 = vmax.f32 %v1581_v1, 0.0 }
 0x2c9   : > { %v1520_v25 = vpop.f32.mrf.mxu2 }
 0x2ca   : > { %v1544_v6 = vpack.c.bf16 %v1520_v25, %v1520_v25 }
 0x2cc   : > { %v1565_v7 = vunpack.c.l.bf16 %v1544_v6  ;;  %v4815_v6 = vunpack.c.l.bf16 %v2499_v60 }
 0x2ce   : > { %v1582_v8 = vadd.f32 %v4749_v50, %v1565_v7 }
 0x2d0   : > { %v1630_v51 = vmax.f32 %v1582_v8, 0.0 }
 0x2d2   : > { %v4799_v10 = vpack.c.bf16 %v1630_v51, %v1629_v9 }
 0x2d4   : > { %2060 = vmatmul.bf16.gmra.mxu3 %v4799_v10  ;;  %2109 = vmatmul.bf16.gmra.mxu0 %v4799_v10 }
 0x2d5   : > { %2158 = vmatmul.bf16.gmra.mxu1 %v4799_v10  ;;  %2207 = vmatmul.bf16.gmra.mxu2 %v4799_v10  ;;  %v1523_v11 = vpop.f32.mrf.mxu2 }
 0x2d6   : > { %v1545_v17 = vpack.c.bf16 %v1523_v11, %v1523_v11 }
 0x2d8   : > { %v1566_v18 = vunpack.c.l.bf16 %v1545_v17 }
 0x2da   : > { %v1583_v21 = vadd.f32 %v4749_v50, %v1566_v18 }
 0x2dc   : > { %v1631_v33 = vmax.f32 %v1583_v21, 0.0  ;;  %v2489_v21 = vld [vmem:[#allocation1 + $0x1b] sm:$0xff] }
 0x2dd   : > { %v1525_v19 = vpop.f32.mrf.mxu2 }
 0x2de   : > { %v1546_v20 = vpack.c.bf16 %v1525_v19, %v1525_v19  ;;  %v2488_v19 = vld [vmem:[#allocation1 + $0x12] sm:$0xff] }
 0x2e0   : > { %v1567_v22 = vunpack.c.l.bf16 %v1546_v20 }
 0x2e2   : > { %v1584_v31 = vadd.f32 %v4749_v50, %v1567_v22 }
 0x2e4   : > { %v1632_v34 = vmax.f32 %v1584_v31, 0.0  ;;  %v2085_v36 = vpop.f32.mrf.mxu0  ;;  %v2500_v31 = vpack.i.b16 %v2488_v19, %v2488_v19 }
 0x2e5   : > { %v2134_v9 = vpop.f32.mrf.mxu1 }
 0x2e6   : > { %v4807_v35 = vpack.c.bf16 %v1632_v34, %v1631_v33  ;;  %v2502_v47 = vperm.slane %v2500_v31, 0 }
 0x2e8   : > { %2065 = vmatmul.bf16.gmra.mxu3 %v4807_v35  ;;  %2114 = vmatmul.bf16.gmra.mxu0 %v4807_v35  ;;  %v4831_v59 = vunpack.c.l.bf16 %v2502_v47 }
 0x2e9   : > { %2163 = vmatmul.bf16.gmra.mxu1 %v4807_v35  ;;  %2212 = vmatmul.bf16.gmra.mxu2 %v4807_v35 }
 0x2ea   : > { %v2036_v41 = vpop.f32.mrf.mxu3 }
 0x2eb   : > { %v2419_v45 = vpack.c.bf16 %v2085_v36, %v2036_v41  ;;  %v2503_v36 = vpack.i.b16 %v2489_v21, %v2489_v21 }
 0x2ec   : > { %v2087_v61 = vpop.f32.mrf.mxu0 }
 0x2ed   : > { %v2518_v25 = vunpack.c.l.bf16 %v2419_v45  ;;  %v2519_v5 = vunpack.c.h.bf16 %v2419_v45  ;;  %v2136_v42 = vpop.f32.mrf.mxu1  ;;  %v2505_v48 = vperm.slane %v2503_v36, 0 }
 0x2ee   : > { %v1528_v26 = vpop.f32.mrf.mxu2 }
 0x2ef   : > { %v1547_v62 = vpack.c.bf16 %v1528_v26, %v1528_v26  ;;  %v2654_v52 = vadd.f32 %v4813_v63, %v2518_v25  ;;  %v2655_v49 = vadd.f32 %v4815_v6, %v2519_v5  ;;  %v4833_v60 = vunpack.c.l.bf16 %v2505_v48 }
 0x2f1   : > { %v1568_v7 = vunpack.c.l.bf16 %v1547_v62  ;;  %v2974_v22 = vmax.f32 %v2654_v52, 0.0  ;;  %v2975_v0 = vmax.f32 %v2655_v49, 0.0 }
 0x2f2   : > { %v2038_v4 = vpop.f32.mrf.mxu3 }
 0x2f3   : > { %v2423_v1 = vpack.c.bf16 %v2087_v61, %v2038_v4  ;;  %v1585_v15 = vadd.f32 %v4749_v50, %v1568_v7  ;;  %v3102_v39 = vpack.c.bf16 %v2975_v0, %v2974_v22 }
 0x2f5   : > { %v2526_v8 = vunpack.c.l.bf16 %v2423_v1  ;;  %v2527_v51 = vunpack.c.h.bf16 %v2423_v1  ;;  %v2090_v24 = vpop.f32.mrf.mxu0  ;;  %v1633_v32 = vmax.f32 %v1585_v15, 0.0  ;;  %v3166_v56 = vunpack.c.l.bf16 %v3102_v39 }
 0x2f6   : > { %v1530_v11 = vpop.f32.mrf.mxu2  ;;  %v3167_v57 = vunpack.c.h.bf16 %v3102_v39 }
 0x2f7   : > { %v2662_v12 = vadd.f32 %v4813_v63, %v2526_v8  ;;  %v1548_v13 = vpack.c.bf16 %v1530_v11, %v1530_v11  ;;  %v2663_v14 = vadd.f32 %v4815_v6, %v2527_v51  ;;  %v2139_v11 = vpop.f32.mrf.mxu1 }
 0x2f9   : > { %v2982_v17 = vmax.f32 %v2662_v12, 0.0  ;;  %v1569_v18 = vunpack.c.l.bf16 %v1548_v13  ;;  %v2983_v20 = vmax.f32 %v2663_v14, 0.0 }
 0x2fb   : > { %v1586_v28 = vadd.f32 %v4749_v50, %v1569_v18  ;;  %v2041_v29 = vpop.f32.mrf.mxu3  ;;  %v3106_v33 = vpack.c.bf16 %v2983_v20, %v2982_v17 }
 0x2fc   : > { %v2427_v30 = vpack.c.bf16 %v2090_v24, %v2041_v29 }
 0x2fd   : > { %v1634_v34 = vmax.f32 %v1586_v28, 0.0  ;;  %v3174_v50 = vunpack.c.l.bf16 %v3106_v33  ;;  %v3175_v45 = vunpack.c.h.bf16 %v3106_v33  ;;  %v2092_v15 = vpop.f32.mrf.mxu0 }
 0x2fe   : > { %v2534_v37 = vunpack.c.l.bf16 %v2427_v30  ;;  %v2535_v38 = vunpack.c.h.bf16 %v2427_v30  ;;  %v2183_v2 = vpop.f32.mrf.mxu2 }
 0x2ff   : > { %v4823_v40 = vpack.c.bf16 %v1634_v34, %v1633_v32  ;;  %v2420_v41 = vpack.c.bf16 %v2183_v2, %v2134_v9  ;;  %v3294_v58 = vmax.f32 %v3166_v56, %v3174_v50  ;;  %v3315_v26 = vmax.f32 %v3167_v57, %v3175_v45  ;;  %v2141_v36 = vpop.f32.mrf.mxu1 }
 0x300   : > { %v2670_v43 = vadd.f32 %v4813_v63, %v2534_v37  ;;  %v2671_v44 = vadd.f32 %v4815_v6, %v2535_v38 }
 0x301   : > { %2070 = vmatmul.bf16.gmra.mxu3 %v4823_v40  ;;  %2119 = vmatmul.bf16.gmra.mxu0 %v4823_v40  ;;  %v2520_v4 = vunpack.c.l.bf16 %v2420_v41  ;;  %v2521_v25 = vunpack.c.h.bf16 %v2420_v41 }
 0x302   : > { %v2990_v54 = vmax.f32 %v2670_v43, 0.0  ;;  %v2991_v55 = vmax.f32 %v2671_v44, 0.0  ;;  %2168 = vmatmul.bf16.gmra.mxu1 %v4823_v40  ;;  %2217 = vmatmul.bf16.gmra.mxu2 %v4823_v40 }
 0x303   : > { %v2656_v52 = vadd.f32 %v4831_v59, %v2520_v4  ;;  %v2657_v49 = vadd.f32 %v4833_v60, %v2521_v25  ;;  %v2043_v12 = vpop.f32.mrf.mxu3 }
 0x304   : > { %v3110_v27 = vpack.c.bf16 %v2991_v55, %v2990_v54  ;;  %v2431_v21 = vpack.c.bf16 %v2092_v15, %v2043_v12 }
 0x305   : > { %v2976_v19 = vmax.f32 %v2656_v52, 0.0  ;;  %v2977_v20 = vmax.f32 %v2657_v49, 0.0 }
 0x306   : > { %v3182_v61 = vunpack.c.l.bf16 %v3110_v27  ;;  %v3183_v62 = vunpack.c.h.bf16 %v3110_v27  ;;  %v2185_v5 = vpop.f32.mrf.mxu2  ;;  %v2542_v31 = vunpack.c.l.bf16 %v2431_v21  ;;  %v2543_v32 = vunpack.c.h.bf16 %v2431_v21 }
 0x307   : > { %v2424_v1 = vpack.c.bf16 %v2185_v5, %v2136_v42  ;;  %v3103_v30 = vpack.c.bf16 %v2977_v20, %v2976_v19 }
 0x308   : > { %v4835_v7 = vmax.f32 %v3294_v58, %v3182_v61  ;;  %v4837_v8 = vmax.f32 %v3315_v26, %v3183_v62  ;;  %v2678_v43 = vadd.f32 %v4813_v63, %v2542_v31  ;;  %v2679_v44 = vadd.f32 %v4815_v6, %v2543_v32 }
 0x309   : > { %v2528_v9 = vunpack.c.l.bf16 %v2424_v1  ;;  %v2529_v51 = vunpack.c.h.bf16 %v2424_v1  ;;  %v3168_v41 = vunpack.c.l.bf16 %v3103_v30  ;;  %v3169_v42 = vunpack.c.h.bf16 %v3103_v30 }
 0x30a   : > { %v2998_v58 = vmax.f32 %v2678_v43, 0.0  ;;  %v2999_v26 = vmax.f32 %v2679_v44, 0.0 }
 0x30b   : > { %v2664_v13 = vadd.f32 %v4831_v59, %v2528_v9  ;;  %v2665_v14 = vadd.f32 %v4833_v60, %v2529_v51 }
 0x30c   : > { %v3114_v52 = vpack.c.bf16 %v2999_v26, %v2998_v58 }
 0x30d   : > { %v2984_v17 = vmax.f32 %v2664_v13, 0.0  ;;  %v2985_v18 = vmax.f32 %v2665_v14, 0.0 }
 0x30e   : > { %v2188_v22 = vpop.f32.mrf.mxu2  ;;  %v3190_v21 = vunpack.c.l.bf16 %v3114_v52 }
 0x30f   : > { %v2428_v0 = vpack.c.bf16 %v2188_v22, %v2139_v11  ;;  %v3107_v24 = vpack.c.bf16 %v2985_v18, %v2984_v17  ;;  %v3191_v22 = vunpack.c.h.bf16 %v3114_v52 }
 0x311   : > { %v2536_v28 = vunpack.c.l.bf16 %v2428_v0  ;;  %v2537_v29 = vunpack.c.h.bf16 %v2428_v0  ;;  %2231 = vmatmul.bf16.vlgmr.msra.gmra.mxu3 %v4754_v3  ;;  %2280 = vmatmul.bf16.vlgmr.msra.gmra.mxu0 %v4754_v3  ;;  %v3176_v37 = vunpack.c.l.bf16 %v3107_v24  ;;  %v3177_v38 = vunpack.c.h.bf16 %v3107_v24 }
 0x312   : > { %2329 = vmatmul.bf16.vlgmr.msra.gmra.mxu1 %v4754_v3  ;;  %2378 = vmatmul.bf16.vlgmr.msra.gmra.mxu2 %v4754_v3 }
 0x313   : > { %v2672_v33 = vadd.f32 %v4831_v59, %v2536_v28  ;;  %v2673_v34 = vadd.f32 %v4833_v60, %v2537_v29  ;;  %v3336_v48 = vmax.f32 %v3168_v41, %v3176_v37  ;;  %v3357_v3 = vmax.f32 %v3169_v42, %v3177_v38 }
 0x314   : > { %v2095_v56 = vpop.f32.mrf.mxu0 }
 0x315   : > { %v2992_v2 = vmax.f32 %v2672_v33, 0.0  ;;  %v2993_v39 = vmax.f32 %v2673_v34, 0.0  ;;  %v2144_v1 = vpop.f32.mrf.mxu1 }
 0x316   : > { %v2190_v50 = vpop.f32.mrf.mxu2 }
 0x317   : > { %v3111_v45 = vpack.c.bf16 %v2993_v39, %v2992_v2  ;;  %v2432_v47 = vpack.c.bf16 %v2190_v50, %v2141_v36  ;;  %v3296_v2 = vmax.f32 %v4835_v7, %v3190_v21  ;;  %v3317_v39 = vmax.f32 %v4837_v8, %v3191_v22 }
 0x319   : > { %v3184_v54 = vunpack.c.l.bf16 %v3111_v45  ;;  %v3185_v55 = vunpack.c.h.bf16 %v3111_v45  ;;  %v2544_v57 = vunpack.c.l.bf16 %v2432_v47  ;;  %v2545_v27 = vunpack.c.h.bf16 %v2432_v47 }
 0x31a   : > { %v2046_v61 = vpop.f32.mrf.mxu3 }
 0x31b   : > { %v3337_v62 = vmax.f32 %v3336_v48, %v3184_v54  ;;  %v3358_v4 = vmax.f32 %v3357_v3, %v3185_v55  ;;  %v2680_v25 = vadd.f32 %v4831_v59, %v2544_v57  ;;  %v2681_v5 = vadd.f32 %v4833_v60, %v2545_v27 }
 0x31c   : > { %v2435_v9 = vpack.c.bf16 %v2095_v56, %v2046_v61  ;;  %v2097_v31 = vpop.f32.mrf.mxu0 }
 0x31d   : > { %v3000_v51 = vmax.f32 %v2680_v25, 0.0  ;;  %v3001_v11 = vmax.f32 %v2681_v5, 0.0  ;;  %v2146_v43 = vpop.f32.mrf.mxu1 }
 0x31e   : > { %v2550_v49 = vunpack.c.l.bf16 %v2435_v9  ;;  %v2551_v12 = vunpack.c.h.bf16 %v2435_v9  ;;  %v2193_v13 = vpop.f32.mrf.mxu2 }
 0x31f   : > { %v3115_v14 = vpack.c.bf16 %v3001_v11, %v3000_v51  ;;  %v2436_v15 = vpack.c.bf16 %v2193_v13, %v2144_v1 }
 0x320   : > { %v2686_v17 = vadd.f32 %v4813_v63, %v2550_v49  ;;  %v2687_v18 = vadd.f32 %v4815_v6, %v2551_v12 }
 0x321   : > { %v2552_v19 = vunpack.c.l.bf16 %v2436_v15  ;;  %v2553_v20 = vunpack.c.h.bf16 %v2436_v15  ;;  %2236 = vmatmul.bf16.gmra.mxu3 %v4763_v16  ;;  %2285 = vmatmul.bf16.gmra.mxu0 %v4763_v16  ;;  %v3192_v29 = vunpack.c.l.bf16 %v3115_v14  ;;  %v3193_v30 = vunpack.c.h.bf16 %v3115_v14 }
 0x322   : > { %v3006_v0 = vmax.f32 %v2686_v17, 0.0  ;;  %v3007_v24 = vmax.f32 %v2687_v18, 0.0  ;;  %2334 = vmatmul.bf16.gmra.mxu1 %v4763_v16  ;;  %2383 = vmatmul.bf16.gmra.mxu2 %v4763_v16  ;;  %v2048_v28 = vpop.f32.mrf.mxu3 }
 0x323   : > { %v2688_v32 = vadd.f32 %v4831_v59, %v2552_v19  ;;  %v2689_v33 = vadd.f32 %v4833_v60, %v2553_v20  ;;  %v2439_v36 = vpack.c.bf16 %v2097_v31, %v2048_v28  ;;  %v3338_v44 = vmax.f32 %v3337_v62, %v3192_v29 }
 0x324   : > { %v3118_v34 = vpack.c.bf16 %v3007_v24, %v3006_v0  ;;  %v3359_v50 = vmax.f32 %v3358_v4, %v3193_v30 }
 0x325   : > { %v3008_v37 = vmax.f32 %v2688_v32, 0.0  ;;  %v3009_v38 = vmax.f32 %v2689_v33, 0.0  ;;  %v2558_v54 = vunpack.c.l.bf16 %v2439_v36  ;;  %v2559_v55 = vunpack.c.h.bf16 %v2439_v36 }
 0x326   : > { %v3198_v41 = vunpack.c.l.bf16 %v3118_v34  ;;  %v3199_v42 = vunpack.c.h.bf16 %v3118_v34  ;;  %v2195_v16 = vpop.f32.mrf.mxu2 }
 0x327   : > { %v3119_v45 = vpack.c.bf16 %v3009_v38, %v3008_v37  ;;  %v2440_v47 = vpack.c.bf16 %v2195_v16, %v2146_v43  ;;  %v2694_v8 = vadd.f32 %v4813_v63, %v2558_v54  ;;  %v2695_v61 = vadd.f32 %v4815_v6, %v2559_v55 }
 0x328   : > { %v3297_v48 = vmax.f32 %v3296_v2, %v3198_v41  ;;  %v3318_v3 = vmax.f32 %v3317_v39, %v3199_v42 }
 0x329   : > { %v3200_v56 = vunpack.c.l.bf16 %v3119_v45  ;;  %v3201_v57 = vunpack.c.h.bf16 %v3119_v45  ;;  %v2560_v27 = vunpack.c.l.bf16 %v2440_v47  ;;  %v2561_v58 = vunpack.c.h.bf16 %v2440_v47 }
 0x32a   : > { %v3014_v4 = vmax.f32 %v2694_v8, 0.0  ;;  %v3015_v5 = vmax.f32 %v2695_v61, 0.0 }
 0x32b   : > { %v3339_v26 = vmax.f32 %v3338_v44, %v3200_v56  ;;  %v3360_v7 = vmax.f32 %v3359_v50, %v3201_v57  ;;  %v2696_v25 = vadd.f32 %v4831_v59, %v2560_v27  ;;  %v2697_v62 = vadd.f32 %v4833_v60, %v2561_v58 }
 0x32c   : > { %v3122_v49 = vpack.c.bf16 %v3015_v5, %v3014_v4 }
 0x32d   : > { %v3016_v1 = vmax.f32 %v2696_v25, 0.0  ;;  %v3017_v9 = vmax.f32 %v2697_v62, 0.0  ;;  %v2100_v51 = vpop.f32.mrf.mxu0 }
 0x32e   : > { %v2149_v11 = vpop.f32.mrf.mxu1  ;;  %v3206_v21 = vunpack.c.l.bf16 %v3122_v49  ;;  %v3207_v22 = vunpack.c.h.bf16 %v3122_v49 }
 0x32f   : > { %v3123_v14 = vpack.c.bf16 %v3017_v9, %v3016_v1 }
 0x330   : > { %v3298_v38 = vmax.f32 %v3297_v48, %v3206_v21  ;;  %v3319_v2 = vmax.f32 %v3318_v3, %v3207_v22 }
 0x331   : > { %2241 = vmatmul.bf16.gmra.mxu3 %v4772_v53  ;;  %2290 = vmatmul.bf16.gmra.mxu0 %v4772_v53  ;;  %v3208_v28 = vunpack.c.l.bf16 %v3123_v14  ;;  %v3209_v29 = vunpack.c.h.bf16 %v3123_v14 }
 0x332   : > { %2339 = vmatmul.bf16.gmra.mxu1 %v4772_v53  ;;  %2388 = vmatmul.bf16.gmra.mxu2 %v4772_v53 }
 0x333   : > { %v2051_v52 = vpop.f32.mrf.mxu3  ;;  %v3340_v16 = vmax.f32 %v3339_v26, %v3208_v28  ;;  %v3361_v44 = vmax.f32 %v3360_v7, %v3209_v29 }
 0x334   : > { %v2443_v12 = vpack.c.bf16 %v2100_v51, %v2051_v52  ;;  %v2198_v13 = vpop.f32.mrf.mxu2 }
 0x335   : > { %v2444_v15 = vpack.c.bf16 %v2198_v13, %v2149_v11  ;;  %v2102_v36 = vpop.f32.mrf.mxu0 }
 0x336   : > { %v2566_v17 = vunpack.c.l.bf16 %v2443_v12  ;;  %v2567_v18 = vunpack.c.h.bf16 %v2443_v12  ;;  %v2151_v41 = vpop.f32.mrf.mxu1 }
 0x337   : > { %v2568_v19 = vunpack.c.l.bf16 %v2444_v15  ;;  %v2569_v20 = vunpack.c.h.bf16 %v2444_v15 }
 0x338   : > { %v2702_v0 = vadd.f32 %v4813_v63, %v2566_v17  ;;  %v2703_v24 = vadd.f32 %v4815_v6, %v2567_v18 }
 0x339   : > { %v2704_v53 = vadd.f32 %v4831_v59, %v2568_v19  ;;  %v2705_v30 = vadd.f32 %v4833_v60, %v2569_v20 }
 0x33a   : > { %v3022_v31 = vmax.f32 %v2702_v0, 0.0  ;;  %v3023_v32 = vmax.f32 %v2703_v24, 0.0 }
 0x33b   : > { %v3024_v33 = vmax.f32 %v2704_v53, 0.0  ;;  %v3025_v34 = vmax.f32 %v2705_v30, 0.0  ;;  %v2053_v37 = vpop.f32.mrf.mxu3 }
 0x33c   : > { %v3126_v39 = vpack.c.bf16 %v3023_v32, %v3022_v31  ;;  %v2447_v42 = vpack.c.bf16 %v2102_v36, %v2053_v37  ;;  %v2200_v43 = vpop.f32.mrf.mxu2 }
 0x33d   : > { %v3127_v50 = vpack.c.bf16 %v3025_v34, %v3024_v33  ;;  %v2448_v45 = vpack.c.bf16 %v2200_v43, %v2151_v41 }
 0x33e   : > { %v3214_v47 = vunpack.c.l.bf16 %v3126_v39  ;;  %v3215_v54 = vunpack.c.h.bf16 %v3126_v39  ;;  %v2574_v55 = vunpack.c.l.bf16 %v2447_v42  ;;  %v2575_v56 = vunpack.c.h.bf16 %v2447_v42 }
 0x33f   : > { %v3216_v57 = vunpack.c.l.bf16 %v3127_v50  ;;  %v3217_v27 = vunpack.c.h.bf16 %v3127_v50  ;;  %v2576_v58 = vunpack.c.l.bf16 %v2448_v45  ;;  %v2577_v8 = vunpack.c.h.bf16 %v2448_v45  ;;  %v2105_v11 = vpop.f32.mrf.mxu0 }
 0x340   : > { %v3299_v61 = vmax.f32 %v3298_v38, %v3214_v47  ;;  %v3320_v25 = vmax.f32 %v3319_v2, %v3215_v54  ;;  %v2710_v48 = vadd.f32 %v4813_v63, %v2574_v55  ;;  %v2711_v3 = vadd.f32 %v4815_v6, %v2575_v56  ;;  %v2154_v52 = vpop.f32.mrf.mxu1 }
 0x341   : > { %v3341_v62 = vmax.f32 %v3340_v16, %v3216_v57  ;;  %v3362_v4 = vmax.f32 %v3361_v44, %v3217_v27  ;;  %v2712_v26 = vadd.f32 %v4831_v59, %v2576_v58  ;;  %v2713_v7 = vadd.f32 %v4833_v60, %v2577_v8  ;;  %2246 = vmatmul.bf16.gmra.mxu3 %v4780_v23 }
 0x342   : > { %v3030_v5 = vmax.f32 %v2710_v48, 0.0  ;;  %v3031_v1 = vmax.f32 %v2711_v3, 0.0  ;;  %2295 = vmatmul.bf16.gmra.mxu0 %v4780_v23  ;;  %2344 = vmatmul.bf16.gmra.mxu1 %v4780_v23 }
 0x343   : > { %v3032_v9 = vmax.f32 %v2712_v26, 0.0  ;;  %v3033_v51 = vmax.f32 %v2713_v7, 0.0  ;;  %2393 = vmatmul.bf16.gmra.mxu2 %v4780_v23 }
 0x344   : > { %v3130_v12 = vpack.c.bf16 %v3031_v1, %v3030_v5 }
 0x345   : > { %v2056_v49 = vpop.f32.mrf.mxu3  ;;  %v3131_v15 = vpack.c.bf16 %v3033_v51, %v3032_v9 }
 0x346   : > { %v2451_v13 = vpack.c.bf16 %v2105_v11, %v2056_v49  ;;  %v2203_v14 = vpop.f32.mrf.mxu2  ;;  %v3222_v22 = vunpack.c.l.bf16 %v3130_v12  ;;  %v3223_v0 = vunpack.c.h.bf16 %v3130_v12 }
 0x347   : > { %v2452_v17 = vpack.c.bf16 %v2203_v14, %v2154_v52  ;;  %v3224_v29 = vunpack.c.l.bf16 %v3131_v15  ;;  %v3225_v53 = vunpack.c.h.bf16 %v3131_v15  ;;  %v2107_v36 = vpop.f32.mrf.mxu0 }
 0x348   : > { %v2582_v18 = vunpack.c.l.bf16 %v2451_v13  ;;  %v2583_v19 = vunpack.c.h.bf16 %v2451_v13  ;;  %v3300_v38 = vmax.f32 %v3299_v61, %v3222_v22  ;;  %v3321_v2 = vmax.f32 %v3320_v25, %v3223_v0  ;;  %v2156_v41 = vpop.f32.mrf.mxu1 }
 0x349   : > { %v2584_v20 = vunpack.c.l.bf16 %v2452_v17  ;;  %v2585_v21 = vunpack.c.h.bf16 %v2452_v17  ;;  %v3342_v16 = vmax.f32 %v3341_v62, %v3224_v29  ;;  %v3363_v44 = vmax.f32 %v3362_v4, %v3225_v53 }
 0x34a   : > { %v2718_v24 = vadd.f32 %v4813_v63, %v2582_v18  ;;  %v2719_v28 = vadd.f32 %v4815_v6, %v2583_v19 }
 0x34b   : > { %v2720_v23 = vadd.f32 %v4831_v59, %v2584_v20  ;;  %v2721_v30 = vadd.f32 %v4833_v60, %v2585_v21 }
 0x34c   : > { %v3038_v31 = vmax.f32 %v2718_v24, 0.0  ;;  %v3039_v32 = vmax.f32 %v2719_v28, 0.0 }
 0x34d   : > { %v3040_v33 = vmax.f32 %v2720_v23, 0.0  ;;  %v3041_v34 = vmax.f32 %v2721_v30, 0.0  ;;  %v2058_v37 = vpop.f32.mrf.mxu3 }
 0x34e   : > { %v3134_v39 = vpack.c.bf16 %v3039_v32, %v3038_v31  ;;  %v2455_v42 = vpack.c.bf16 %v2107_v36, %v2058_v37  ;;  %v2205_v43 = vpop.f32.mrf.mxu2 }
 0x34f   : > { %v3135_v50 = vpack.c.bf16 %v3041_v34, %v3040_v33  ;;  %v2456_v45 = vpack.c.bf16 %v2205_v43, %v2156_v41 }
 0x350   : > { %v3230_v47 = vunpack.c.l.bf16 %v3134_v39  ;;  %v3231_v54 = vunpack.c.h.bf16 %v3134_v39  ;;  %v2590_v55 = vunpack.c.l.bf16 %v2455_v42  ;;  %v2591_v56 = vunpack.c.h.bf16 %v2455_v42 }
 0x351   : > { %v3232_v57 = vunpack.c.l.bf16 %v3135_v50  ;;  %v3233_v27 = vunpack.c.h.bf16 %v3135_v50  ;;  %v2592_v58 = vunpack.c.l.bf16 %v2456_v45  ;;  %v2593_v8 = vunpack.c.h.bf16 %v2456_v45  ;;  %2251 = vmatmul.bf16.gmra.mxu3 %v4788_v46  ;;  %v2110_v11 = vpop.f32.mrf.mxu0 }
 0x352   : > { %v3301_v61 = vmax.f32 %v3300_v38, %v3230_v47  ;;  %v3322_v25 = vmax.f32 %v3321_v2, %v3231_v54  ;;  %v2726_v48 = vadd.f32 %v4813_v63, %v2590_v55  ;;  %v2727_v3 = vadd.f32 %v4815_v6, %v2591_v56  ;;  %2300 = vmatmul.bf16.gmra.mxu0 %v4788_v46  ;;  %v2159_v49 = vpop.f32.mrf.mxu1 }
 0x353   : > { %v3343_v62 = vmax.f32 %v3342_v16, %v3232_v57  ;;  %v3364_v4 = vmax.f32 %v3363_v44, %v3233_v27  ;;  %v2728_v26 = vadd.f32 %v4831_v59, %v2592_v58  ;;  %v2729_v7 = vadd.f32 %v4833_v60, %v2593_v8  ;;  %2349 = vmatmul.bf16.gmra.mxu1 %v4788_v46 }
 0x354   : > { %v3046_v5 = vmax.f32 %v2726_v48, 0.0  ;;  %v3047_v1 = vmax.f32 %v2727_v3, 0.0  ;;  %2398 = vmatmul.bf16.gmra.mxu2 %v4788_v46 }
 0x355   : > { %v3048_v9 = vmax.f32 %v2728_v26, 0.0  ;;  %v3049_v51 = vmax.f32 %v2729_v7, 0.0 }
 0x356   : > { %v3138_v52 = vpack.c.bf16 %v3047_v1, %v3046_v5 }
 0x357   : > { %v3139_v12 = vpack.c.bf16 %v3049_v51, %v3048_v9  ;;  %v2061_v13 = vpop.f32.mrf.mxu3 }
 0x358   : > { %v3238_v14 = vunpack.c.l.bf16 %v3138_v52  ;;  %v3239_v15 = vunpack.c.h.bf16 %v3138_v52  ;;  %v2459_v17 = vpack.c.bf16 %v2110_v11, %v2061_v13  ;;  %v2208_v18 = vpop.f32.mrf.mxu2 }
 0x359   : > { %v3240_v19 = vunpack.c.l.bf16 %v3139_v12  ;;  %v3241_v20 = vunpack.c.h.bf16 %v3139_v12  ;;  %v2460_v21 = vpack.c.bf16 %v2208_v18, %v2159_v49  ;;  %v2112_v2 = vpop.f32.mrf.mxu0 }
 0x35a   : > { %v3302_v22 = vmax.f32 %v3301_v61, %v3238_v14  ;;  %v3323_v0 = vmax.f32 %v3322_v25, %v3239_v15  ;;  %v2598_v24 = vunpack.c.l.bf16 %v2459_v17  ;;  %v2599_v28 = vunpack.c.h.bf16 %v2459_v17  ;;  %v2161_v42 = vpop.f32.mrf.mxu1 }
 0x35b   : > { %v3344_v29 = vmax.f32 %v3343_v62, %v3240_v19  ;;  %v3365_v46 = vmax.f32 %v3364_v4, %v3241_v20  ;;  %v2600_v53 = vunpack.c.l.bf16 %v2460_v21  ;;  %v2601_v23 = vunpack.c.h.bf16 %v2460_v21 }
 0x35c   : > { %v2734_v30 = vadd.f32 %v4813_v63, %v2598_v24  ;;  %v2735_v31 = vadd.f32 %v4815_v6, %v2599_v28 }
 0x35d   : > { %v2736_v32 = vadd.f32 %v4831_v59, %v2600_v53  ;;  %v2737_v33 = vadd.f32 %v4833_v60, %v2601_v23 }
 0x35e   : > { %v3054_v34 = vmax.f32 %v2734_v30, 0.0  ;;  %v3055_v36 = vmax.f32 %v2735_v31, 0.0 }
 0x35f   : > { %v3056_v37 = vmax.f32 %v2736_v32, 0.0  ;;  %v3057_v38 = vmax.f32 %v2737_v33, 0.0  ;;  %v2063_v39 = vpop.f32.mrf.mxu3 }
 0x360   : > { %v3142_v41 = vpack.c.bf16 %v3055_v36, %v3054_v34  ;;  %v2463_v43 = vpack.c.bf16 %v2112_v2, %v2063_v39  ;;  %v2210_v16 = vpop.f32.mrf.mxu2 }
 0x361   : > { %v3143_v44 = vpack.c.bf16 %v3057_v38, %v3056_v37  ;;  %v2464_v50 = vpack.c.bf16 %v2210_v16, %v2161_v42  ;;  %2256 = vmatmul.bf16.gmra.mxu3 %v4799_v10 }
 0x362   : > { %v3246_v45 = vunpack.c.l.bf16 %v3142_v41  ;;  %v3247_v47 = vunpack.c.h.bf16 %v3142_v41  ;;  %v2606_v54 = vunpack.c.l.bf16 %v2463_v43  ;;  %v2607_v55 = vunpack.c.h.bf16 %v2463_v43  ;;  %2305 = vmatmul.bf16.gmra.mxu0 %v4799_v10 }
 0x363   : > { %v3248_v56 = vunpack.c.l.bf16 %v3143_v44  ;;  %v3249_v57 = vunpack.c.h.bf16 %v3143_v44  ;;  %v2608_v27 = vunpack.c.l.bf16 %v2464_v50  ;;  %v2609_v58 = vunpack.c.h.bf16 %v2464_v50  ;;  %2354 = vmatmul.bf16.gmra.mxu1 %v4799_v10 }
 0x364   : > { %v3303_v8 = vmax.f32 %v3302_v22, %v3246_v45  ;;  %v3324_v61 = vmax.f32 %v3323_v0, %v3247_v47  ;;  %v2742_v25 = vadd.f32 %v4813_v63, %v2606_v54  ;;  %v2743_v48 = vadd.f32 %v4815_v6, %v2607_v55  ;;  %2403 = vmatmul.bf16.gmra.mxu2 %v4799_v10 }
 0x365   : > { %v3345_v3 = vmax.f32 %v3344_v29, %v3248_v56  ;;  %v3366_v62 = vmax.f32 %v3365_v46, %v3249_v57  ;;  %v2744_v4 = vadd.f32 %v4831_v59, %v2608_v27  ;;  %v2745_v26 = vadd.f32 %v4833_v60, %v2609_v58  ;;  %v2115_v52 = vpop.f32.mrf.mxu0 }
 0x366   : > { %v3062_v7 = vmax.f32 %v2742_v25, 0.0  ;;  %v3063_v5 = vmax.f32 %v2743_v48, 0.0  ;;  %v2164_v13 = vpop.f32.mrf.mxu1 }
 0x367   : > { %v3064_v1 = vmax.f32 %v2744_v4, 0.0  ;;  %v3065_v9 = vmax.f32 %v2745_v26, 0.0 }
 0x368   : > { %v3146_v51 = vpack.c.bf16 %v3063_v5, %v3062_v7 }
 0x369   : > { %v3147_v11 = vpack.c.bf16 %v3065_v9, %v3064_v1 }
 0x36a   : > { %v3254_v49 = vunpack.c.l.bf16 %v3146_v51  ;;  %v3255_v12 = vunpack.c.h.bf16 %v3146_v51 }
 0x36b   : > { %v3256_v14 = vunpack.c.l.bf16 %v3147_v11  ;;  %v3257_v15 = vunpack.c.h.bf16 %v3147_v11  ;;  %v2066_v17 = vpop.f32.mrf.mxu3 }
 0x36c   : > { %v3304_v10 = vmax.f32 %v3303_v8, %v3254_v49  ;;  %v3325_v18 = vmax.f32 %v3324_v61, %v3255_v12  ;;  %v2467_v19 = vpack.c.bf16 %v2115_v52, %v2066_v17  ;;  %v2213_v20 = vpop.f32.mrf.mxu2 }
 0x36d   : > { %v3346_v21 = vmax.f32 %v3345_v3, %v3256_v14  ;;  %v3367_v22 = vmax.f32 %v3366_v62, %v3257_v15  ;;  %v2468_v0 = vpack.c.bf16 %v2213_v20, %v2164_v13  ;;  %v2117_v37 = vpop.f32.mrf.mxu0 }
 0x36e   : > { %v2614_v24 = vunpack.c.l.bf16 %v2467_v19  ;;  %v2615_v28 = vunpack.c.h.bf16 %v2467_v19  ;;  %v2166_v39 = vpop.f32.mrf.mxu1 }
 0x36f   : > { %v2616_v29 = vunpack.c.l.bf16 %v2468_v0  ;;  %v2617_v46 = vunpack.c.h.bf16 %v2468_v0  ;;  %v2491_v0 = vld [vmem:[#allocation1 + $0x2d] sm:$0xff] }
 0x370   : > { %v2750_v53 = vadd.f32 %v4813_v63, %v2614_v24  ;;  %v2751_v23 = vadd.f32 %v4815_v6, %v2615_v28 }
 0x371   : > { %v2752_v30 = vadd.f32 %v4831_v59, %v2616_v29  ;;  %v2753_v31 = vadd.f32 %v4833_v60, %v2617_v46  ;;  %2261 = vmatmul.bf16.gmra.mxu3 %v4807_v35  ;;  %v2492_v46 = vld [vmem:[#allocation1 + $0x36] sm:$0xff] }
 0x372   : > { %v3070_v32 = vmax.f32 %v2750_v53, 0.0  ;;  %v3071_v33 = vmax.f32 %v2751_v23, 0.0  ;;  %2310 = vmatmul.bf16.gmra.mxu0 %v4807_v35  ;;  %v2493_v53 = vld [vmem:[#allocation1 + $0x3f] sm:$0xff] }
 0x373   : > { %v3072_v34 = vmax.f32 %v2752_v30, 0.0  ;;  %v3073_v36 = vmax.f32 %v2753_v31, 0.0  ;;  %2359 = vmatmul.bf16.gmra.mxu1 %v4807_v35  ;;  %v2068_v38 = vpop.f32.mrf.mxu3 }
 0x374   : > { %v3150_v2 = vpack.c.bf16 %v3071_v33, %v3070_v32  ;;  %2408 = vmatmul.bf16.gmra.mxu2 %v4807_v35  ;;  %v2471_v41 = vpack.c.bf16 %v2117_v37, %v2068_v38  ;;  %v2215_v42 = vpop.f32.mrf.mxu2  ;;  %v2512_v37 = vpack.i.b16 %v2492_v46, %v2492_v46  ;;  %v2515_v38 = vpack.i.b16 %v2493_v53, %v2493_v53 }
 0x375   : > { %v3151_v43 = vpack.c.bf16 %v3073_v36, %v3072_v34  ;;  %v2472_v16 = vpack.c.bf16 %v2215_v42, %v2166_v39 }
 0x376   : > { %v3262_v44 = vunpack.c.l.bf16 %v3150_v2  ;;  %v3263_v50 = vunpack.c.h.bf16 %v3150_v2  ;;  %v2622_v45 = vunpack.c.l.bf16 %v2471_v41  ;;  %v2623_v47 = vunpack.c.h.bf16 %v2471_v41 }
 0x377   : > { %v3264_v54 = vunpack.c.l.bf16 %v3151_v43  ;;  %v3265_v55 = vunpack.c.h.bf16 %v3151_v43  ;;  %v2624_v56 = vunpack.c.l.bf16 %v2472_v16  ;;  %v2625_v57 = vunpack.c.h.bf16 %v2472_v16 }
 0x378   : > { %v3305_v27 = vmax.f32 %v3304_v10, %v3262_v44  ;;  %v3326_v58 = vmax.f32 %v3325_v18, %v3263_v50  ;;  %v2758_v8 = vadd.f32 %v4813_v63, %v2622_v45  ;;  %v2759_v61 = vadd.f32 %v4815_v6, %v2623_v47 }
 0x379   : > { %v3347_v25 = vmax.f32 %v3346_v21, %v3264_v54  ;;  %v3368_v35 = vmax.f32 %v3367_v22, %v3265_v55  ;;  %v2760_v48 = vadd.f32 %v4831_v59, %v2624_v56  ;;  %v2761_v3 = vadd.f32 %v4833_v60, %v2625_v57  ;;  %v2490_v22 = vld [vmem:[#allocation1 + $0x24] sm:$0xff] }
 0x37a   : > { %v3078_v62 = vmax.f32 %v2758_v8, 0.0  ;;  %v3079_v4 = vmax.f32 %v2759_v61, 0.0  ;;  %v2506_v33 = vpack.i.b16 %v2490_v22, %v2490_v22  ;;  %v2514_v57 = vperm.slane %v2512_v37, 0 }
 0x37b   : > { %v3080_v26 = vmax.f32 %v2760_v48, 0.0  ;;  %v3081_v7 = vmax.f32 %v2761_v3, 0.0 }
 0x37c   : > { %v3154_v5 = vpack.c.bf16 %v3079_v4, %v3078_v62  ;;  %v2508_v45 = vperm.slane %v2506_v33, 0 }
 0x37d   : > { %v3155_v1 = vpack.c.bf16 %v3081_v7, %v3080_v26 }
 0x37e   : > { %v3270_v9 = vunpack.c.l.bf16 %v3154_v5  ;;  %v3271_v51 = vunpack.c.h.bf16 %v3154_v5  ;;  %v2120_v11 = vpop.f32.mrf.mxu0  ;;  %v4931_v22 = vunpack.c.l.bf16 %v2508_v45 }
 0x37f   : > { %v3272_v52 = vunpack.c.l.bf16 %v3155_v1  ;;  %v3273_v49 = vunpack.c.h.bf16 %v3155_v1  ;;  %v2169_v12 = vpop.f32.mrf.mxu1 }
 0x380   : > { %v3306_v13 = vmax.f32 %v3305_v27, %v3270_v9  ;;  %v3327_v14 = vmax.f32 %v3326_v58, %v3271_v51  ;;  %v2517_v27 = vperm.slane %v2515_v38, 0 }
 0x381   : > { %v3348_v15 = vmax.f32 %v3347_v25, %v3272_v52  ;;  %v3369_v17 = vmax.f32 %v3368_v35, %v3273_v49  ;;  %2266 = vmatmul.bf16.gmra.mxu3 %v4823_v40 }
 0x382   : > { %2315 = vmatmul.bf16.gmra.mxu0 %v4823_v40 }
 0x383   : > { %2364 = vmatmul.bf16.gmra.mxu1 %v4823_v40 }
 0x384   : > { %2413 = vmatmul.bf16.gmra.mxu2 %v4823_v40  ;;  %v2071_v10 = vpop.f32.mrf.mxu3  ;;  %v2509_v40 = vpack.i.b16 %v2491_v0, %v2491_v0 }
 0x385   : > { %v2475_v18 = vpack.c.bf16 %v2120_v11, %v2071_v10  ;;  %v2218_v19 = vpop.f32.mrf.mxu2 }
 0x386   : > { %v2476_v20 = vpack.c.bf16 %v2218_v19, %v2169_v12  ;;  %v2122_v21 = vpop.f32.mrf.mxu0  ;;  %v2511_v47 = vperm.slane %v2509_v40, 0 }
 0x387   : > { %v2630_v24 = vunpack.c.l.bf16 %v2475_v18  ;;  %v2631_v28 = vunpack.c.h.bf16 %v2475_v18  ;;  %v2171_v29 = vpop.f32.mrf.mxu1 }
 0x388   : > { %v2632_v23 = vunpack.c.l.bf16 %v2476_v20  ;;  %v2633_v30 = vunpack.c.h.bf16 %v2476_v20 }
 0x389   : > { %v2766_v31 = vadd.f32 %v4813_v63, %v2630_v24  ;;  %v2767_v32 = vadd.f32 %v4815_v6, %v2631_v28 }
 0x38a   : > { %v2768_v34 = vadd.f32 %v4831_v59, %v2632_v23  ;;  %v2769_v36 = vadd.f32 %v4833_v60, %v2633_v30 }
 0x38b   : > { %v3086_v2 = vmax.f32 %v2766_v31, 0.0  ;;  %v3087_v39 = vmax.f32 %v2767_v32, 0.0 }
 0x38c   : > { %v3088_v41 = vmax.f32 %v2768_v34, 0.0  ;;  %v3089_v42 = vmax.f32 %v2769_v36, 0.0  ;;  %v2073_v43 = vpop.f32.mrf.mxu3 }
 0x38d   : > { %v3158_v16 = vpack.c.bf16 %v3087_v39, %v3086_v2  ;;  %v2479_v44 = vpack.c.bf16 %v2122_v21, %v2073_v43  ;;  %v2220_v50 = vpop.f32.mrf.mxu2 }
 0x38e   : > { %v3159_v54 = vpack.c.bf16 %v3089_v42, %v3088_v41  ;;  %v2480_v55 = vpack.c.bf16 %v2220_v50, %v2171_v29  ;;  %v2281_v56 = vpop.f32.mrf.mxu0 }
 0x38f   : > { %v3278_v58 = vunpack.c.l.bf16 %v3158_v16  ;;  %v3279_v8 = vunpack.c.h.bf16 %v3158_v16  ;;  %v2638_v61 = vunpack.c.l.bf16 %v2479_v44  ;;  %v2639_v25 = vunpack.c.h.bf16 %v2479_v44  ;;  %v2330_v35 = vpop.f32.mrf.mxu1 }
 0x390   : > { %v3280_v48 = vunpack.c.l.bf16 %v3159_v54  ;;  %v3281_v3 = vunpack.c.h.bf16 %v3159_v54  ;;  %v2640_v62 = vunpack.c.l.bf16 %v2480_v55  ;;  %v2641_v4 = vunpack.c.h.bf16 %v2480_v55 }
 0x391   : > { %v3307_v26 = vmax.f32 %v3306_v13, %v3278_v58  ;;  %v3328_v7 = vmax.f32 %v3327_v14, %v3279_v8  ;;  %v2774_v5 = vadd.f32 %v4813_v63, %v2638_v61  ;;  %v2775_v1 = vadd.f32 %v4815_v6, %v2639_v25 }
 0x392   : > { %v3349_v9 = vmax.f32 %v3348_v15, %v3280_v48  ;;  %v3370_v51 = vmax.f32 %v3369_v17, %v3281_v3  ;;  %v2776_v11 = vadd.f32 %v4831_v59, %v2640_v62  ;;  %v2777_v52 = vadd.f32 %v4833_v60, %v2641_v4 }
 0x393   : > { %v3094_v49 = vmax.f32 %v2774_v5, 0.0  ;;  %v3095_v12 = vmax.f32 %v2775_v1, 0.0  ;;  %v4933_v13 = vunpack.c.l.bf16 %v2511_v47  ;;  %v4935_v15 = vunpack.c.l.bf16 %v2514_v57 }
 0x394   : > { %v3096_v10 = vmax.f32 %v2776_v11, 0.0  ;;  %v3097_v18 = vmax.f32 %v2777_v52, 0.0  ;;  %v2232_v19 = vpop.f32.mrf.mxu3  ;;  %v4937_v17 = vunpack.c.l.bf16 %v2517_v27 }
 0x395   : > { %v3162_v20 = vpack.c.bf16 %v3095_v12, %v3094_v49  ;;  %v2421_v21 = vpack.c.bf16 %v2281_v56, %v2232_v19  ;;  %v2379_v63 = vpop.f32.mrf.mxu2 }
 0x396   : > { %v3163_v14 = vpack.c.bf16 %v3097_v18, %v3096_v10  ;;  %v2422_v6 = vpack.c.bf16 %v2379_v63, %v2330_v35  ;;  %v2283_v59 = vpop.f32.mrf.mxu0 }
 0x397   : > { %v3286_v60 = vunpack.c.l.bf16 %v3162_v20  ;;  %v3287_v0 = vunpack.c.h.bf16 %v3162_v20  ;;  %v2522_v24 = vunpack.c.l.bf16 %v2421_v21  ;;  %v2523_v28 = vunpack.c.h.bf16 %v2421_v21  ;;  %v2332_v29 = vpop.f32.mrf.mxu1 }
 0x398   : > { %v3288_v46 = vunpack.c.l.bf16 %v3163_v14  ;;  %v3289_v53 = vunpack.c.h.bf16 %v3163_v14  ;;  %v2524_v23 = vunpack.c.l.bf16 %v2422_v6  ;;  %v2525_v30 = vunpack.c.h.bf16 %v2422_v6 }
 0x399   : > { %v3308_v31 = vmax.f32 %v3307_v26, %v3286_v60  ;;  %v3329_v32 = vmax.f32 %v3328_v7, %v3287_v0  ;;  %v2658_v33 = vadd.f32 %v4931_v22, %v2522_v24  ;;  %v2659_v40 = vadd.f32 %v4933_v13, %v2523_v28 }
 0x39a   : > { %v3350_v34 = vmax.f32 %v3349_v9, %v3288_v46  ;;  %v3371_v36 = vmax.f32 %v3370_v51, %v3289_v53  ;;  %v2660_v37 = vadd.f32 %v4935_v15, %v2524_v23  ;;  %v2661_v38 = vadd.f32 %v4937_v17, %v2525_v30 }
 0x39b   : > { %v3309_v2 = vrot.slane %v3308_v31, 4  ;;  %v3330_v39 = vrot.slane %v3329_v32, 4  ;;  %v2978_v41 = vmax.f32 %v2658_v33, 0.0  ;;  %v2979_v42 = vmax.f32 %v2659_v40, 0.0 }
 0x39c   : > { %v3351_v43 = vrot.slane %v3350_v34, 4  ;;  %v3372_v16 = vrot.slane %v3371_v36, 4  ;;  %v2980_v44 = vmax.f32 %v2660_v37, 0.0  ;;  %v2981_v50 = vmax.f32 %v2661_v38, 0.0  ;;  %v2234_v45 = vpop.f32.mrf.mxu3 }
 0x39d   : > { %v3310_v47 = vmax.f32 %v3308_v31, %v3309_v2  ;;  %v3331_v54 = vmax.f32 %v3329_v32, %v3330_v39  ;;  %v4943_v55 = vpack.c.bf16 %v2979_v42, %v2978_v41  ;;  %v2425_v56 = vpack.c.bf16 %v2283_v59, %v2234_v45  ;;  %v2381_v57 = vpop.f32.mrf.mxu2 }
 0x39e   : > { %v3352_v27 = vmax.f32 %v3350_v34, %v3351_v43  ;;  %v3373_v58 = vmax.f32 %v3371_v36, %v3372_v16  ;;  %v2426_v8 = vpack.c.bf16 %v2381_v57, %v2332_v29  ;;  %v2286_v61 = vpop.f32.mrf.mxu0  ;;  %v3105_v48 = vpack.c.bf16 %v2981_v50, %v2980_v44 }
 0x39f   : > { %v3311_v25 = vrot.slane %v3310_v47, 2  ;;  %v3332_v35 = vrot.slane %v3331_v54, 2  ;;  %v2335_v3 = vpop.f32.mrf.mxu1  ;;  %v3170_v26 = vunpack.c.l.bf16 %v4943_v55  ;;  %v3171_v7 = vunpack.c.h.bf16 %v4943_v55 }
 0x3a0   : > { %v3353_v62 = vrot.slane %v3352_v27, 2  ;;  %v3374_v4 = vrot.slane %v3373_v58, 2  ;;  %v2530_v9 = vunpack.c.l.bf16 %v2425_v56  ;;  %v2531_v51 = vunpack.c.h.bf16 %v2425_v56 }
 0x3a1   : > { %v3312_v5 = vmax.f32 %v3310_v47, %v3311_v25  ;;  %v3333_v1 = vmax.f32 %v3331_v54, %v3332_v35  ;;  %v2532_v49 = vunpack.c.l.bf16 %v2426_v8  ;;  %v2533_v12 = vunpack.c.h.bf16 %v2426_v8 }
 0x3a2   : > { %v3354_v11 = vmax.f32 %v3352_v27, %v3353_v62  ;;  %v3375_v52 = vmax.f32 %v3373_v58, %v3374_v4  ;;  %v2666_v19 = vadd.f32 %v4931_v22, %v2530_v9  ;;  %v2667_v20 = vadd.f32 %v4933_v13, %v2531_v51 }
 0x3a3   : > { %v3313_v10 = vrot.slane %v3312_v5, 1  ;;  %v3334_v18 = vrot.slane %v3333_v1, 1  ;;  %v2668_v14 = vadd.f32 %v4935_v15, %v2532_v49  ;;  %v2669_v6 = vadd.f32 %v4937_v17, %v2533_v12 }
 0x3a4   : > { %v3355_v21 = vrot.slane %v3354_v11, 1  ;;  %v3376_v63 = vrot.slane %v3375_v52, 1  ;;  %v2237_v59 = vpop.f32.mrf.mxu3  ;;  %v2986_v24 = vmax.f32 %v2666_v19, 0.0  ;;  %v2987_v28 = vmax.f32 %v2667_v20, 0.0 }
 0x3a5   : > { %v3314_v60 = vmax.f32 %v3312_v5, %v3313_v10  ;;  %v3335_v0 = vmax.f32 %v3333_v1, %v3334_v18  ;;  %v2384_v29 = vpop.f32.mrf.mxu2  ;;  %v2988_v23 = vmax.f32 %v2668_v14, 0.0  ;;  %v2989_v30 = vmax.f32 %v2669_v6, 0.0 }
 0x3a6   : > { %v3356_v46 = vmax.f32 %v3354_v11, %v3355_v21  ;;  %v3377_v53 = vmax.f32 %v3375_v52, %v3376_v63  ;;  %v2288_v31 = vpop.f32.mrf.mxu0  ;;  %v3108_v33 = vpack.c.bf16 %v2987_v28, %v2986_v24  ;;  %v2429_v40 = vpack.c.bf16 %v2286_v61, %v2237_v59 }
 0x3a7   : > { %v3462_v32 = vpack.c.bf16 %v3335_v0, %v3314_v60  ;;  %v2430_v34 = vpack.c.bf16 %v2384_v29, %v2335_v3  ;;  %v2337_v36 = vpop.f32.mrf.mxu1  ;;  %v3172_v38 = vunpack.c.l.bf16 %v3105_v48  ;;  %v3173_v2 = vunpack.c.h.bf16 %v3105_v48 }
 0x3a8   : > { %v3463_v37 = vpack.c.bf16 %v3377_v53, %v3356_v46  ;;  %v3109_v39 = vpack.c.bf16 %v2989_v30, %v2988_v23  ;;  %v3178_v43 = vunpack.c.l.bf16 %v3108_v33  ;;  %v3179_v16 = vunpack.c.h.bf16 %v3108_v33 }
 0x3a9   : > { %v3466_v41 = vunpack.c.l.bf16 %v3462_v32  ;;  %v3467_v42 = vunpack.c.h.bf16 %v3462_v32  ;;  %v2538_v57 = vunpack.c.l.bf16 %v2429_v40  ;;  %v2539_v35 = vunpack.c.h.bf16 %v2429_v40 }
 0x3aa   : > { %v3468_v44 = vunpack.c.l.bf16 %v3463_v37  ;;  %v3469_v50 = vunpack.c.h.bf16 %v3463_v37  ;;  %v3180_v45 = vunpack.c.l.bf16 %v3109_v39  ;;  %v3181_v47 = vunpack.c.h.bf16 %v3109_v39 }
 0x3ab   : > { %v3488_v54 = vrot.slane %v3467_v42, 7  ;;  %v3378_v55 = vmax.f32 %v3170_v26, %v3178_v43  ;;  %v3399_v56 = vmax.f32 %v3171_v7, %v3179_v16  ;;  %v2674_v48 = vadd.f32 %v4931_v22, %v2538_v57 }
 0x3ac   : > { %v3489_v27 = vrot.slane %v3468_v44, 6  ;;  %v3490_v58 = vrot.slane %v3469_v50, 5  ;;  %v3420_v8 = vmax.f32 %v3172_v38, %v3180_v45  ;;  %v3441_v61 = vmax.f32 %v3173_v2, %v3181_v47  ;;  %v2239_v25 = vpop.f32.mrf.mxu3 }
 0x3ad   : > { %v2540_v3 = vunpack.c.l.bf16 %v2430_v34  ;;  %v2541_v62 = vunpack.c.h.bf16 %v2430_v34  ;;  %v2386_v4 = vpop.f32.mrf.mxu2  ;;  %v2433_v5 = vpack.c.bf16 %v2288_v31, %v2239_v25  ;;  %v3496_v51 = vsel %vm3495_vm1, %v3466_v41, %v3488_v54 }
 0x3ae   : > { %v2434_v1 = vpack.c.bf16 %v2386_v4, %v2337_v36  ;;  %v2291_v9 = vpop.f32.mrf.mxu0  ;;  %v3498_v26 = vsel %vm3497_vm2, %v3489_v27, %v3490_v58  ;;  %v2675_v7 = vadd.f32 %v4933_v13, %v2539_v35  ;;  %v2994_v11 = vmax.f32 %v2674_v48, 0.0 }
 0x3af   : > { %v2676_v52 = vadd.f32 %v4935_v15, %v2540_v3  ;;  %v2677_v49 = vadd.f32 %v4937_v17, %v2541_v62  ;;  %v2340_v12 = vpop.f32.mrf.mxu1  ;;  %v2546_v10 = vunpack.c.l.bf16 %v2433_v5  ;;  %v2547_v18 = vunpack.c.h.bf16 %v2433_v5 }
 0x3b0   : > { %v2548_v19 = vunpack.c.l.bf16 %v2434_v1  ;;  %v2549_v20 = vunpack.c.h.bf16 %v2434_v1  ;;  %v2995_v21 = vmax.f32 %v2675_v7, 0.0  ;;  %v4958_v6 = vsel %vm3499_vm3, %v3496_v51, %v3498_v26 }
 0x3b1   : > { %v2996_v63 = vmax.f32 %v2676_v52, 0.0  ;;  %v2997_v14 = vmax.f32 %v2677_v49, 0.0  ;;  %v2682_v59 = vadd.f32 %v4931_v22, %v2546_v10  ;;  %v2683_v60 = vadd.f32 %v4933_v13, %v2547_v18 }
 0x3b2   : > { %v2684_v0 = vadd.f32 %v4935_v15, %v2548_v19  ;;  %v2685_v24 = vadd.f32 %v4937_v17, %v2549_v20  ;;  %v3112_v28 = vpack.c.bf16 %v2995_v21, %v2994_v11 }
 0x3b3   : > { %v3113_v29 = vpack.c.bf16 %v2997_v14, %v2996_v63  ;;  %v3002_v46 = vmax.f32 %v2682_v59, 0.0  ;;  %v3003_v53 = vmax.f32 %v2683_v60, 0.0 }
 0x3b4   : > { %v3004_v23 = vmax.f32 %v2684_v0, 0.0  ;;  %v3005_v30 = vmax.f32 %v2685_v24, 0.0  ;;  %v2242_v31 = vpop.f32.mrf.mxu3  ;;  %v3186_v32 = vunpack.c.l.bf16 %v3112_v28  ;;  %v3187_v33 = vunpack.c.h.bf16 %v3112_v28 }
 0x3b5   : > { %v3188_v40 = vunpack.c.l.bf16 %v3113_v29  ;;  %v3189_v34 = vunpack.c.h.bf16 %v3113_v29  ;;  %v2389_v36 = vpop.f32.mrf.mxu2  ;;  %v3116_v37 = vpack.c.bf16 %v3003_v53, %v3002_v46  ;;  %v2437_v2 = vpack.c.bf16 %v2291_v9, %v2242_v31 }
 0x3b6   : > { %v3117_v38 = vpack.c.bf16 %v3005_v30, %v3004_v23  ;;  %v2438_v39 = vpack.c.bf16 %v2389_v36, %v2340_v12  ;;  %v2293_v41 = vpop.f32.mrf.mxu0  ;;  %v3379_v42 = vmax.f32 %v3378_v55, %v3186_v32  ;;  %v3400_v43 = vmax.f32 %v3399_v56, %v3187_v33 }
 0x3b7   : > { %v3421_v16 = vmax.f32 %v3420_v8, %v3188_v40  ;;  %v3442_v44 = vmax.f32 %v3441_v61, %v3189_v34  ;;  %v2342_v50 = vpop.f32.mrf.mxu1  ;;  %v3194_v45 = vunpack.c.l.bf16 %v3116_v37  ;;  %v3195_v47 = vunpack.c.h.bf16 %v3116_v37 }
 0x3b8   : > { %v3196_v54 = vunpack.c.l.bf16 %v3117_v38  ;;  %v3197_v57 = vunpack.c.h.bf16 %v3117_v38  ;;  %v2554_v27 = vunpack.c.l.bf16 %v2437_v2  ;;  %v2555_v58 = vunpack.c.h.bf16 %v2437_v2 }
 0x3b9   : > { %v2556_v25 = vunpack.c.l.bf16 %v2438_v39  ;;  %v2557_v35 = vunpack.c.h.bf16 %v2438_v39  ;;  %v3380_v48 = vmax.f32 %v3379_v42, %v3194_v45  ;;  %v3401_v3 = vmax.f32 %v3400_v43, %v3195_v47 }
 0x3ba   : > { %v3422_v62 = vmax.f32 %v3421_v16, %v3196_v54  ;;  %v3443_v4 = vmax.f32 %v3442_v44, %v3197_v57  ;;  %v2690_v5 = vadd.f32 %v4931_v22, %v2554_v27  ;;  %v2691_v55 = vadd.f32 %v4933_v13, %v2555_v58 }
 0x3bb   : > { %v2692_v56 = vadd.f32 %v4935_v15, %v2556_v25  ;;  %v2693_v8 = vadd.f32 %v4937_v17, %v2557_v35 }
 0x3bc   : > { %v2244_v61 = vpop.f32.mrf.mxu3  ;;  %v3010_v1 = vmax.f32 %v2690_v5, 0.0  ;;  %v3011_v9 = vmax.f32 %v2691_v55, 0.0 }
 0x3bd   : > { %v3012_v51 = vmax.f32 %v2692_v56, 0.0  ;;  %v3013_v26 = vmax.f32 %v2693_v8, 0.0  ;;  %v2391_v7 = vpop.f32.mrf.mxu2  ;;  %v2441_v29 = vpack.c.bf16 %v2293_v41, %v2244_v61 }
 0x3be   : > { %v3120_v11 = vpack.c.bf16 %v3011_v9, %v3010_v1  ;;  %v2442_v46 = vpack.c.bf16 %v2391_v7, %v2342_v50 }
 0x3bf   : > { %v3121_v52 = vpack.c.bf16 %v3013_v26, %v3012_v51  ;;  %v2296_v49 = vpop.f32.mrf.mxu0  ;;  %v2345_v12 = vpop.f32.mrf.mxu1  ;;  %v2562_v23 = vunpack.c.l.bf16 %v2441_v29  ;;  %v2563_v30 = vunpack.c.h.bf16 %v2441_v29 }
 0x3c0   : > { %v3202_v10 = vunpack.c.l.bf16 %v3120_v11  ;;  %v3203_v18 = vunpack.c.h.bf16 %v3120_v11  ;;  %v2564_v40 = vunpack.c.l.bf16 %v2442_v46  ;;  %v2565_v38 = vunpack.c.h.bf16 %v2442_v46 }
 0x3c1   : > { %v3204_v19 = vunpack.c.l.bf16 %v3121_v52  ;;  %v3205_v20 = vunpack.c.h.bf16 %v3121_v52  ;;  %v2698_v36 = vadd.f32 %v4931_v22, %v2562_v23  ;;  %v2699_v37 = vadd.f32 %v4933_v13, %v2563_v30 }
 0x3c2   : > { %v4968_v21 = vmax.f32 %v3380_v48, %v3202_v10  ;;  %v4970_v63 = vmax.f32 %v3401_v3, %v3203_v18  ;;  %v2700_v43 = vadd.f32 %v4935_v15, %v2564_v40  ;;  %v2701_v50 = vadd.f32 %v4937_v17, %v2565_v38 }
 0x3c3   : > { %v4972_v14 = vmax.f32 %v3422_v62, %v3204_v19  ;;  %v4974_v59 = vmax.f32 %v3443_v4, %v3205_v20  ;;  %v3018_v16 = vmax.f32 %v2698_v36, 0.0  ;;  %v3019_v44 = vmax.f32 %v2699_v37, 0.0 }
 0x3c4   : > { %v2247_v60 = vpop.f32.mrf.mxu3  ;;  %v3020_v62 = vmax.f32 %v2700_v43, 0.0  ;;  %v3021_v4 = vmax.f32 %v2701_v50, 0.0 }
 0x3c5   : > { %v2445_v31 = vpack.c.bf16 %v2296_v49, %v2247_v60  ;;  %v3124_v3 = vpack.c.bf16 %v3019_v44, %v3018_v16 }
 0x3c6   : > { %v2394_v0 = vpop.f32.mrf.mxu2  ;;  %v3125_v49 = vpack.c.bf16 %v3021_v4, %v3020_v62 }
 0x3c7   : > { %v2298_v24 = vpop.f32.mrf.mxu0  ;;  %v2347_v28 = vpop.f32.mrf.mxu1  ;;  %v2570_v2 = vunpack.c.l.bf16 %v2445_v31  ;;  %v2571_v39 = vunpack.c.h.bf16 %v2445_v31  ;;  %v2446_v42 = vpack.c.bf16 %v2394_v0, %v2345_v12  ;;  %v3210_v11 = vunpack.c.l.bf16 %v3124_v3 }
 0x3c8   : > { %v3211_v52 = vunpack.c.h.bf16 %v3124_v3 }
 0x3c9   : > { %v2706_v45 = vadd.f32 %v4931_v22, %v2570_v2  ;;  %v2707_v47 = vadd.f32 %v4933_v13, %v2571_v39  ;;  %v2572_v54 = vunpack.c.l.bf16 %v2446_v42  ;;  %v2573_v57 = vunpack.c.h.bf16 %v2446_v42 }
 0x3ca   : > { %v3382_v31 = vmax.f32 %v4968_v21, %v3210_v11  ;;  %v3403_v36 = vmax.f32 %v4970_v63, %v3211_v52 }
 0x3cb   : > { %v3026_v5 = vmax.f32 %v2706_v45, 0.0  ;;  %v3027_v55 = vmax.f32 %v2707_v47, 0.0  ;;  %v2708_v56 = vadd.f32 %v4935_v15, %v2572_v54  ;;  %v2709_v8 = vadd.f32 %v4937_v17, %v2573_v57 }
 0x3cc   : > { %v2249_v53 = vpop.f32.mrf.mxu3 }
 0x3cd   : > { %v2449_v27 = vpack.c.bf16 %v2298_v24, %v2249_v53  ;;  %v3128_v12 = vpack.c.bf16 %v3027_v55, %v3026_v5  ;;  %v3028_v10 = vmax.f32 %v2708_v56, 0.0  ;;  %v3029_v18 = vmax.f32 %v2709_v8, 0.0 }
 0x3ce   : > { %v2396_v32 = vpop.f32.mrf.mxu2 }
 0x3cf   : > { %v2301_v33 = vpop.f32.mrf.mxu0  ;;  %v2450_v58 = vpack.c.bf16 %v2396_v32, %v2347_v28  ;;  %v2578_v61 = vunpack.c.l.bf16 %v2449_v27  ;;  %v2579_v1 = vunpack.c.h.bf16 %v2449_v27  ;;  %v3212_v32 = vunpack.c.l.bf16 %v3125_v49 }
 0x3d0   : > { %v2350_v34 = vpop.f32.mrf.mxu1  ;;  %v3218_v37 = vunpack.c.l.bf16 %v3128_v12  ;;  %v3129_v38 = vpack.c.bf16 %v3029_v18, %v3028_v10  ;;  %v3219_v21 = vunpack.c.h.bf16 %v3128_v12 }
 0x3d1   : > { %v2580_v9 = vunpack.c.l.bf16 %v2450_v58  ;;  %v2581_v26 = vunpack.c.h.bf16 %v2450_v58  ;;  %v2714_v19 = vadd.f32 %v4931_v22, %v2578_v61  ;;  %v2715_v20 = vadd.f32 %v4933_v13, %v2579_v1 }
 0x3d2   : > { %v3424_v63 = vmax.f32 %v4972_v14, %v3212_v32  ;;  %v3383_v58 = vmax.f32 %v3382_v31, %v3218_v37 }
 0x3d3   : > { %v2716_v60 = vadd.f32 %v4935_v15, %v2580_v9  ;;  %v2717_v46 = vadd.f32 %v4937_v17, %v2581_v26  ;;  %v3034_v2 = vmax.f32 %v2714_v19, 0.0  ;;  %v3035_v39 = vmax.f32 %v2715_v20, 0.0 }
 0x3d4   : > { %v2252_v41 = vpop.f32.mrf.mxu3  ;;  %v3404_v9 = vmax.f32 %v3403_v36, %v3219_v21  ;;  %v3221_v26 = vunpack.c.h.bf16 %v3129_v38 }
 0x3d5   : > { %v2453_v51 = vpack.c.bf16 %v2301_v33, %v2252_v41  ;;  %v3213_v33 = vunpack.c.h.bf16 %v3125_v49  ;;  %v3036_v42 = vmax.f32 %v2716_v60, 0.0  ;;  %v3037_v16 = vmax.f32 %v2717_v46, 0.0 }
 0x3d7   : > { %v2399_v25 = vpop.f32.mrf.mxu2  ;;  %v2303_v35 = vpop.f32.mrf.mxu0  ;;  %v2586_v0 = vunpack.c.l.bf16 %v2453_v51  ;;  %v2587_v24 = vunpack.c.h.bf16 %v2453_v51  ;;  %v3445_v27 = vmax.f32 %v4974_v59, %v3213_v33  ;;  %v3133_v55 = vpack.c.bf16 %v3037_v16, %v3036_v42 }
 0x3d8   : > { %v2352_v48 = vpop.f32.mrf.mxu1  ;;  %v2454_v53 = vpack.c.bf16 %v2399_v25, %v2350_v34 }
 0x3d9   : > { %v2722_v43 = vadd.f32 %v4931_v22, %v2586_v0  ;;  %v2723_v41 = vadd.f32 %v4933_v13, %v2587_v24  ;;  %v3228_v19 = vunpack.c.l.bf16 %v3133_v55  ;;  %v3229_v36 = vunpack.c.h.bf16 %v3133_v55 }
 0x3da   : > { %v2588_v34 = vunpack.c.l.bf16 %v2454_v53  ;;  %v2589_v44 = vunpack.c.h.bf16 %v2454_v53 }
 0x3db   : > { %v3042_v3 = vmax.f32 %v2722_v43, 0.0  ;;  %v3043_v62 = vmax.f32 %v2723_v41, 0.0 }
 0x3dc   : > { %v2254_v7 = vpop.f32.mrf.mxu3  ;;  %v2724_v56 = vadd.f32 %v4935_v15, %v2588_v34  ;;  %v2725_v8 = vadd.f32 %v4937_v17, %v2589_v44 }
 0x3dd   : > { %v2457_v23 = vpack.c.bf16 %v2303_v35, %v2254_v7  ;;  %v3220_v35 = vunpack.c.l.bf16 %v3129_v38  ;;  %v3136_v18 = vpack.c.bf16 %v3043_v62, %v3042_v3 }
 0x3de   : > { %v3044_v20 = vmax.f32 %v2724_v56, 0.0  ;;  %v3045_v60 = vmax.f32 %v2725_v8, 0.0 }
 0x3df   : > { %v2401_v28 = vpop.f32.mrf.mxu2  ;;  %v2306_v29 = vpop.f32.mrf.mxu0  ;;  %v2594_v50 = vunpack.c.l.bf16 %v2457_v23  ;;  %v2595_v47 = vunpack.c.h.bf16 %v2457_v23  ;;  %v3425_v49 = vmax.f32 %v3424_v63, %v3220_v35  ;;  %v3234_v37 = vunpack.c.l.bf16 %v3136_v18 }
 0x3e0   : > { %v2355_v30 = vpop.f32.mrf.mxu1  ;;  %v2458_v40 = vpack.c.bf16 %v2401_v28, %v2352_v48  ;;  %v3132_v48 = vpack.c.bf16 %v3035_v39, %v3034_v2  ;;  %v3137_v39 = vpack.c.bf16 %v3045_v60, %v3044_v20  ;;  %v3235_v63 = vunpack.c.h.bf16 %v3136_v18 }
 0x3e1   : > { %v2730_v61 = vadd.f32 %v4931_v22, %v2594_v50  ;;  %v2731_v14 = vadd.f32 %v4933_v13, %v2595_v47  ;;  %v3426_v34 = vmax.f32 %v3425_v49, %v3228_v19 }
 0x3e2   : > { %v2596_v54 = vunpack.c.l.bf16 %v2458_v40  ;;  %v2597_v57 = vunpack.c.h.bf16 %v2458_v40  ;;  %v3226_v12 = vunpack.c.l.bf16 %v3132_v48  ;;  %v3227_v10 = vunpack.c.h.bf16 %v3132_v48 }
 0x3e3   : > { %v3050_v0 = vmax.f32 %v2730_v61, 0.0  ;;  %v3051_v28 = vmax.f32 %v2731_v14, 0.0  ;;  %v3236_v3 = vunpack.c.l.bf16 %v3137_v39 }
 0x3e4   : > { %v2257_v45 = vpop.f32.mrf.mxu3  ;;  %v2732_v59 = vadd.f32 %v4935_v15, %v2596_v54  ;;  %v2733_v51 = vadd.f32 %v4937_v17, %v2597_v57  ;;  %v3384_v40 = vmax.f32 %v3383_v58, %v3226_v12  ;;  %v3405_v16 = vmax.f32 %v3404_v9, %v3227_v10 }
 0x3e5   : > { %v2461_v25 = vpack.c.bf16 %v2306_v29, %v2257_v45  ;;  %v3140_v44 = vpack.c.bf16 %v3051_v28, %v3050_v0 }
 0x3e6   : > { %v3052_v29 = vmax.f32 %v2732_v59, 0.0  ;;  %v3053_v46 = vmax.f32 %v2733_v51, 0.0  ;;  %v3385_v48 = vmax.f32 %v3384_v40, %v3234_v37  ;;  %v3406_v59 = vmax.f32 %v3405_v16, %v3235_v63 }
 0x3e7   : > { %v2404_v4 = vpop.f32.mrf.mxu2  ;;  %v2308_v5 = vpop.f32.mrf.mxu0  ;;  %v2602_v7 = vunpack.c.l.bf16 %v2461_v25  ;;  %v2603_v11 = vunpack.c.h.bf16 %v2461_v25  ;;  %v3242_v55 = vunpack.c.l.bf16 %v3140_v44  ;;  %v3243_v56 = vunpack.c.h.bf16 %v3140_v44 }
 0x3e8   : > { %v2357_v1 = vpop.f32.mrf.mxu1  ;;  %v2462_v52 = vpack.c.bf16 %v2404_v4, %v2355_v30  ;;  %v3446_v30 = vmax.f32 %v3445_v27, %v3221_v26  ;;  %v3141_v50 = vpack.c.bf16 %v3053_v46, %v3052_v29 }
 0x3e9   : > { %v2738_v23 = vadd.f32 %v4931_v22, %v2602_v7  ;;  %v2739_v31 = vadd.f32 %v4933_v13, %v2603_v11  ;;  %v3386_v20 = vmax.f32 %v3385_v48, %v3242_v55  ;;  %v3407_v60 = vmax.f32 %v3406_v59, %v3243_v56 }
 0x3ea   : > { %v2604_v32 = vunpack.c.l.bf16 %v2462_v52  ;;  %v2605_v33 = vunpack.c.h.bf16 %v2462_v52  ;;  %v3447_v35 = vmax.f32 %v3446_v30, %v3229_v36  ;;  %v3244_v61 = vunpack.c.l.bf16 %v3141_v50  ;;  %v1169_v30 = vpop.trf.xlu2 }
 0x3eb   : > { %v3058_v21 = vmax.f32 %v2738_v23, 0.0  ;;  %v3059_v47 = vmax.f32 %v2739_v31, 0.0  ;;  %v3427_v52 = vmax.f32 %v3426_v34, %v3236_v3 }
 0x3ec   : > { %v2259_v24 = vpop.f32.mrf.mxu3  ;;  %v2740_v54 = vadd.f32 %v4935_v15, %v2604_v32  ;;  %v2741_v57 = vadd.f32 %v4937_v17, %v2605_v33 }
 0x3ed   : > { %v2465_v53 = vpack.c.bf16 %v2308_v5, %v2259_v24  ;;  %v3237_v5 = vunpack.c.h.bf16 %v3137_v39  ;;  %v3245_v24 = vunpack.c.h.bf16 %v3141_v50  ;;  %v3428_v28 = vmax.f32 %v3427_v52, %v3244_v61 }
 0x3ee   : > { %v3060_v9 = vmax.f32 %v2740_v54, 0.0  ;;  %v3061_v14 = vmax.f32 %v2741_v57, 0.0 }
 0x3ef   : > { %v2406_v38 = vpop.f32.mrf.mxu2  ;;  %v2311_v2 = vpop.f32.mrf.mxu0  ;;  %v2610_v42 = vunpack.c.l.bf16 %v2465_v53  ;;  %v2611_v43 = vunpack.c.h.bf16 %v2465_v53  ;;  %v3448_v19 = vmax.f32 %v3447_v35, %v3237_v5 }
 0x3f0   : > { %v2466_v41 = vpack.c.bf16 %v2406_v38, %v2357_v1  ;;  %v2360_v45 = vpop.f32.mrf.mxu1  ;;  %v5006_v1 = vpack.c.bf16 %v3059_v47, %v3058_v21  ;;  %v3145_v46 = vpack.c.bf16 %v3061_v14, %v3060_v9  ;;  %v1181_v38 = vunpack.c.l.b16 %v1169_v30 }
 0x3f1   : > { %v2746_v27 = vadd.f32 %v4931_v22, %v2610_v42  ;;  %v2747_v58 = vadd.f32 %v4933_v13, %v2611_v43  ;;  %v3449_v16 = vmax.f32 %v3448_v19, %v3245_v24 }
 0x3f2   : > { %v2612_v25 = vunpack.c.l.bf16 %v2466_v41  ;;  %v2613_v62 = vunpack.c.h.bf16 %v2466_v41  ;;  %v3250_v29 = vunpack.c.l.bf16 %v5006_v1  ;;  %v3251_v34 = vunpack.c.h.bf16 %v5006_v1  ;;  %v1170_v59 = vpop.trf.xlu2 }
 0x3f3   : > { %v3066_v51 = vmax.f32 %v2746_v27, 0.0  ;;  %v3067_v26 = vmax.f32 %v2747_v58, 0.0  ;;  %v1189_v44 = vpack.c.b16 %v1181_v38, %v1181_v38  ;;  %v3252_v21 = vunpack.c.l.bf16 %v3145_v46 }
 0x3f4   : > { %v2262_v4 = vpop.f32.mrf.mxu3  ;;  %v2748_v7 = vadd.f32 %v4935_v15, %v2612_v25  ;;  %v2749_v49 = vadd.f32 %v4937_v17, %v2613_v62  ;;  %v3253_v47 = vunpack.c.h.bf16 %v3145_v46  ;;  %v3408_v61 = vmax.f32 %v3407_v60, %v3251_v34 }
 0x3f5   : > { %v2469_v8 = vpack.c.bf16 %v2311_v2, %v2262_v4  ;;  %v3148_v53 = vpack.c.bf16 %v3067_v26, %v3066_v51  ;;  %v1182_v2 = vunpack.c.h.b16 %v1169_v30  ;;  %1205 = vst [vmem:[%s5020_s14] sm:$0xf] %v1189_v44  ;;  %v3429_v1 = vmax.f32 %v3428_v28, %v3252_v21 }
 0x3f6   : > { %v3068_v23 = vmax.f32 %v2748_v7, 0.0  ;;  %v3069_v40 = vmax.f32 %v2749_v49, 0.0  ;;  %v3450_v9 = vmax.f32 %v3449_v16, %v3253_v47  ;;  %v1183_v19 = vunpack.c.l.b16 %v1170_v59 }
 0x3f7   : > { %v2409_v11 = vpop.f32.mrf.mxu2  ;;  %v2618_v12 = vunpack.c.l.bf16 %v2469_v8  ;;  %v2313_v18 = vpop.f32.mrf.mxu0  ;;  %v2619_v0 = vunpack.c.h.bf16 %v2469_v8  ;;  %v1190_v50 = vpack.c.b16 %v1182_v2, %v1182_v2  ;;  %v3258_v54 = vunpack.c.l.bf16 %v3148_v53 }
 0x3f8   : > { %v2470_v10 = vpack.c.bf16 %v2409_v11, %v2360_v45  ;;  %v2362_v33 = vpop.f32.mrf.mxu1  ;;  %v3387_v45 = vmax.f32 %v3386_v20, %v3250_v29  ;;  %v3149_v63 = vpack.c.bf16 %v3069_v40, %v3068_v23  ;;  %v3259_v14 = vunpack.c.h.bf16 %v3148_v53 }
 0x3f9   : > { %v2754_v36 = vadd.f32 %v4931_v22, %v2618_v12  ;;  %v2755_v39 = vadd.f32 %v4933_v13, %v2619_v0  ;;  %1206 = vst [vmem:[%s5020_s14 + $0x4] sm:$0xf] %v1190_v50  ;;  %v1184_v24 = vunpack.c.h.b16 %v1170_v59  ;;  %v1191_v23 = vpack.c.b16 %v1183_v19, %v1183_v19 }
 0x3fa   : > { %v2620_v31 = vunpack.c.l.bf16 %v2470_v10  ;;  %v2621_v32 = vunpack.c.h.bf16 %v2470_v10  ;;  %v3260_v51 = vunpack.c.l.bf16 %v3149_v63  ;;  %v3388_v49 = vmax.f32 %v3387_v45, %v3258_v54  ;;  %v1171_v50 = vpop.trf.xlu2 }
 0x3fb   : > { %v3074_v35 = vmax.f32 %v2754_v36, 0.0  ;;  %v3075_v48 = vmax.f32 %v2755_v39, 0.0  ;;  %v3261_v20 = vunpack.c.h.bf16 %v3149_v63  ;;  %v3409_v28 = vmax.f32 %v3408_v61, %v3259_v14  ;;  %1207 = vst [vmem:[%s5020_s14 + $0x8] sm:$0xf] %v1191_v23 }
 0x3fc   : > { %v2264_v37 = vpop.f32.mrf.mxu3  ;;  %v2756_v42 = vadd.f32 %v4935_v15, %v2620_v31  ;;  %v2757_v43 = vadd.f32 %v4937_v17, %v2621_v32  ;;  %v3430_v31 = vmax.f32 %v3429_v1, %v3260_v51  ;;  %v1192_v38 = vpack.c.b16 %v1184_v24, %v1184_v24 }
 0x3fd   : > { %v2473_v41 = vpack.c.bf16 %v2313_v18, %v2264_v37  ;;  %v3152_v0 = vpack.c.bf16 %v3075_v48, %v3074_v35  ;;  %v3451_v2 = vmax.f32 %v3450_v9, %v3261_v20  ;;  %v1186_v63 = vunpack.c.h.b16 %v1171_v50 }
 0x3fe   : > { %v3076_v3 = vmax.f32 %v2756_v42, 0.0  ;;  %v3077_v62 = vmax.f32 %v2757_v43, 0.0  ;;  %1208 = vst [vmem:[%s5020_s14 + $0xc] sm:$0xf] %v1192_v38 }
 0x3ff   : > { %v2411_v57 = vpop.f32.mrf.mxu2  ;;  %v2626_v27 = vunpack.c.l.bf16 %v2473_v41  ;;  %v2627_v58 = vunpack.c.h.bf16 %v2473_v41  ;;  %v2316_v8 = vpop.f32.mrf.mxu0  ;;  %v3266_v39 = vunpack.c.l.bf16 %v3152_v0  ;;  %v3267_v42 = vunpack.c.h.bf16 %v3152_v0 }
 0x400   : > { %v2474_v25 = vpack.c.bf16 %v2411_v57, %v2362_v33  ;;  %v2365_v10 = vpop.f32.mrf.mxu1  ;;  %v3153_v60 = vpack.c.bf16 %v3077_v62, %v3076_v3  ;;  %v1185_v57 = vunpack.c.l.b16 %v1171_v50 }
 0x401   : > { %v2762_v4 = vadd.f32 %v4931_v22, %v2626_v27  ;;  %v2763_v5 = vadd.f32 %v4933_v13, %v2627_v58  ;;  %v3389_v48 = vmax.f32 %v3388_v49, %v3266_v39  ;;  %v3410_v3 = vmax.f32 %v3409_v28, %v3267_v42 }
 0x402   : > { %v2628_v55 = vunpack.c.l.bf16 %v2474_v25  ;;  %v2629_v56 = vunpack.c.h.bf16 %v2474_v25  ;;  %v3268_v43 = vunpack.c.l.bf16 %v3153_v60  ;;  %v3269_v45 = vunpack.c.h.bf16 %v3153_v60  ;;  %v1172_v24 = vpop.trf.xlu2 }
 0x403   : > { %v3082_v26 = vmax.f32 %v2762_v4, 0.0  ;;  %v3083_v7 = vmax.f32 %v2763_v5, 0.0  ;;  %v1193_v62 = vpack.c.b16 %v1185_v57, %v1185_v57  ;;  %v1194_v4 = vpack.c.b16 %v1186_v63, %v1186_v63 }
 0x404   : > { %v2764_v11 = vadd.f32 %v4935_v15, %v2628_v55  ;;  %v2267_v52 = vpop.f32.mrf.mxu3  ;;  %v2765_v12 = vadd.f32 %v4937_v17, %v2629_v56  ;;  %v3431_v9 = vmax.f32 %v3430_v31, %v3268_v43  ;;  %v1187_v23 = vunpack.c.l.b16 %v1172_v24 }
 0x405   : > { %v2477_v18 = vpack.c.bf16 %v2316_v8, %v2267_v52  ;;  %v3156_v32 = vpack.c.bf16 %v3083_v7, %v3082_v26  ;;  %1209 = vst [vmem:[%s5020_s14 + $0x10] sm:$0xf] %v1193_v62  ;;  %v3452_v26 = vmax.f32 %v3451_v2, %v3269_v45  ;;  %v1188_v31 = vunpack.c.h.b16 %v1172_v24 }
 0x406   : > { %v3084_v33 = vmax.f32 %v2764_v11, 0.0  ;;  %v3085_v40 = vmax.f32 %v2765_v12, 0.0  ;;  %1210 = vst [vmem:[%s5020_s14 + $0x14] sm:$0xf] %v1194_v4 }
 0x407   : > { %v2634_v29 = vunpack.c.l.bf16 %v2477_v18  ;;  %v2635_v46 = vunpack.c.h.bf16 %v2477_v18  ;;  %v2414_v53 = vpop.f32.mrf.mxu2  ;;  %v3274_v21 = vunpack.c.l.bf16 %v3156_v32  ;;  %v2318_v47 = vpop.f32.mrf.mxu0  ;;  %v3275_v5 = vunpack.c.h.bf16 %v3156_v32 }
 0x408   : > { %v2478_v30 = vpack.c.bf16 %v2414_v53, %v2365_v10  ;;  %v3157_v27 = vpack.c.bf16 %v3085_v40, %v3084_v33  ;;  %v2367_v61 = vpop.f32.mrf.mxu1  ;;  %v1196_v38 = vpack.c.b16 %v1188_v31, %v1188_v31 }
 0x409   : > { %v2770_v36 = vadd.f32 %v4931_v22, %v2634_v29  ;;  %v2771_v37 = vadd.f32 %v4933_v13, %v2635_v46  ;;  %v3390_v7 = vmax.f32 %v3389_v48, %v3274_v21  ;;  %v3411_v19 = vmax.f32 %v3410_v3, %v3275_v5 }
 0x40a   : > { %v2636_v34 = vunpack.c.l.bf16 %v2478_v30  ;;  %v2637_v44 = vunpack.c.h.bf16 %v2478_v30  ;;  %v3276_v11 = vunpack.c.l.bf16 %v3157_v27  ;;  %v3277_v20 = vunpack.c.h.bf16 %v3157_v27  ;;  %1212 = vst [vmem:[%s5020_s14 + $0x1c] sm:$0xf] %v1196_v38 }
 0x40b   : > { %v3090_v41 = vmax.f32 %v2770_v36, 0.0  ;;  %v3091_v16 = vmax.f32 %v2771_v37, 0.0 }
 0x40c   : > { %v2269_v54 = vpop.f32.mrf.mxu3  ;;  %v2772_v58 = vadd.f32 %v4935_v15, %v2636_v34  ;;  %v2773_v25 = vadd.f32 %v4937_v17, %v2637_v44  ;;  %v3432_v32 = vmax.f32 %v3431_v9, %v3276_v11  ;;  %v3453_v36 = vmax.f32 %v3452_v26, %v3277_v20 }
 0x40d   : > { %v2481_v35 = vpack.c.bf16 %v2318_v47, %v2269_v54  ;;  %v3160_v55 = vpack.c.bf16 %v3091_v16, %v3090_v41 }
 0x40e   : > { %v3092_v56 = vmax.f32 %v2772_v58, 0.0  ;;  %v3093_v8 = vmax.f32 %v2773_v25, 0.0 }
 0x40f   : > { %v2416_v1 = vpop.f32.mrf.mxu2  ;;  %v2642_v14 = vunpack.c.l.bf16 %v2481_v35  ;;  %v2643_v59 = vunpack.c.h.bf16 %v2481_v35  ;;  %v3282_v0 = vunpack.c.l.bf16 %v3160_v55  ;;  %v3283_v60 = vunpack.c.h.bf16 %v3160_v55 }
 0x410   : > { %v2482_v51 = vpack.c.bf16 %v2416_v1, %v2367_v61  ;;  %v3161_v52 = vpack.c.bf16 %v3093_v8, %v3092_v56 }
 0x411   : > { %v2778_v49 = vadd.f32 %v4931_v22, %v2642_v14  ;;  %v2779_v12 = vadd.f32 %v4933_v13, %v2643_v59  ;;  %v3391_v37 = vmax.f32 %v3390_v7, %v3282_v0 }
 0x412   : > { %v2644_v10 = vunpack.c.l.bf16 %v2482_v51  ;;  %v2645_v18 = vunpack.c.h.bf16 %v2482_v51  ;;  %v3284_v13 = vunpack.c.l.bf16 %v3161_v52  ;;  %v3285_v53 = vunpack.c.h.bf16 %v3161_v52 }
 0x413   : > { %v3098_v28 = vmax.f32 %v2778_v49, 0.0  ;;  %v3099_v29 = vmax.f32 %v2779_v12, 0.0 }
 0x414   : > { %v2780_v46 = vadd.f32 %v4935_v15, %v2644_v10  ;;  %v2781_v22 = vadd.f32 %v4937_v17, %v2645_v18  ;;  %v1195_v15 = vpack.c.b16 %v1187_v23, %v1187_v23  ;;  %v3412_v17 = vmax.f32 %v3411_v19, %v3283_v60 }
 0x415   : > { %v3164_v33 = vpack.c.bf16 %v3099_v29, %v3098_v28  ;;  %v3433_v43 = vmax.f32 %v3432_v32, %v3284_v13  ;;  %v3454_v41 = vmax.f32 %v3453_v36, %v3285_v53 }
 0x416   : > { %v3100_v30 = vmax.f32 %v2780_v46, 0.0  ;;  %v3101_v40 = vmax.f32 %v2781_v22, 0.0  ;;  %1211 = vst [vmem:[%s5020_s14 + $0x18] sm:$0xf] %v1195_v15 }
 0x417   : > { %v3290_v2 = vunpack.c.l.bf16 %v3164_v33  ;;  %v3291_v39 = vunpack.c.h.bf16 %v3164_v33 }
 0x418   : > { %v3165_v42 = vpack.c.bf16 %v3101_v40, %v3100_v30 }
 0x419   : > { %v3392_v16 = vmax.f32 %v3391_v37, %v3290_v2  ;;  %v3413_v34 = vmax.f32 %v3412_v17, %v3291_v39 }
 0x41a   : > { %v3292_v44 = vunpack.c.l.bf16 %v3165_v42  ;;  %v3293_v50 = vunpack.c.h.bf16 %v3165_v42 }
 0x41b   : > { %4282 = shalt.err (!%p4279_p9)
}
 0x41c   : > { %s4377_s14 = smov 64   ;;  %s4378_s3 = smov 4   ;;  %v3393_v45 = vrot.slane %v3392_v16, 4  ;;  %v3414_v21 = vrot.slane %v3413_v34, 4  ;;  %v3434_v47 = vmax.f32 %v3433_v43, %v3292_v44  ;;  %v3455_v54 = vmax.f32 %v3454_v41, %v3293_v50 }
 0x41d   : > { %4111 = dma.vmem_to_hbm [thread:$0]  (%p4484_p4), %s5048_s18, 512, %s3534_s19, %s3513_s28, %s4377_s14, %s4377_s14, %s4378_s3   ;;  %vm3501_vm4 = vcmask 1044484   ;;  %vm3503_vm5 = vcmask 1046534   ;;  %vm3505_vm6 = vcmask 1045508   ;;  %vm3507_vm7 = vcmask 1043456  }
 0x41e   : > { %v3394_v57 = vmax.f32 %v3392_v16, %v3393_v45  ;;  %v3415_v63 = vmax.f32 %v3413_v34, %v3414_v21  ;;  %v3435_v27 = vrot.slane %v3434_v47, 4  ;;  %v3456_v58 = vrot.slane %v3455_v54, 4  ;;  %s3679_s0 = sshll.u32 %s5010_s20, 3  ;;  %s4014_s1 = sshll.u32 %s4361_s24, 3 }
 0x41f   : > { %s3546_s18 = scalar_lea.hbm %s5115_s12, %s4014_s1  ;;  %s459_s19 = scalar_lea.vmem [#allocation6], %s3679_s0 }
 0x420   : > { %v3395_v25 = vrot.slane %v3394_v57, 2  ;;  %v3416_v35 = vrot.slane %v3415_v63, 2  ;;  %v3436_v48 = vmax.f32 %v3434_v47, %v3435_v27  ;;  %v3457_v3 = vmax.f32 %v3455_v54, %v3456_v58  ;;  %s3548_s24 = sshll.u32 %s459_s19, 4  ;;  %s3550_s28 = sshll.u32 %s3546_s18, 4  ;;  %s3549_s24 = int_to_ptr.vmem [resolvable:$true] %s3548_s24  ;;  %s3551_s28 = int_to_ptr.hbm [resolvable:$true] %s3550_s28 }
 0x421   : > { %s3518_s29 = scalar_lea.sflag [#allocation7], %s5010_s20  ;;  %s4297_s27 = sshra.s32 %s3551_s28, 4  ;;  %s4298_s27 = int_to_ptr.hbm [resolvable:$true] %s4297_s27 }
 0x422   : > { %v3396_v62 = vmax.f32 %v3394_v57, %v3395_v25  ;;  %v3417_v4 = vmax.f32 %v3415_v63, %v3416_v35  ;;  %v3437_v5 = vrot.slane %v3436_v48, 2  ;;  %v3458_v55 = vrot.slane %v3457_v3, 2  ;;  %s4299_s30 = scalar_lea.hbm %s4298_s27, 8  ;;  %s4303_s0 = scalar_lea.hbm %s5115_s12, 16 }
 0x423   : > { %p4300_p10 = scmp.ne.s32.totalorder %s4298_s27, %s4299_s30  ;;  %p4304_p13 = scmp.lt.s32.totalorder %s4298_s27, %s5115_s12 }
 0x424   : > { %v3397_v56 = vrot.slane %v3396_v62, 1  ;;  %v3418_v8 = vrot.slane %v3417_v4, 1  ;;  %v3438_v61 = vmax.f32 %v3436_v48, %v3437_v5  ;;  %v3459_v1 = vmax.f32 %v3457_v3, %v3458_v55  ;;  %p4305_p0 = scmp.lt.s32.totalorder %s4303_s0, %s4299_s30 }
 0x425   : > { %p4301_p11 = pnand %p4300_p10, %p4484_p4 }
 0x426   : > { %v3398_v9 = vmax.f32 %v3396_v62, %v3397_v56  ;;  %v3419_v14 = vmax.f32 %v3417_v4, %v3418_v8  ;;  %v3439_v59 = vrot.slane %v3438_v61, 1  ;;  %v3460_v51 = vrot.slane %v3459_v1, 1  ;;  %p4306_p1 = por %p4305_p0, %p4304_p13 }
 0x427   : > { %p4302_p12 = pneg %p4301_p11 }
 0x428   : > { %v3464_v26 = vpack.c.bf16 %v3419_v14, %v3398_v9  ;;  %v3440_v7 = vmax.f32 %v3438_v61, %v3439_v59  ;;  %v3461_v11 = vmax.f32 %v3459_v1, %v3460_v51 }
 0x429   : > { %p4307_p2 = pnand %p4306_p1, %p4302_p12 }
 0x42a   : > { %v3470_v52 = vunpack.c.l.bf16 %v3464_v26  ;;  %v3471_v49 = vunpack.c.h.bf16 %v3464_v26  ;;  %v3465_v12 = vpack.c.bf16 %v3461_v11, %v3440_v7 }
 0x42c   : > { %v3491_v10 = vrot.slane %v3470_v52, 4  ;;  %v3492_v18 = vrot.slane %v3471_v49, 3  ;;  %v3472_v19 = vunpack.c.l.bf16 %v3465_v12  ;;  %v3473_v20 = vunpack.c.h.bf16 %v3465_v12 }
 0x42e   : > { %v3493_v0 = vrot.slane %v3472_v19, 2  ;;  %v3494_v60 = vrot.slane %v3473_v20, 1  ;;  %v3502_v24 = vsel %vm3501_vm4, %v3491_v10, %v3492_v18 }
 0x430   : > { %v3504_v28 = vsel %vm3503_vm5, %v3493_v0, %v3494_v60 }
 0x431   : > { %v3506_v29 = vsel %vm3505_vm6, %v3502_v24, %v3504_v28 }
 0x432   : > { %v3508_v46 = vsel %vm3507_vm7, %v4958_v6, %v3506_v29 }
 0x433   : > { %3511 = vst [vmem:[%s459_s19] sm:$0xff] %v3508_v46 }
 0x434   : > { %4310 = shalt.err (!%p4307_p2)
}
 0x435   : > { %4112 = dma.vmem_to_hbm [thread:$0]  (%p4484_p4), %s3549_s24, 128, %s3551_s28, %s3518_s29  }
 0x436 PF: > { %p4128_p3 = scmp.ge.s32.totalorder %s4369_s26, 2  ;;  %s3562_s20 = sand.u32 1, %s4349_s21  }
 0x437   : > { %s3563_s3 = scalar_lea.sflag [#allocation4], %s3562_s20 }
 0x438   : > { %p4120_p5 = pnand %p4128_p3, %p4491_p8 }
 0x43a   : > { %p4121_p6 = pneg %p4120_p5 }
 0x43c   : > { %4340 = dma.done.wait (%p4121_p6), %s3563_s3, 512  }
 0x43d   : > { %4342 = vsyncadd (%p4121_p6), %s3563_s3, 4294966784  ;;  %s3573_s18 = scalar_lea.sflag [#allocation7], %s3562_s20 }
 0x43e   : > { %4344 = dma.done.wait (%p4121_p6), %s3573_s18, 128  }
 0x43f   : > { %4346 = vsyncadd (%p4121_p6), %s3573_s18, 4294967168  ;;  %s30_s26 = sadd.s32 1, %s4369_s26   ;;  %s5128_s13 = sld [smem:[#allocation11_spill]] }
 0x440   : > { %p27_p7 = scmp.ge.s32.totalorder %s30_s26, 4   ;;  %s5129_s21 = smov %s4353_s22 }
 0x441   : > { %s5130_s22 = smov %s4357_s23  ;;  %s5131_s23 = smov %s4497_s16 }
 0x442   : > { %s5132_s24 = smov %s4365_s25  ;;  %29 = sbr.rel (!%p27_p7) target bundleno = 12 (0xc), region = 125 }
 0x445   : > { %s5133_s25 = smov %s5128_s13 }
 0x447   :  { %3579 = vsyncpa [#allocation3], 1 }
 0x448   :  { %3581 = vsyncpa [#allocation3 + $0x1], 1 }
 0x449   :  { %3582 = vsyncpa [#allocation4], 1 }
 0x44a   :  { %3584 = vsyncpa [#allocation4 + $0x1], 1 }
 0x44b   :  { %3585 = vsyncpa [#allocation7], 1 }
 0x44c   :  { %3587 = vsyncpa [#allocation7 + $0x1], 1 }

</bundles_post_ra>
